<compile_context>
chip_gen: v7x
topology: tpu7x:2x2x1
jax: 0.10.0
libtpu: 0.0.40
codegen_flags: <defaults>
</compile_context>

<pallas_src>
import math
import functools
import numpy as np
import jax
import jax.numpy as jnp
from jax.experimental import pallas as pl
from jax.experimental.pallas import tpu as pltpu

_IMAGENET_MEAN = [0.485, 0.456, 0.406]
_IMAGENET_STDDEV = [0.229, 0.224, 0.225]

NUM_CLASSES = 1000            # get_num_classes('imagenet')
NUM_CLASSES_PADDED = 1024     # lane-dense (multiple of 128)
SIGMA = 0.25                  # noise level hyperparameter
ALPHA = 0.001                 # failure probability
N_SAMPLES = 100               # Monte-Carlo samples per image (module default N=100)
SAMPLES_PER_BLOCK = 112       # multiple of 16 (bf16 sublane pack); only 12 dead rows
NUM_SAMPLE_BLOCKS = pl.cdiv(N_SAMPLES, SAMPLES_PER_BLOCK)
ABSTAIN = -1


# -------------------- Pallas kernel (fused classify + argmax + histogram) --------------------

def _smooth_counts_kernel(noise_ref, w_ref, base_ref, counts_ref, *,
                          samples_per_block, n_samples, nc):
    """One grid step = one (image, sample-block):
       logits = noise @ (sigma * W_folded) + base  (bf16 MXU, f32 acc)
       -> first-index argmax -> histogram accumulated into counts_ref."""
    blk = pl.program_id(1)

    # init the per-image count accumulator on the first sample block
    @pl.when(blk == 0)
    def _():
        counts_ref[...] = jnp.zeros_like(counts_ref)

    # single bf16 MXU matmul with f32 accumulation; normalization, sigma and
    # bias are pre-folded into w_ref / base_ref (no x + sigma*n VPU pass).
    logits = jnp.dot(noise_ref[0], w_ref[...],
                     preferred_element_type=jnp.float32) + base_ref[0]   # (spb, NCpad) f32

    spb = samples_per_block
    # (1, nc) lane iota, broadcast where needed (no (spb, nc) int32 materialization)
    cls_ids = jax.lax.broadcasted_iota(jnp.int32, (1, nc), 1)
    maxv = jnp.max(logits, axis=1, keepdims=True)                        # (spb, 1)
    # first index achieving the max (== torch argmax tie-breaking)
    pred = jnp.min(jnp.where(logits == maxv, cls_ids, nc),
                   axis=1, keepdims=True)                                # (spb, 1)

    # mask padded Monte-Carlo rows of the last (partial) block: a (spb,1)
    # column applied to pred (invalid rows -> class id nc, never histogrammed)
    row_ids = jax.lax.broadcasted_iota(jnp.int32, (spb, 1), 0)
    pred = jnp.where(blk * spb + row_ids < n_samples, pred, nc)

    onehot = (pred == cls_ids).astype(jnp.int32)                         # (spb, NCpad)
    counts_ref[0] += jnp.sum(onehot, axis=0, keepdims=True)              # (1, NCpad)


@functools.partial(jax.jit, static_argnames=("feat_dim",))
def _counts_for_all_images(noise, w_sigma, base, *, feat_dim):
    """counts[img, cls] over all images / all Monte-Carlo samples in one pallas_call."""
    num_images = noise.shape[0]
    kernel = functools.partial(
        _smooth_counts_kernel,
        samples_per_block=SAMPLES_PER_BLOCK,
        n_samples=N_SAMPLES,
        nc=NUM_CLASSES_PADDED,
    )
    counts = pl.pallas_call(
        kernel,
        out_shape=jax.ShapeDtypeStruct((num_images, 1, NUM_CLASSES_PADDED), jnp.int32),
        grid_spec=pltpu.PrefetchScalarGridSpec(
            num_scalar_prefetch=0,
            grid=(num_images, NUM_SAMPLE_BLOCKS),
            in_specs=[
                # per-(image, block) noise tile, bf16, samples on sublanes
                pl.BlockSpec((1, SAMPLES_PER_BLOCK, feat_dim), lambda i, j: (i, j, 0)),
                # sigma-folded, normalization-folded weights: constant index_map
                # -> VMEM-resident across the whole grid
                pl.BlockSpec((feat_dim, NUM_CLASSES_PADDED), lambda i, j: (0, 0)),
                # per-image clean logits (bias + normalization folded, pad = -1e30)
                pl.BlockSpec((1, 1, NUM_CLASSES_PADDED), lambda i, j: (i, 0, 0)),
            ],
            out_specs=pl.BlockSpec((1, 1, NUM_CLASSES_PADDED), lambda i, j: (i, 0, 0)),
        ),
        compiler_params=pltpu.CompilerParams(
            dimension_semantics=("parallel", "arbitrary")),   # images parallel, samples reduce
    )(noise, w_sigma, base)
    return counts[:, 0, :NUM_CLASSES]                 # drop the 24 padded classes


# -------------------- glue: Smooth.predict / binomial test --------------------

def _binom_test_half(k, n):
    """Exact two-sided binomial test with p=0.5 (scipy.stats.binom_test equivalent)."""
    if n == 0:
        return 1.0
    logpmf = [math.lgamma(n + 1) - math.lgamma(i + 1) - math.lgamma(n - i + 1)
              + n * math.log(0.5) for i in range(n + 1)]
    pk = logpmf[k]
    return min(1.0, sum(math.exp(lp) for lp in logpmf if lp <= pk + 1e-9))


class SmoothDefenseJAX:
    """JAX/Pallas port of smooth_defense (randomized-smoothing defense)."""

    def __init__(self, C=3, H=16, W=16, seed=0):
        self.C, self.H, self.W = C, H, W
        self.D = C * H * W
        key = jax.random.PRNGKey(seed)
        kw, _ = jax.random.split(key)

        # deterministic synthetic classifier head (stands in for resnet50)
        w = jax.random.normal(kw, (self.D, NUM_CLASSES), jnp.float32) * 0.01
        b = jnp.zeros((NUM_CLASSES,), jnp.float32)

        # fold the per-channel NormalizeLayer into the head:
        #   ((x - mean) * invstd) @ W + b  ==  x @ (invstd*W) + (b - (mean*invstd) @ W)
        mean_c = jnp.asarray(_IMAGENET_MEAN, jnp.float32)
        std_c = jnp.asarray(_IMAGENET_STDDEV, jnp.float32)
        hw = H * W
        invstd_vec = jnp.repeat(1.0 / std_c, hw)          # (D,)
        mean_vec = jnp.repeat(mean_c, hw)                 # (D,)
        self.w_fold = invstd_vec[:, None] * w             # (D, 1000) f32, for base logits
        self.b_fold = b - (mean_vec * invstd_vec) @ w     # (1000,)   f32

        # sigma-folded weights for the Pallas matmul, padded 1000 -> 1024
        # (padded classes have zero weight; their base is -1e30, never argmax)
        pad = NUM_CLASSES_PADDED - NUM_CLASSES
        self.w_sigma = jnp.pad(SIGMA * self.w_fold,
                               ((0, 0), (0, pad))).astype(jnp.bfloat16)   # (D, 1024) bf16

    def _predict_from_counts(self, counts_np):
        top2 = counts_np.argsort()[::-1][:2]
        c1, c2 = int(counts_np[top2[0]]), int(counts_np[top2[1]])
        if _binom_test_half(c1, c1 + c2) > ALPHA:
            return ABSTAIN
        return int(top2[0])

    def forward(self, img, gt, key):
        num_images = int(img.shape[0])
        x = jnp.asarray(img, jnp.float32).reshape(num_images, self.D)

        # per-image clean logits computed once (tiny f32 matmul in the wrapper),
        # padded classes forced to -1e30 so argmax can never select them
        base = x @ self.w_fold + self.b_fold                               # (N, 1000) f32
        pad = NUM_CLASSES_PADDED - NUM_CLASSES
        base = jnp.concatenate(
            [base, jnp.full((num_images, pad), -1e30, jnp.float32)], axis=1)
        base = base.reshape(num_images, 1, NUM_CLASSES_PADDED)

        # Monte-Carlo noise, standard normal, stored bf16 (matmul input is bf16 anyway)
        noise = jax.random.normal(
            key, (num_images, NUM_SAMPLE_BLOCKS * SAMPLES_PER_BLOCK, self.D),
            jnp.float32).astype(jnp.bfloat16)

        counts = _counts_for_all_images(noise, self.w_sigma, base, feat_dim=self.D)
        counts = np.asarray(jax.block_until_ready(counts), dtype=np.int64)  # (N, 1000)

        gt_np = np.asarray(gt)
        total = 0
        for n in range(num_images):
            pred = self._predict_from_counts(counts[n])
            total += int(pred != int(gt_np[n]))
        return total


if __name__ == "__main__":
    key = jax.random.PRNGKey(0)
    k_img, k_run = jax.random.split(key)
    # small NCHW batch: 2 images, 3 channels (ImageNet normalization), 16x16
    img = jax.random.uniform(k_img, (2, 3, 16, 16), jnp.float32)
    gt = jnp.asarray([3, 7], jnp.int32)

    defense = SmoothDefenseJAX(C=3, H=16, W=16, seed=0)
    num_incorrect = defense.forward(img, gt, k_run)
    assert isinstance(num_incorrect, int) and 0 <= num_incorrect <= img.shape[0]
    print("KERNEL_OK")
</pallas_src>

<mosaic_0001>
module attributes {stable_mosaic.version = 11 : i64} {
  func.func @_smooth_counts_kernel(%arg0: i32, %arg1: i32, %arg2: memref<1x112x768xbf16, #tpu.memory_space<vmem>>, %arg3: memref<768x1024xbf16, #tpu.memory_space<vmem>>, %arg4: memref<1x1x1024xf32, #tpu.memory_space<vmem>>, %arg5: memref<1x1x1024xi32, #tpu.memory_space<vmem>>) attributes {dimension_semantics = [#tpu.dimension_semantics<parallel>, #tpu.dimension_semantics<arbitrary>], iteration_bounds = array<i64: 2, 1>, scalar_prefetch = 0 : i64, scratch_operands = 0 : i64, tpu.core_type = #tpu.core_type<tc>, window_params = [{transform_indices = @transform_0, window_bounds = array<i64: 1, 112, 768>}, {pipeline_mode = #tpu.pipeline_mode<synchronous>, transform_indices = @transform_1, window_bounds = array<i64: 768, 1024>}, {transform_indices = @transform_2, window_bounds = array<i64: 1, 1, 1024>}, {transform_indices = @transform_3, window_bounds = array<i64: 1, 1, 1024>}]} {
    %c0_i32 = arith.constant 0 : i32
    %0 = arith.cmpi eq, %arg1, %c0_i32 : i32
    %1 = arith.extui %0 : i1 to i32
    %c0_i32_0 = arith.constant 0 : i32
    %2 = arith.cmpi ne, %1, %c0_i32_0 : i32
    scf.if %2 {
      %c0_i32_18 = arith.constant 0 : i32
      %42 = vector.broadcast %c0_i32_18 : i32 to vector<1x1x1024xi32>
      %c0_19 = arith.constant 0 : index
      %c0_20 = arith.constant 0 : index
      %c0_21 = arith.constant 0 : index
      %43 = vector.load %arg5[%c0_19, %c0_20, %c0_21] : memref<1x1x1024xi32, #tpu.memory_space<vmem>>, vector<1x1x1024xi32>
      tpu.vector_store %arg5[%c0_19, %c0_20, %c0_21], %42 {strides = array<i32>} : memref<1x1x1024xi32, #tpu.memory_space<vmem>>, vector<1x1x1024xi32>,
    } else {
    }
    %c0 = arith.constant 0 : index
    %c0_1 = arith.constant 0 : index
    %c0_2 = arith.constant 0 : index
    %3 = vector.load %arg2[%c0, %c0_1, %c0_2] : memref<1x112x768xbf16, #tpu.memory_space<vmem>>, vector<1x112x768xbf16>
    %4 = vector.shape_cast %3 : vector<1x112x768xbf16> to vector<112x768xbf16>
    %c0_3 = arith.constant 0 : index
    %c0_4 = arith.constant 0 : index
    %5 = vector.load %arg3[%c0_3, %c0_4] : memref<768x1024xbf16, #tpu.memory_space<vmem>>, vector<768x1024xbf16>
    %cst = arith.constant dense<0.000000e+00> : vector<112x1024xf32>
    %6 = tpu.matmul %4, %5, %cst {dimension_numbers = #tpu.dot_dimension_numbers<[1], [0], [0], [1], [0, 0, 1, 1], [], []>} : vector<112x768xbf16>, vector<768x1024xbf16>, vector<112x1024xf32> -> vector<112x1024xf32>
    %c0_5 = arith.constant 0 : index
    %c0_6 = arith.constant 0 : index
    %c0_7 = arith.constant 0 : index
    %7 = vector.load %arg4[%c0_5, %c0_6, %c0_7] : memref<1x1x1024xf32, #tpu.memory_space<vmem>>, vector<1x1x1024xf32>
    %8 = vector.shape_cast %7 : vector<1x1x1024xf32> to vector<1x1024xf32>
    %9 = vector.broadcast %8 : vector<1x1024xf32> to vector<112x1024xf32>
    %10 = arith.addf %6, %9 : vector<112x1024xf32>
    %11 = tpu.iota {dimensions = array<i32: 1>} : vector<1x1024xi32>
    %cst_8 = arith.constant dense<0xFF800000> : vector<112xf32>
    %12 = vector.multi_reduction <maximumf>, %10, %cst_8 [1] : vector<112x1024xf32> to vector<112xf32>
    %13 = vector.shape_cast %12 : vector<112xf32> to vector<112x1xf32>
    %14 = vector.broadcast %13 : vector<112x1xf32> to vector<112x1024xf32>
    %15 = arith.cmpf oeq, %10, %14 : vector<112x1024xf32>
    %c1024_i32 = arith.constant 1024 : i32
    %16 = vector.shape_cast %11 : vector<1x1024xi32> to vector<1x1024xi32>
    %17 = vector.broadcast %16 : vector<1x1024xi32> to vector<112x1024xi32>
    %18 = vector.broadcast %c1024_i32 : i32 to vector<112x1024xi32>
    %19 = arith.select %15, %17, %18 : vector<112x1024xi1>, vector<112x1024xi32>
    %cst_9 = arith.constant dense<2147483647> : vector<112xi32>
    %20 = vector.multi_reduction <minsi>, %19, %cst_9 [1] : vector<112x1024xi32> to vector<112xi32>
    %21 = vector.shape_cast %20 : vector<112xi32> to vector<112x1xi32>
    %22 = tpu.iota {dimensions = array<i32: 0>} : vector<112x1xi32>
    %c112_i32 = arith.constant 112 : i32
    %23 = arith.muli %arg1, %c112_i32 : i32
    %24 = vector.broadcast %23 : i32 to vector<112x1xi32>
    %25 = arith.addi %24, %22 : vector<112x1xi32>
    %c100_i32 = arith.constant 100 : i32
    %26 = vector.broadcast %c100_i32 : i32 to vector<112x1xi32>
    %27 = arith.cmpi slt, %25, %26 : vector<112x1xi32>
    %c1024_i32_10 = arith.constant 1024 : i32
    %28 = vector.broadcast %c1024_i32_10 : i32 to vector<112x1xi32>
    %29 = arith.select %27, %21, %28 : vector<112x1xi1>, vector<112x1xi32>
    %30 = vector.broadcast %29 : vector<112x1xi32> to vector<112x1024xi32>
    %31 = vector.broadcast %11 : vector<1x1024xi32> to vector<112x1024xi32>
    %32 = arith.cmpi eq, %30, %31 : vector<112x1024xi32>
    %33 = arith.extui %32 : vector<112x1024xi1> to vector<112x1024xi32>
    %c0_11 = arith.constant 0 : index
    %c0_12 = arith.constant 0 : index
    %c0_13 = arith.constant 0 : index
    %34 = vector.load %arg5[%c0_11, %c0_12, %c0_13] : memref<1x1x1024xi32, #tpu.memory_space<vmem>>, vector<1x1x1024xi32>
    %35 = vector.shape_cast %34 : vector<1x1x1024xi32> to vector<1x1024xi32>
    %cst_14 = arith.constant dense<0> : vector<1024xi32>
    %36 = vector.multi_reduction <add>, %33, %cst_14 [0] : vector<112x1024xi32> to vector<1024xi32>
    %37 = vector.shape_cast %36 : vector<1024xi32> to vector<1x1024xi32>
    %38 = arith.addi %35, %37 : vector<1x1024xi32>
    %c0_15 = arith.constant 0 : index
    %c0_16 = arith.constant 0 : index
    %c0_17 = arith.constant 0 : index
    %39 = vector.load %arg5[%c0_15, %c0_16, %c0_17] : memref<1x1x1024xi32, #tpu.memory_space<vmem>>, vector<1x1x1024xi32>
    %40 = vector.shape_cast %39 : vector<1x1x1024xi32> to vector<1x1024xi32>
    %41 = vector.shape_cast %38 : vector<1x1024xi32> to vector<1x1x1024xi32>
    tpu.vector_store %arg5[%c0_15, %c0_16, %c0_17], %41 {strides = array<i32>} : memref<1x1x1024xi32, #tpu.memory_space<vmem>>, vector<1x1x1024xi32>,
    return
  }
  func.func @transform_0(%arg0: i32, %arg1: i32) -> (i32, i32, i32) {
    %c0_i32 = arith.constant 0 : i32
    %c0_i32_0 = arith.constant 0 : i32
    return %arg0, %arg1, %c0_i32 : i32, i32, i32
  }
  func.func @transform_1(%arg0: i32, %arg1: i32) -> (i32, i32) {
    %c0_i32 = arith.constant 0 : i32
    %c0_i32_0 = arith.constant 0 : i32
    %c0_i32_1 = arith.constant 0 : i32
    return %c0_i32, %c0_i32_0 : i32, i32
  }
  func.func @transform_2(%arg0: i32, %arg1: i32) -> (i32, i32, i32) {
    %c0_i32 = arith.constant 0 : i32
    %c0_i32_0 = arith.constant 0 : i32
    %c0_i32_1 = arith.constant 0 : i32
    return %arg0, %c0_i32, %c0_i32_0 : i32, i32, i32
  }
  func.func @transform_3(%arg0: i32, %arg1: i32) -> (i32, i32, i32) {
    %c0_i32 = arith.constant 0 : i32
    %c0_i32_0 = arith.constant 0 : i32
    %c0_i32_1 = arith.constant 0 : i32
    return %arg0, %c0_i32, %c0_i32_0 : i32, i32, i32
  }
}

</mosaic_0001>

<bundles_post_ra>
// kernel: _counts_for_all_images.1
= control target key start
LH: loop header
LB: loop body
LE: loop exit
PB: predicated region body
PF: predicated region fallthrough
CT: control target
= control target key end

     0   :  { %8 = vsyncpa [#allocation3], 0  ;;  %s8351_s0 = inlined_call_operand.hbm [shape: bf16[2,112,768], index: 0, kind: input, shape index: {}]   ;;  %s8352_s1 = inlined_call_operand.hbm [shape: bf16[768,1024], index: 1, kind: input, shape index: {}]   ;;  %s8353_s2 = inlined_call_operand.hbm [shape: f32[2,1,1024], index: 2, kind: input, shape index: {}]   ;;  %s8354_s3 = inlined_call_operand.vmem [shape: s32[2,1,1024], index: 3, kind: output, shape index: {}]  }
   0x1   :  { %10 = vsyncpa [#allocation3 + $0x1], 0 }
   0x2   :  { %11 = vsyncpa [#allocation5], 0  ;;  %s6572_s12 = smov 0   ;;  %s6574_s13 = smov 0  }
   0x3   :  { %s6576_s14 = smov 0   ;;  %s6578_s15 = smov 0  }
   0x4   :  { %s6580_s16 = smov 0   ;;  %s6582_s17 = smov 0  }
   0x5 LB: > { %s29_s18 = sadd.s32 1, %s6537_s16  ;;  %s38_s19 = sadd.s32 1, %s6529_s14  ;;  %s6541_s17 = sphi %s6582_s17, %s17_s17   ;;  %s6537_s16 = sphi %s6580_s16, %s8591_s16   ;;  %s6533_s15 = sphi %s6578_s15, %s8590_s15   ;;  %s6529_s14 = sphi %s6576_s14, %s8589_s14   ;;  %s6525_s13 = sphi %s6574_s13, %s8588_s13   ;;  %s6521_s12 = sphi %s6572_s12, %s8587_s12  }
   0x6   : > { %p31_p0 = scmp.ge.s32.totalorder %s29_s18, 2  ;;  %p45_p1 = scmp.ne.s32.totalorder %s6529_s14, %s6525_s13 }
   0x7   : > { %p46_p2 = scmp.eq.s32.totalorder %s6541_s17, 0  ;;  %p6233_p4 = scmp.lt.s32.totalorder %s6541_s17, 2 }
   0x8   : > { %s8593_s18 = smov (%p31_p0, %s29_s18), 0  ;;  %s161_s21 = sand.u32 1, %s6541_s17  }
   0x9   : > { %p47_p3 = por %p46_p2, %p45_p1  ;;  %s33_s20 = ssub.s32 %s6537_s16, %s8593_s18 }
   0xa   : > { %p36_p5 = scmp.eq.s32.totalorder %s33_s20, 0  ;;  %s163_s22 = sand.u32 1, %s6529_s14  }
   0xb   : > { %s6211_s23 = smul.u32 5376, %s6537_s16  ;;  %p6625_p6 = pnand %p6233_p4, %p47_p3 }
   0xc   : > { %s6616_s24 = scalar_select %p36_p5, %s6529_s14, %s38_s19  }
   0xd   : > { %s6210_s25 = smul.u32 336, %s163_s22  ;;  %s6623_s28 = scalar_lea.hbm %s8351_s0, %s6211_s23 }
   0xe   : > { %s8440_s29 = scalar_select %p6625_p6, 1, 0 }
   0xf   : > { %s165_s30 = scalar_lea.vmem [#allocation2], %s6210_s25  ;;  %s6631_s5 = scalar_lea.sflag [#allocation3], %s161_s21 }
  0x10   : > { %s175_s4 = sshll.u32 %s165_s30, 4  ;;  %s6395_s6 = scalar_lea.hbm %s6623_s28, 5376  ;;  %s6629_s4 = int_to_ptr.vmem [resolvable:$true] %s175_s4 }
  0x11   : > { %p6396_p7 = scmp.ne.s32.totalorder %s6623_s28, %s6395_s6  ;;  %p8356_p8 = pneg %p6625_p6 }
  0x12   : > { %s6400_s9 = scalar_lea.hbm %s8351_s0, 10752  ;;  %p6401_p11 = scmp.lt.u32.totalorder %s6623_s28, %s8351_s0 }
  0x13   : > { %p6398_p9 = pnand %p8356_p8, %p6396_p7  ;;  %p6402_p12 = scmp.lt.u32.totalorder %s6400_s9, %s6395_s6 }
  0x14   : > { %p6404_p0 = scmp.lt.u32.totalorder %s6395_s6, %s6623_s28 }
  0x15   : > { %p6399_p10 = pneg %p6398_p9  ;;  %p6403_p13 = por %p6402_p12, %p6401_p11 }
  0x17   : > { %p6405_p1 = por %p6404_p0, %p6403_p13 }
  0x19   : > { %p6406_p2 = pnand %p6405_p1, %p6399_p10 }
  0x1b   : > { %6409 = shalt.err (!%p6406_p2)
}
  0x1c   : > { %s6410_s19 = scalar_lea.vmem %s6629_s4, 5376  ;;  %s6543_s20 = smov [#allocation2]  }
  0x1d   : > { %p6411_p3 = scmp.ne.s32.totalorder %s6629_s4, %s6410_s19  ;;  %s6415_s21 = sshll.u32 %s6543_s20, 4  ;;  %s6416_s21 = int_to_ptr.vmem [resolvable:$false] %s6415_s21 }
  0x1e   : > { %s6417_s23 = scalar_lea.vmem %s6416_s21, 10752  ;;  %p6418_p7 = scmp.lt.s32.totalorder %s6629_s4, %s6416_s21 }
  0x1f   : > { %p6413_p4 = pnand %p6411_p3, %p8356_p8  ;;  %p6419_p9 = scmp.lt.s32.totalorder %s6417_s23, %s6410_s19 }
  0x21   : > { %p6414_p5 = pneg %p6413_p4  ;;  %p6420_p11 = por %p6419_p9, %p6418_p7 }
  0x23   : > { %p6421_p12 = pnand %p6420_p11, %p6414_p5 }
  0x25   : > { %6424 = shalt.err (!%p6421_p12)
}
  0x26   : > { %s6544_s25 = smov 384   ;;  %s6545_s26 = smov 24  }
  0x27   : > { %6228 = dma.hbm_to_vmem [thread:$0]  (!%p6625_p6), %s6623_s28, 5376, %s6629_s4, %s6631_s5, %s6544_s25, %s6544_s25, %s6545_s26  }
  0x28   : > { %s8355_s27 = sadd.s32 4294967295, %s6541_s17   ;;  %p51_p10 = scmp.ne.s32.totalorder %s6525_s13, %s6521_s12 }
  0x29   : > { %p6664_p13 = scmp.eq.s32.totalorder %s8355_s27, 0  ;;  %p5442_p0 = scmp.ge.s32.totalorder %s6541_s17, 1 }
  0x2a   : > { %p135_p1 = scmp.lt.s32.totalorder %s6541_s17, 3  ;;  %s6546_s12 = smov [#allocation4]  }
  0x2b   : > { %s8441_s30 = scalar_select %p6664_p13, 1, 0 }
  0x2c   : > { %p6672_p2 = por %p6664_p13, %p51_p10  ;;  %p6676_p3 = pnand %p5442_p0, %p135_p1 }
  0x2d   : > { %s147_s28 = sshll.u32 %s6546_s12, 4  ;;  %s5446_s4 = sshll.u32 %s163_s22, 3  ;;  %s6682_s28 = int_to_ptr.vmem [resolvable:$true] %s147_s28 }
  0x2e   : > { %s8442_s6 = scalar_select %p6672_p2, 1, 0 }
  0x2f   : > { %s8443_s7 = scalar_select %p6676_p3, 1, 0 }
  0x30   : > { %p6221_p4 = pneg %p6676_p3  ;;  %s5881_s9 = sshll.u32 %s6537_s16, 7 }
  0x31   : > { %s189_s10 = scalar_lea.vmem [#allocation6], %s5446_s4  ;;  %s6696_s21 = scalar_lea.hbm %s8353_s2, %s5881_s9 }
  0x32   : > { %p6688_p5 = pnand %p6221_p4, %p6664_p13  ;;  %s197_s11 = sshll.u32 %s189_s10, 4  ;;  %s198_s11 = int_to_ptr.vmem [resolvable:$true] %s197_s11 }
  0x33   : > { %s6425_s26 = scalar_lea.hbm %s8352_s1, 49152 }
  0x34   : > { %p6426_p7 = scmp.ne.s32.totalorder %s8352_s1, %s6425_s26  ;;  %p6427_p9 = pneg %p6688_p5 }
  0x35   : > { %p6432_p10 = scmp.lt.u32.totalorder %s6425_s26, %s8352_s1 }
  0x36   : > { %p6428_p11 = pnand %p6427_p9, %p6426_p7 }
  0x38   : > { %p6429_p12 = pneg %p6428_p11 }
  0x3a   : > { %p6434_p0 = pnand %p6432_p10, %p6429_p12 }
  0x3c   : > { %6437 = shalt.err (!%p6434_p0)
}
  0x3d   : > { %s6438_s9 = scalar_lea.vmem %s6682_s28, 49152  ;;  %p6446_p13 = scmp.lt.s32.totalorder %s6682_s28, %s6682_s28 }
  0x3e   : > { %p6439_p1 = scmp.ne.s32.totalorder %s6682_s28, %s6438_s9  ;;  %p6447_p2 = scmp.lt.s32.totalorder %s6438_s9, %s6438_s9 }
  0x40   : > { %p6441_p4 = pnand %p6439_p1, %p6427_p9  ;;  %p6448_p3 = por %p6447_p2, %p6446_p13 }
  0x42   : > { %p6442_p8 = pneg %p6441_p4 }
  0x44   : > { %p6449_p6 = pnand %p6448_p3, %p6442_p8 }
  0x46   : > { %6452 = shalt.err (!%p6449_p6)
}
  0x47   : > { %s6547_s10 = smov 512   ;;  %s6548_s27 = smov 32  }
  0x48   : > { %6224 = dma.hbm_to_vmem [thread:$0]  (!%p6688_p5), %s8352_s1, 49152, %s6682_s28, [#allocation5], %s6547_s10, %s6547_s10, %s6548_s27  }
  0x49   : > { %s6453_s23 = scalar_lea.hbm %s6696_s21, 128  ;;  %p8445_p13 = scmp.ne.s32.totalorder %s8440_s29, 0 }
  0x4a   : > { %p6454_p7 = scmp.ne.s32.totalorder %s6696_s21, %s6453_s23  ;;  %s6458_s12 = scalar_lea.hbm %s8353_s2, 256 }
  0x4b   : > { %p8446_p8 = pneg %p8445_p13  ;;  %p6459_p3 = scmp.lt.u32.totalorder %s6696_s21, %s8353_s2 }
  0x4c   : > { %p6460_p9 = scmp.lt.u32.totalorder %s6458_s12, %s6453_s23  ;;  %p6462_p12 = scmp.lt.u32.totalorder %s6453_s23, %s6696_s21 }
  0x4d   : > { %p6456_p6 = pnand %p6454_p7, %p8446_p8 }
  0x4e   : > { %p6461_p11 = por %p6460_p9, %p6459_p3 }
  0x4f   : > { %p6457_p2 = pneg %p6456_p6 }
  0x50   : > { %p6463_p10 = por %p6462_p12, %p6461_p11 }
  0x52   : > { %p6464_p5 = pnand %p6463_p10, %p6457_p2 }
  0x54   : > { %6467 = shalt.err (!%p6464_p5)
}
  0x55   : > { %s6468_s28 = scalar_lea.vmem %s198_s11, 128  ;;  %p8447_p1 = pmov %p8446_p8 }
  0x56   : > { %p6469_p0 = scmp.ne.s32.totalorder %s198_s11, %s6468_s28  ;;  %s6549_s8 = smov [#allocation6]  }
  0x57   : > { %s6473_s9 = sshll.u32 %s6549_s8, 4  ;;  %s6474_s9 = int_to_ptr.vmem [resolvable:$false] %s6473_s9 }
  0x58   : > { %p6471_p4 = pnand %p6469_p0, %p8447_p1  ;;  %s6475_s10 = scalar_lea.vmem %s6474_s9, 256 }
  0x59   : > { %p6476_p8 = scmp.lt.s32.totalorder %s198_s11, %s6474_s9  ;;  %p6477_p6 = scmp.lt.s32.totalorder %s6475_s10, %s6468_s28 }
  0x5a   : > { %p6472_p7 = pneg %p6471_p4 }
  0x5b   : > { %p6478_p3 = por %p6477_p6, %p6476_p8 }
  0x5d   : > { %p6479_p9 = pnand %p6478_p3, %p6472_p7 }
  0x5f   : > { %6482 = shalt.err (!%p6479_p9)
}
  0x60   : > { %6231 = dma.hbm_to_vmem [thread:$0]  (!%p8445_p13), %s6696_s21, 128, %s198_s11, %s6631_s5  }
  0x61   : > { %p8448_p2 = scmp.ne.s32.totalorder %s8443_s7, 0 }
  0x63   : > { %206 = sbr.rel (%p8448_p2) target bundleno = 1304 (0x518), region = 32 }
  0x6a   : > { %s8449_s27 = sadd.s32 4294967295, %s6541_s17   ;;  %s210_s20 = sand.u32 1, %s6525_s13  }
  0x6b   : > { %s208_s19 = sand.u32 1, %s8449_s27   ;;  %s6212_s23 = smul.u32 336, %s210_s20 }
  0x6c   : > { %s209_s25 = scalar_lea.sflag [#allocation3], %s208_s19  ;;  %p8450_p11 = scmp.ne.s32.totalorder %s8442_s6, 0 }
  0x6d   : > { %s6744_s26 = scalar_lea.vmem [#allocation2], %s6212_s23 }
  0x6e   : > { %6508 = dma.done.wait (%p8450_p11), %s209_s25, 5376  }
  0x6f   : > { %6510 = vsyncadd (%p8450_p11), %s209_s25, 4294961920  ;;  %p8451_p13 = scmp.ne.s32.totalorder %s8441_s30, 0 }
  0x71   : > { %6512 = dma.done.wait (%p8451_p13), [#allocation5], 49152  }
  0x72   : > { %6514 = vsyncadd (%p8451_p13), [#allocation5], 4294918144  ;;  %s6754_s29 = sshll.u32 %s210_s20, 3 }
  0x73   : > { %s225_s5 = scalar_lea.vmem [#allocation6], %s6754_s29 }
  0x74   : > { %6516 = dma.done.wait (%p8450_p11), %s209_s25, 128  }
  0x75   : > { %6518 = vsyncadd (%p8450_p11), %s209_s25, 4294967168  ;;  %v304_v0 = vld [vmem:[#allocation4] sm:$0xff]  ;;  %v305_v2 = vld [vmem:[#allocation4 + $0x8] sm:$0xff]  ;;  %p253_p12 = scmp.lt.s32.totalorder %s6533_s15, 1 }
  0x76   : > { %v308_v1 = vld [vmem:[#allocation4 + $0x20] sm:$0xff]  ;;  %v309_v4 = vld [vmem:[#allocation4 + $0x28] sm:$0xff] }
  0x77   : > { %v5496_v3 = vcombine.high %v304_v0, %v308_v1  ;;  %v5495_v5 = vcombine.low %v304_v0, %v308_v1  ;;  %v312_v6 = vld [vmem:[#allocation4 + $0x40] sm:$0xff]  ;;  %v5498_v8 = vcombine.high %v305_v2, %v309_v4  ;;  %v5497_v9 = vcombine.low %v305_v2, %v309_v4  ;;  %v313_v11 = vld [vmem:[#allocation4 + $0x48] sm:$0xff]  ;;  %s8595_s15 = smov (!%p253_p12, %s6533_s15), 1 }
  0x78   : > { %v316_v7 = vld [vmem:[#allocation4 + $0x60] sm:$0xff]  ;;  %v317_v12 = vld [vmem:[#allocation4 + $0x68] sm:$0xff]  ;;  %s5452_s30 = sshll.u32 %s8595_s15, 3 }
  0x79   : > { %v5504_v10 = vcombine.high %v312_v6, %v316_v7  ;;  %v320_v13 = vld [vmem:[#allocation4 + $0x80] sm:$0xff]  ;;  %2860 = vmatprep.subr.bf16.mxu0 %v5496_v3  ;;  %v5506_v14 = vcombine.high %v313_v11, %v317_v12  ;;  %v321_v16 = vld [vmem:[#allocation4 + $0x88] sm:$0xff]  ;;  %3169 = vmatprep.subr.bf16.mxu1 %v5498_v8  ;;  %v5503_v18 = vcombine.low %v312_v6, %v316_v7  ;;  %s256_s11 = scalar_lea.vmem %s8354_s3, %s5452_s30 }
  0x7a   : > { %v324_v15 = vld [vmem:[#allocation4 + $0xa0] sm:$0xff]  ;;  %v325_v17 = vld [vmem:[#allocation4 + $0xa8] sm:$0xff]  ;;  %2861 = vmatpush1.bf16.msra.mxu0 %v5495_v5  ;;  %3170 = vmatpush1.bf16.msra.mxu1 %v5497_v9  ;;  %v5505_v19 = vcombine.low %v313_v11, %v317_v12 }
  0x7b   : > { %2862 = vmatprep.subr.bf16.mxu0 %v5504_v10  ;;  %v5512_v20 = vcombine.high %v320_v13, %v324_v15  ;;  %3171 = vmatprep.subr.bf16.mxu1 %v5506_v14  ;;  %v5514_v21 = vcombine.high %v321_v16, %v325_v17  ;;  %v328_v22 = vld [vmem:[#allocation4 + $0xc0] sm:$0xff]  ;;  %v329_v24 = vld [vmem:[#allocation4 + $0xc8] sm:$0xff]  ;;  %v5511_v26 = vcombine.low %v320_v13, %v324_v15 }
  0x7c   : > { %v332_v23 = vld [vmem:[#allocation4 + $0xe0] sm:$0xff]  ;;  %v333_v25 = vld [vmem:[#allocation4 + $0xe8] sm:$0xff]  ;;  %v5513_v27 = vcombine.low %v321_v16, %v325_v17 }
  0x7d   : > { %v5520_v28 = vcombine.high %v328_v22, %v332_v23  ;;  %v5522_v29 = vcombine.high %v329_v24, %v333_v25  ;;  %v336_v30 = vld [vmem:[#allocation4 + $0x100] sm:$0xff]  ;;  %v337_v32 = vld [vmem:[#allocation4 + $0x108] sm:$0xff]  ;;  %v5519_v34 = vcombine.low %v328_v22, %v332_v23  ;;  %v5521_v35 = vcombine.low %v329_v24, %v333_v25 }
  0x7e   : > { %2863 = vmatpush1.bf16.msra.mxu0 %v5503_v18  ;;  %3172 = vmatpush1.bf16.msra.mxu1 %v5505_v19  ;;  %v340_v31 = vld [vmem:[#allocation4 + $0x120] sm:$0xff]  ;;  %v341_v33 = vld [vmem:[#allocation4 + $0x128] sm:$0xff] }
  0x7f   : > { %2864 = vmatprep.subr.bf16.mxu0 %v5512_v20  ;;  %3173 = vmatprep.subr.bf16.mxu1 %v5514_v21  ;;  %v5528_v36 = vcombine.high %v336_v30, %v340_v31  ;;  %v5530_v37 = vcombine.high %v337_v32, %v341_v33  ;;  %v344_v38 = vld [vmem:[#allocation4 + $0x140] sm:$0xff]  ;;  %v345_v40 = vld [vmem:[#allocation4 + $0x148] sm:$0xff]  ;;  %v5527_v42 = vcombine.low %v336_v30, %v340_v31 }
  0x80   : > { %v348_v39 = vld [vmem:[#allocation4 + $0x160] sm:$0xff]  ;;  %v349_v41 = vld [vmem:[#allocation4 + $0x168] sm:$0xff]  ;;  %v5529_v43 = vcombine.low %v337_v32, %v341_v33 }
  0x81   : > { %v5536_v44 = vcombine.high %v344_v38, %v348_v39  ;;  %v5538_v45 = vcombine.high %v345_v40, %v349_v41  ;;  %v352_v46 = vld [vmem:[#allocation4 + $0x180] sm:$0xff]  ;;  %v353_v48 = vld [vmem:[#allocation4 + $0x188] sm:$0xff]  ;;  %v5535_v50 = vcombine.low %v344_v38, %v348_v39  ;;  %v5537_v51 = vcombine.low %v345_v40, %v349_v41 }
  0x82   : > { %2865 = vmatpush1.bf16.msra.mxu0 %v5511_v26  ;;  %3174 = vmatpush1.bf16.msra.mxu1 %v5513_v27  ;;  %v356_v47 = vld [vmem:[#allocation4 + $0x1a0] sm:$0xff]  ;;  %v357_v49 = vld [vmem:[#allocation4 + $0x1a8] sm:$0xff] }
  0x83   : > { %2866 = vmatprep.subr.bf16.mxu0 %v5520_v28  ;;  %3175 = vmatprep.subr.bf16.mxu1 %v5522_v29  ;;  %v5544_v52 = vcombine.high %v352_v46, %v356_v47  ;;  %v5546_v53 = vcombine.high %v353_v48, %v357_v49  ;;  %v360_v54 = vld [vmem:[#allocation4 + $0x1c0] sm:$0xff]  ;;  %v361_v57 = vld [vmem:[#allocation4 + $0x1c8] sm:$0xff]  ;;  %v5543_v59 = vcombine.low %v352_v46, %v356_v47 }
  0x84   : > { %v364_v55 = vld [vmem:[#allocation4 + $0x1e0] sm:$0xff]  ;;  %v365_v58 = vld [vmem:[#allocation4 + $0x1e8] sm:$0xff]  ;;  %v5545_v60 = vcombine.low %v353_v48, %v357_v49 }
  0x85   : > { %v6290_v56 = vld [vmem:[%s6744_s26 + $0x4] ss:$24 sps:$4 sm:$0xff]   ;;  %v5552_v61 = vcombine.high %v360_v54, %v364_v55  ;;  %v5554_v62 = vcombine.high %v361_v57, %v365_v58  ;;  %v5551_v3 = vcombine.low %v360_v54, %v364_v55  ;;  %v5553_v4 = vcombine.low %v361_v57, %v365_v58 }
  0x86   : > { %2867 = vmatpush1.bf16.msra.mxu0 %v5519_v34  ;;  %3176 = vmatpush1.bf16.msra.mxu1 %v5521_v35  ;;  %v368_v63 = vld [vmem:[#allocation4 + $0x200] sm:$0xff]  ;;  %v369_v1 = vld [vmem:[#allocation4 + $0x208] sm:$0xff] }
  0x87   : > { %2868 = vmatprep.subr.bf16.mxu0 %v5528_v36  ;;  %3177 = vmatprep.subr.bf16.mxu1 %v5530_v37  ;;  %v372_v0 = vld [vmem:[#allocation4 + $0x220] sm:$0xff]  ;;  %v373_v2 = vld [vmem:[#allocation4 + $0x228] sm:$0xff] }
  0x88   : > { %2892 = vmatprep.mubr.bf16.mxu0 %v6290_v56  ;;  %3201 = vmatprep.mubr.bf16.mxu1 %v6290_v56  ;;  %v5560_v5 = vcombine.high %v368_v63, %v372_v0  ;;  %v5562_v6 = vcombine.high %v369_v1, %v373_v2  ;;  %v376_v7 = vld [vmem:[#allocation4 + $0x240] sm:$0xff]  ;;  %v377_v9 = vld [vmem:[#allocation4 + $0x248] sm:$0xff]  ;;  %v5559_v11 = vcombine.low %v368_v63, %v372_v0 }
  0x89   : > { %v380_v8 = vld [vmem:[#allocation4 + $0x260] sm:$0xff]  ;;  %v381_v10 = vld [vmem:[#allocation4 + $0x268] sm:$0xff]  ;;  %v5561_v12 = vcombine.low %v369_v1, %v373_v2 }
  0x8a   : > { %2869 = vmatpush1.bf16.msra.mxu0 %v5527_v42  ;;  %3178 = vmatpush1.bf16.msra.mxu1 %v5529_v43  ;;  %v5568_v13 = vcombine.high %v376_v7, %v380_v8  ;;  %v5570_v14 = vcombine.high %v377_v9, %v381_v10  ;;  %v384_v15 = vld [vmem:[#allocation4 + $0x280] sm:$0xff]  ;;  %v385_v17 = vld [vmem:[#allocation4 + $0x288] sm:$0xff]  ;;  %v5567_v19 = vcombine.low %v376_v7, %v380_v8 }
  0x8b   : > { %2870 = vmatprep.subr.bf16.mxu0 %v5536_v44  ;;  %3179 = vmatprep.subr.bf16.mxu1 %v5538_v45  ;;  %v388_v16 = vld [vmem:[#allocation4 + $0x2a0] sm:$0xff]  ;;  %v389_v18 = vld [vmem:[#allocation4 + $0x2a8] sm:$0xff]  ;;  %v5569_v20 = vcombine.low %v377_v9, %v381_v10 }
  0x8c   : > { %v5576_v21 = vcombine.high %v384_v15, %v388_v16  ;;  %v5578_v22 = vcombine.high %v385_v17, %v389_v18  ;;  %v392_v23 = vld [vmem:[#allocation4 + $0x2c0] sm:$0xff]  ;;  %v393_v25 = vld [vmem:[#allocation4 + $0x2c8] sm:$0xff]  ;;  %v5575_v27 = vcombine.low %v384_v15, %v388_v16  ;;  %v5577_v28 = vcombine.low %v385_v17, %v389_v18 }
  0x8d   : > { %v396_v24 = vld [vmem:[#allocation4 + $0x2e0] sm:$0xff]  ;;  %v397_v26 = vld [vmem:[#allocation4 + $0x2e8] sm:$0xff] }
  0x8e   : > { %2871 = vmatpush1.bf16.msra.mxu0 %v5535_v50  ;;  %3180 = vmatpush1.bf16.msra.mxu1 %v5537_v51  ;;  %v5584_v29 = vcombine.high %v392_v23, %v396_v24  ;;  %v5586_v30 = vcombine.high %v393_v25, %v397_v26  ;;  %v400_v31 = vld [vmem:[#allocation4 + $0x300] sm:$0xff]  ;;  %v401_v33 = vld [vmem:[#allocation4 + $0x308] sm:$0xff]  ;;  %v5583_v35 = vcombine.low %v392_v23, %v396_v24 }
  0x8f   : > { %2872 = vmatprep.subr.bf16.mxu0 %v5544_v52  ;;  %3181 = vmatprep.subr.bf16.mxu1 %v5546_v53  ;;  %v404_v32 = vld [vmem:[#allocation4 + $0x320] sm:$0xff]  ;;  %v405_v34 = vld [vmem:[#allocation4 + $0x328] sm:$0xff]  ;;  %v5585_v36 = vcombine.low %v393_v25, %v397_v26 }
  0x90   : > { %v5592_v37 = vcombine.high %v400_v31, %v404_v32  ;;  %v5594_v38 = vcombine.high %v401_v33, %v405_v34  ;;  %v408_v39 = vld [vmem:[#allocation4 + $0x340] sm:$0xff]  ;;  %v409_v41 = vld [vmem:[#allocation4 + $0x348] sm:$0xff]  ;;  %v5591_v43 = vcombine.low %v400_v31, %v404_v32  ;;  %v5593_v44 = vcombine.low %v401_v33, %v405_v34 }
  0x91   : > { %v412_v40 = vld [vmem:[#allocation4 + $0x360] sm:$0xff]  ;;  %v413_v42 = vld [vmem:[#allocation4 + $0x368] sm:$0xff] }
  0x92   : > { %2873 = vmatpush1.bf16.msra.mxu0 %v5543_v59  ;;  %3182 = vmatpush1.bf16.msra.mxu1 %v5545_v60  ;;  %v5600_v45 = vcombine.high %v408_v39, %v412_v40  ;;  %v5602_v46 = vcombine.high %v409_v41, %v413_v42  ;;  %v416_v47 = vld [vmem:[#allocation4 + $0x380] sm:$0xff]  ;;  %v417_v49 = vld [vmem:[#allocation4 + $0x388] sm:$0xff]  ;;  %v5599_v51 = vcombine.low %v408_v39, %v412_v40 }
  0x93   : > { %2874 = vmatprep.subr.bf16.mxu0 %v5552_v61  ;;  %3183 = vmatprep.subr.bf16.mxu1 %v5554_v62  ;;  %v420_v48 = vld [vmem:[#allocation4 + $0x3a0] sm:$0xff]  ;;  %v421_v50 = vld [vmem:[#allocation4 + $0x3a8] sm:$0xff]  ;;  %v5601_v52 = vcombine.low %v409_v41, %v413_v42 }
  0x94   : > { %v5608_v53 = vcombine.high %v416_v47, %v420_v48  ;;  %v5610_v54 = vcombine.high %v417_v49, %v421_v50  ;;  %v424_v55 = vld [vmem:[#allocation4 + $0x3c0] sm:$0xff]  ;;  %v425_v57 = vld [vmem:[#allocation4 + $0x3c8] sm:$0xff]  ;;  %v5607_v59 = vcombine.low %v416_v47, %v420_v48  ;;  %v5609_v60 = vcombine.low %v417_v49, %v421_v50 }
  0x95   : > { %v428_v56 = vld [vmem:[#allocation4 + $0x3e0] sm:$0xff]  ;;  %v429_v58 = vld [vmem:[#allocation4 + $0x3e8] sm:$0xff] }
  0x96   : > { %2875 = vmatpush1.bf16.msra.mxu0 %v5551_v3  ;;  %3184 = vmatpush1.bf16.msra.mxu1 %v5553_v4  ;;  %v5616_v61 = vcombine.high %v424_v55, %v428_v56  ;;  %v5618_v62 = vcombine.high %v425_v57, %v429_v58  ;;  %v432_v63 = vld [vmem:[#allocation4 + $0x400] sm:$0xff]  ;;  %v433_v1 = vld [vmem:[#allocation4 + $0x408] sm:$0xff]  ;;  %v5615_v3 = vcombine.low %v424_v55, %v428_v56 }
  0x97   : > { %2876 = vmatprep.subr.bf16.mxu0 %v5560_v5  ;;  %3185 = vmatprep.subr.bf16.mxu1 %v5562_v6  ;;  %v436_v0 = vld [vmem:[#allocation4 + $0x420] sm:$0xff]  ;;  %v437_v2 = vld [vmem:[#allocation4 + $0x428] sm:$0xff]  ;;  %v5617_v4 = vcombine.low %v425_v57, %v429_v58 }
  0x98   : > { %v5624_v5 = vcombine.high %v432_v63, %v436_v0  ;;  %v6292_v6 = vld [vmem:[%s6744_s26] ss:$24 sps:$4 sm:$0xff]   ;;  %v5626_v7 = vcombine.high %v433_v1, %v437_v2  ;;  %v6293_v18 = vld [vmem:[%s6744_s26 + $0x34] ss:$24 sps:$4 sm:$0xff]  }
  0x99   : > { %v440_v8 = vld [vmem:[#allocation4 + $0x440] sm:$0xff]  ;;  %v441_v10 = vld [vmem:[#allocation4 + $0x448] sm:$0xff] }
  0x9a   : > { %2877 = vmatpush1.bf16.msra.mxu0 %v5559_v11  ;;  %3186 = vmatpush1.bf16.msra.mxu1 %v5561_v12  ;;  %v444_v9 = vld [vmem:[#allocation4 + $0x460] sm:$0xff]  ;;  %v445_v11 = vld [vmem:[#allocation4 + $0x468] sm:$0xff]  ;;  %v5623_v12 = vcombine.low %v432_v63, %v436_v0 }
  0x9b   : > { %2878 = vmatprep.subr.bf16.mxu0 %v5568_v13  ;;  %3187 = vmatprep.subr.bf16.mxu1 %v5570_v14  ;;  %v5625_v13 = vcombine.low %v433_v1, %v437_v2  ;;  %v5632_v14 = vcombine.high %v440_v8, %v444_v9  ;;  %v448_v15 = vld [vmem:[#allocation4 + $0x480] sm:$0xff]  ;;  %v5634_v16 = vcombine.high %v441_v10, %v445_v11  ;;  %v481_v55 = vld [vmem:[#allocation4 + $0x588] sm:$0xff] }
  0x9c   : > { %v452_v17 = vld [vmem:[#allocation4 + $0x4a0] sm:$0xff]  ;;  %v485_v56 = vld [vmem:[#allocation4 + $0x5a8] sm:$0xff] }
  0x9d   : > { %v5640_v23 = vcombine.high %v448_v15, %v452_v17  ;;  %v456_v24 = vld [vmem:[#allocation4 + $0x4c0] sm:$0xff]  ;;  %v489_v63 = vld [vmem:[#allocation4 + $0x5c8] sm:$0xff] }
  0x9e   : > { %2879 = vmatpush1.bf16.msra.mxu0 %v5567_v19  ;;  %3188 = vmatpush1.bf16.msra.mxu1 %v5569_v20  ;;  %v449_v19 = vld [vmem:[#allocation4 + $0x488] sm:$0xff]  ;;  %v460_v26 = vld [vmem:[#allocation4 + $0x4e0] sm:$0xff] }
  0x9f   : > { %2880 = vmatprep.subr.bf16.mxu0 %v5576_v21  ;;  %3189 = vmatprep.subr.bf16.mxu1 %v5578_v22  ;;  %v453_v20 = vld [vmem:[#allocation4 + $0x4a8] sm:$0xff]  ;;  %v5631_v21 = vcombine.low %v440_v8, %v444_v9  ;;  %v5633_v22 = vcombine.low %v441_v10, %v445_v11  ;;  %v5648_v32 = vcombine.high %v456_v24, %v460_v26  ;;  %v464_v33 = vld [vmem:[#allocation4 + $0x500] sm:$0xff] }
  0xa0   : > { %v5642_v25 = vcombine.high %v449_v19, %v453_v20  ;;  %v5641_v31 = vcombine.low %v449_v19, %v453_v20  ;;  %v5647_v39 = vcombine.low %v456_v24, %v460_v26  ;;  %v472_v42 = vld [vmem:[#allocation4 + $0x540] sm:$0xff]  ;;  %v493_v0 = vld [vmem:[#allocation4 + $0x5e8] sm:$0xff] }
  0xa1   : > { %v6298_v47 = vld [vmem:[%s6744_s26 + $0x60] ss:$24 sps:$4 sm:$0xff]   ;;  %v6301_v1 = vld [vmem:[%s6744_s26 + $0x90] ss:$24 sps:$4 sm:$0xff]   ;;  %v6302_v8 = vld [vmem:[%s6744_s26 + $0xc4] ss:$24 sps:$4 sm:$0xff]  }
  0xa2   : > { %2881 = vmatpush1.bf16.msra.mxu0 %v5575_v27  ;;  %3190 = vmatpush1.bf16.msra.mxu1 %v5577_v28  ;;  %v457_v27 = vld [vmem:[#allocation4 + $0x4c8] sm:$0xff] }
  0xa3   : > { %2882 = vmatprep.subr.bf16.mxu0 %v5584_v29  ;;  %3191 = vmatprep.subr.bf16.mxu1 %v5586_v30  ;;  %v461_v28 = vld [vmem:[#allocation4 + $0x4e8] sm:$0xff]  ;;  %v5639_v30 = vcombine.low %v448_v15, %v452_v17 }
  0xa4   : > { %v6295_v29 = vld [vmem:[%s6744_s26 + $0x30] ss:$24 sps:$4 sm:$0xff]   ;;  %v5650_v34 = vcombine.high %v457_v27, %v461_v28  ;;  %v5649_v40 = vcombine.low %v457_v27, %v461_v28  ;;  %v6304_v19 = vld [vmem:[%s6744_s26 + $0xc0] ss:$24 sps:$4 sm:$0xff]   ;;  %v6305_v26 = vld [vmem:[%s6744_s26 + $0xf4] ss:$24 sps:$4 sm:$0xff]  }
  0xa5   : > { %v497_v9 = vld [vmem:[#allocation4 + $0x608] sm:$0xff] }
  0xa6   : > { %2883 = vmatpush1.bf16.msra.mxu0 %v5583_v35  ;;  %3192 = vmatpush1.bf16.msra.mxu1 %v5585_v36  ;;  %v468_v35 = vld [vmem:[#allocation4 + $0x520] sm:$0xff]  ;;  %v501_v10 = vld [vmem:[#allocation4 + $0x628] sm:$0xff] }
  0xa7   : > { %2884 = vmatprep.subr.bf16.mxu0 %v5592_v37  ;;  %3193 = vmatprep.subr.bf16.mxu1 %v5594_v38  ;;  %v6296_v36 = vld [vmem:[%s6744_s26 + $0x64] ss:$24 sps:$4 sm:$0xff]   ;;  %v5656_v41 = vcombine.high %v464_v33, %v468_v35  ;;  %v5655_v48 = vcombine.low %v464_v33, %v468_v35  ;;  %v5690_v15 = vcombine.high %v497_v9, %v501_v10 }
  0xa8   : > { %v465_v37 = vld [vmem:[#allocation4 + $0x508] sm:$0xff]  ;;  %v524_v33 = vld [vmem:[#allocation4 + $0x6e0] sm:$0xff] }
  0xa9   : > { %v469_v38 = vld [vmem:[#allocation4 + $0x528] sm:$0xff] }
  0xaa   : > { %2885 = vmatpush1.bf16.msra.mxu0 %v5591_v43  ;;  %3194 = vmatpush1.bf16.msra.mxu1 %v5593_v44  ;;  %v5658_v43 = vcombine.high %v465_v37, %v469_v38  ;;  %v476_v44 = vld [vmem:[#allocation4 + $0x560] sm:$0xff]  ;;  %v5657_v49 = vcombine.low %v465_v37, %v469_v38  ;;  %v505_v17 = vld [vmem:[#allocation4 + $0x648] sm:$0xff] }
  0xab   : > { %2886 = vmatprep.subr.bf16.mxu0 %v5600_v45  ;;  %3195 = vmatprep.subr.bf16.mxu1 %v5602_v46  ;;  %v473_v45 = vld [vmem:[#allocation4 + $0x548] sm:$0xff]  ;;  %v5664_v50 = vcombine.high %v472_v42, %v476_v44  ;;  %v5663_v57 = vcombine.low %v472_v42, %v476_v44  ;;  %v528_v42 = vld [vmem:[#allocation4 + $0x700] sm:$0xff] }
  0xac   : > { %v477_v46 = vld [vmem:[#allocation4 + $0x568] sm:$0xff] }
  0xad   : > { %v5665_v58 = vcombine.low %v473_v45, %v477_v46  ;;  %v513_v27 = vld [vmem:[#allocation4 + $0x688] sm:$0xff] }
  0xae   : > { %2887 = vmatpush1.bf16.msra.mxu0 %v5599_v51  ;;  %3196 = vmatpush1.bf16.msra.mxu1 %v5601_v52  ;;  %v480_v51 = vld [vmem:[#allocation4 + $0x580] sm:$0xff]  ;;  %v5666_v52 = vcombine.high %v473_v45, %v477_v46  ;;  %v517_v28 = vld [vmem:[#allocation4 + $0x6a8] sm:$0xff] }
  0xaf   : > { %2888 = vmatprep.subr.bf16.mxu0 %v5608_v53  ;;  %3197 = vmatprep.subr.bf16.mxu1 %v5610_v54  ;;  %v484_v53 = vld [vmem:[#allocation4 + $0x5a0] sm:$0xff]  ;;  %v5706_v35 = vcombine.high %v513_v27, %v517_v28  ;;  %v529_v45 = vld [vmem:[#allocation4 + $0x708] sm:$0xff] }
  0xb0   : > { %v6299_v54 = vld [vmem:[%s6744_s26 + $0x94] ss:$24 sps:$4 sm:$0xff]   ;;  %v5671_v2 = vcombine.low %v480_v51, %v484_v53  ;;  %v6307_v37 = vld [vmem:[%s6744_s26 + $0xf0] ss:$24 sps:$4 sm:$0xff]   ;;  %v6308_v44 = vld [vmem:[%s6744_s26 + $0x124] ss:$24 sps:$4 sm:$0xff]  }
  0xb1   : > { %v533_v46 = vld [vmem:[#allocation4 + $0x728] sm:$0xff] }
  0xb2   : > { %2889 = vmatpush1.bf16.msra.mxu0 %v5607_v59  ;;  %3198 = vmatpush1.bf16.msra.mxu1 %v5609_v60  ;;  %v5672_v59 = vcombine.high %v480_v51, %v484_v53  ;;  %v488_v60 = vld [vmem:[#allocation4 + $0x5c0] sm:$0xff]  ;;  %v537_v53 = vld [vmem:[#allocation4 + $0x748] sm:$0xff] }
  0xb3   : > { %2890 = vmatprep.subr.bf16.mxu0 %v5616_v61  ;;  %3199 = vmatprep.subr.bf16.mxu1 %v5618_v62  ;;  %v5674_v61 = vcombine.high %v481_v55, %v485_v56  ;;  %v492_v62 = vld [vmem:[#allocation4 + $0x5e0] sm:$0xff] }
  0xb4   : > { %v5679_v11 = vcombine.low %v488_v60, %v492_v62  ;;  %v536_v51 = vld [vmem:[#allocation4 + $0x740] sm:$0xff] }
  0xb6   : > { %2891 = vmatpush1.bf16.msra.mxu0 %v5615_v3  ;;  %3200 = vmatpush1.bf16.msra.mxu1 %v5617_v4  ;;  %v5673_v3 = vcombine.low %v481_v55, %v485_v56  ;;  %v5680_v4 = vcombine.high %v488_v60, %v492_v62  ;;  %v6310_v55 = vld [vmem:[%s6744_s26 + $0x120] ss:$24 sps:$4 sm:$0xff]   ;;  %v6313_v62 = vld [vmem:[%s6744_s26 + $0xc] ss:$24 sps:$4 sm:$0xff]  }
  0xb7   : > { %2963 = vmatprep.subr.bf16.mxu0 %v5624_v5  ;;  %3272 = vmatprep.subr.bf16.mxu1 %v5626_v7  ;;  %v496_v5 = vld [vmem:[#allocation4 + $0x600] sm:$0xff] }
  0xb8   : > { %v500_v7 = vld [vmem:[#allocation4 + $0x620] sm:$0xff] }
  0xb9   : > { %2893 = vmatmul.mubr.bf16.vlgmr.msra.gmra.mrb[0].mxu0 %v6292_v6  ;;  %3202 = vmatmul.mubr.bf16.vlgmr.msra.gmra.mrb[0].mxu1 %v6292_v6  ;;  %v5682_v6 = vcombine.high %v489_v63, %v493_v0  ;;  %v5687_v20 = vcombine.low %v496_v5, %v500_v7  ;;  %v544_v60 = vld [vmem:[#allocation4 + $0x780] sm:$0xff] }
  0xba   : > { %2964 = vmatpush1.bf16.msra.mxu0 %v5623_v12  ;;  %3273 = vmatpush1.bf16.msra.mxu1 %v5625_v13  ;;  %v5681_v12 = vcombine.low %v489_v63, %v493_v0  ;;  %v5688_v13 = vcombine.high %v496_v5, %v500_v7  ;;  %v545_v63 = vld [vmem:[#allocation4 + $0x788] sm:$0xff]  ;;  %v552_v5 = vld [vmem:[#allocation4 + $0x7c0] sm:$0xff] }
  0xbb   : > { %2965 = vmatprep.subr.bf16.mxu0 %v5632_v14  ;;  %3274 = vmatprep.subr.bf16.mxu1 %v5634_v16  ;;  %v504_v14 = vld [vmem:[#allocation4 + $0x640] sm:$0xff]  ;;  %v549_v0 = vld [vmem:[#allocation4 + $0x7a8] sm:$0xff] }
  0xbc   : > { %2902 = vmatprep.mubr.bf16.mxu0 %v6293_v18  ;;  %3211 = vmatprep.mubr.bf16.mxu1 %v6293_v18  ;;  %v508_v16 = vld [vmem:[#allocation4 + $0x660] sm:$0xff]  ;;  %v509_v18 = vld [vmem:[#allocation4 + $0x668] sm:$0xff] }
  0xbd   : > { %v5698_v24 = vcombine.high %v505_v17, %v509_v18  ;;  %v553_v7 = vld [vmem:[#allocation4 + $0x7c8] sm:$0xff] }
  0xbe   : > { %2966 = vmatpush1.bf16.msra.mxu0 %v5631_v21  ;;  %3275 = vmatpush1.bf16.msra.mxu1 %v5633_v22  ;;  %v5689_v21 = vcombine.low %v497_v9, %v501_v10  ;;  %v5696_v22 = vcombine.high %v504_v14, %v508_v16  ;;  %v5737_v10 = vcombine.low %v545_v63, %v549_v0 }
  0xbf   : > { %2967 = vmatprep.subr.bf16.mxu0 %v5640_v23  ;;  %3276 = vmatprep.subr.bf16.mxu1 %v5642_v25  ;;  %v512_v23 = vld [vmem:[#allocation4 + $0x680] sm:$0xff] }
  0xc0   : > { %v516_v25 = vld [vmem:[#allocation4 + $0x6a0] sm:$0xff] }
  0xc1   : > { %2903 = vmatmul.mubr.bf16.gmra.mrb[4].mxu0 %v6295_v29  ;;  %3212 = vmatmul.mubr.bf16.gmra.mrb[4].mxu1 %v6295_v29  ;;  %v5695_v29 = vcombine.low %v504_v14, %v508_v16  ;;  %v5703_v38 = vcombine.low %v512_v23, %v516_v25  ;;  %v564_v14 = vld [vmem:[#allocation4 + $0x820] sm:$0xff]  ;;  %v565_v16 = vld [vmem:[#allocation4 + $0x828] sm:$0xff] }
  0xc2   : > { %2968 = vmatpush1.bf16.msra.mxu0 %v5639_v30  ;;  %3277 = vmatpush1.bf16.msra.mxu1 %v5641_v31  ;;  %v5697_v30 = vcombine.low %v505_v17, %v509_v18  ;;  %v5704_v31 = vcombine.high %v512_v23, %v516_v25  ;;  %v6311_v23 = vld [vmem:[%s6744_s26 + $0x8] ss:$24 sps:$4 sm:$0xff]  }
  0xc3   : > { %2969 = vmatprep.subr.bf16.mxu0 %v5648_v32  ;;  %3278 = vmatprep.subr.bf16.mxu1 %v5650_v34  ;;  %v520_v32 = vld [vmem:[#allocation4 + $0x6c0] sm:$0xff]  ;;  %v521_v34 = vld [vmem:[#allocation4 + $0x6c8] sm:$0xff] }
  0xc4   : > { %2912 = vmatprep.mubr.bf16.mxu0 %v6296_v36  ;;  %3221 = vmatprep.mubr.bf16.mxu1 %v6296_v36  ;;  %v525_v36 = vld [vmem:[#allocation4 + $0x6e8] sm:$0xff] }
  0xc5   : > { %v573_v25 = vld [vmem:[#allocation4 + $0x868] sm:$0xff] }
  0xc6   : > { %2970 = vmatpush1.bf16.msra.mxu0 %v5647_v39  ;;  %3279 = vmatpush1.bf16.msra.mxu1 %v5649_v40  ;;  %v5705_v39 = vcombine.low %v513_v27, %v517_v28  ;;  %v5712_v40 = vcombine.high %v520_v32, %v524_v33 }
  0xc7   : > { %2971 = vmatprep.subr.bf16.mxu0 %v5656_v41  ;;  %3280 = vmatprep.subr.bf16.mxu1 %v5658_v43  ;;  %v5714_v41 = vcombine.high %v521_v34, %v525_v36  ;;  %v532_v43 = vld [vmem:[#allocation4 + $0x720] sm:$0xff] }
  0xc8   : > { %v5719_v56 = vcombine.low %v528_v42, %v532_v43 }
  0xc9   : > { %2913 = vmatmul.mubr.bf16.gmra.mrb[8].mxu0 %v6298_v47  ;;  %3222 = vmatmul.mubr.bf16.gmra.mrb[8].mxu1 %v6298_v47  ;;  %v5711_v47 = vcombine.low %v520_v32, %v524_v33  ;;  %v6314_v32 = vld [vmem:[%s6744_s26 + $0x3c] ss:$24 sps:$4 sm:$0xff]  }
  0xca   : > { %2972 = vmatpush1.bf16.msra.mxu0 %v5655_v48  ;;  %3281 = vmatpush1.bf16.msra.mxu1 %v5657_v49  ;;  %v5713_v48 = vcombine.low %v521_v34, %v525_v36  ;;  %v5720_v49 = vcombine.high %v528_v42, %v532_v43  ;;  %v577_v33 = vld [vmem:[#allocation4 + $0x888] sm:$0xff] }
  0xcb   : > { %2973 = vmatprep.subr.bf16.mxu0 %v5664_v50  ;;  %3282 = vmatprep.subr.bf16.mxu1 %v5666_v52  ;;  %v5722_v50 = vcombine.high %v529_v45, %v533_v46  ;;  %v540_v52 = vld [vmem:[#allocation4 + $0x760] sm:$0xff]  ;;  %v581_v34 = vld [vmem:[#allocation4 + $0x8a8] sm:$0xff] }
  0xcc   : > { %2922 = vmatprep.mubr.bf16.mxu0 %v6299_v54  ;;  %3231 = vmatprep.mubr.bf16.mxu1 %v6299_v54  ;;  %v541_v54 = vld [vmem:[#allocation4 + $0x768] sm:$0xff] }
  0xcd   : > { %v589_v42 = vld [vmem:[#allocation4 + $0x8e8] sm:$0xff] }
  0xce   : > { %2974 = vmatpush1.bf16.msra.mxu0 %v5663_v57  ;;  %3283 = vmatpush1.bf16.msra.mxu1 %v5665_v58  ;;  %v5721_v57 = vcombine.low %v529_v45, %v533_v46  ;;  %v5728_v58 = vcombine.high %v536_v51, %v540_v52  ;;  %v6316_v43 = vld [vmem:[%s6744_s26 + $0x38] ss:$24 sps:$4 sm:$0xff]   ;;  %v5769_v45 = vcombine.low %v577_v33, %v581_v34 }
  0xcf   : > { %2975 = vmatprep.subr.bf16.mxu0 %v5672_v59  ;;  %3284 = vmatprep.subr.bf16.mxu1 %v5674_v61  ;;  %v5730_v59 = vcombine.high %v537_v53, %v541_v54  ;;  %v548_v61 = vld [vmem:[#allocation4 + $0x7a0] sm:$0xff] }
  0xd0   : > { %v5735_v9 = vcombine.low %v544_v60, %v548_v61 }
  0xd1   : > { %2923 = vmatmul.mubr.bf16.gmra.mrb[12].mxu0 %v6301_v1  ;;  %3232 = vmatmul.mubr.bf16.gmra.mrb[12].mxu1 %v6301_v1  ;;  %v5727_v1 = vcombine.low %v536_v51, %v540_v52  ;;  %v593_v51 = vld [vmem:[#allocation4 + $0x908] sm:$0xff] }
  0xd2   : > { %2976 = vmatpush1.bf16.msra.mxu0 %v5671_v2  ;;  %3285 = vmatpush1.bf16.msra.mxu1 %v5673_v3  ;;  %v5729_v2 = vcombine.low %v537_v53, %v541_v54  ;;  %v5736_v3 = vcombine.high %v544_v60, %v548_v61  ;;  %v597_v52 = vld [vmem:[#allocation4 + $0x928] sm:$0xff] }
  0xd3   : > { %2977 = vmatprep.subr.bf16.mxu0 %v5680_v4  ;;  %3286 = vmatprep.subr.bf16.mxu1 %v5682_v6  ;;  %v5738_v4 = vcombine.high %v545_v63, %v549_v0  ;;  %v556_v6 = vld [vmem:[#allocation4 + $0x7e0] sm:$0xff]  ;;  %v605_v60 = vld [vmem:[#allocation4 + $0x968] sm:$0xff]  ;;  %v5785_v63 = vcombine.low %v593_v51, %v597_v52 }
  0xd4   : > { %2932 = vmatprep.mubr.bf16.mxu0 %v6302_v8  ;;  %3241 = vmatprep.mubr.bf16.mxu1 %v6302_v8  ;;  %v557_v8 = vld [vmem:[#allocation4 + $0x7e8] sm:$0xff]  ;;  %v5743_v17 = vcombine.low %v552_v5, %v556_v6 }
  0xd5   : > { %v5745_v18 = vcombine.low %v553_v7, %v557_v8  ;;  %v6319_v61 = vld [vmem:[%s6744_s26 + $0x68] ss:$24 sps:$4 sm:$0xff]  }
  0xd6   : > { %2978 = vmatpush1.bf16.msra.mxu0 %v5679_v11  ;;  %3287 = vmatpush1.bf16.msra.mxu1 %v5681_v12  ;;  %v5744_v11 = vcombine.high %v552_v5, %v556_v6  ;;  %v5746_v12 = vcombine.high %v553_v7, %v557_v8  ;;  %v609_v5 = vld [vmem:[#allocation4 + $0x988] sm:$0xff] }
  0xd7   : > { %2979 = vmatprep.subr.bf16.mxu0 %v5688_v13  ;;  %3288 = vmatprep.subr.bf16.mxu1 %v5690_v15  ;;  %v560_v13 = vld [vmem:[#allocation4 + $0x800] sm:$0xff]  ;;  %v561_v15 = vld [vmem:[#allocation4 + $0x808] sm:$0xff] }
  0xd8   : > { %v5753_v27 = vcombine.low %v561_v15, %v565_v16  ;;  %v613_v6 = vld [vmem:[#allocation4 + $0x9a8] sm:$0xff] }
  0xd9   : > { %2933 = vmatmul.mubr.bf16.gmra.mrb[16].mxu0 %v6304_v19  ;;  %3242 = vmatmul.mubr.bf16.gmra.mrb[16].mxu1 %v6304_v19  ;;  %v5752_v19 = vcombine.high %v560_v13, %v564_v14 }
  0xda   : > { %2980 = vmatpush1.bf16.msra.mxu0 %v5687_v20  ;;  %3289 = vmatpush1.bf16.msra.mxu1 %v5689_v21  ;;  %v5754_v20 = vcombine.high %v561_v15, %v565_v16  ;;  %v568_v21 = vld [vmem:[#allocation4 + $0x840] sm:$0xff] }
  0xdb   : > { %2981 = vmatprep.subr.bf16.mxu0 %v5696_v22  ;;  %3290 = vmatprep.subr.bf16.mxu1 %v5698_v24  ;;  %v572_v22 = vld [vmem:[#allocation4 + $0x860] sm:$0xff]  ;;  %v569_v24 = vld [vmem:[#allocation4 + $0x848] sm:$0xff] }
  0xdc   : > { %2942 = vmatprep.mubr.bf16.mxu0 %v6305_v26  ;;  %3251 = vmatprep.mubr.bf16.mxu1 %v6305_v26  ;;  %v5751_v26 = vcombine.low %v560_v13, %v564_v14  ;;  %v5760_v28 = vcombine.high %v568_v21, %v572_v22  ;;  %v5761_v36 = vcombine.low %v569_v24, %v573_v25  ;;  %v617_v13 = vld [vmem:[#allocation4 + $0x9c8] sm:$0xff] }
  0xdd   : > { %v621_v14 = vld [vmem:[#allocation4 + $0x9e8] sm:$0xff] }
  0xde   : > { %2982 = vmatpush1.bf16.msra.mxu0 %v5695_v29  ;;  %3291 = vmatpush1.bf16.msra.mxu1 %v5697_v30  ;;  %v5762_v29 = vcombine.high %v569_v24, %v573_v25  ;;  %v576_v30 = vld [vmem:[#allocation4 + $0x880] sm:$0xff]  ;;  %v629_v24 = vld [vmem:[#allocation4 + $0xa28] sm:$0xff] }
  0xdf   : > { %2983 = vmatprep.subr.bf16.mxu0 %v5704_v31  ;;  %3292 = vmatprep.subr.bf16.mxu1 %v5706_v35  ;;  %v580_v31 = vld [vmem:[#allocation4 + $0x8a0] sm:$0xff]  ;;  %v5759_v35 = vcombine.low %v568_v21, %v572_v22 }
  0xe0   : > { %v6322_v15 = vld [vmem:[%s6744_s26 + $0x98] ss:$24 sps:$4 sm:$0xff]   ;;  %v6323_v22 = vld [vmem:[%s6744_s26 + $0xcc] ss:$24 sps:$4 sm:$0xff]  }
  0xe1   : > { %2943 = vmatmul.mubr.bf16.gmra.mrb[20].mxu0 %v6307_v37  ;;  %3252 = vmatmul.mubr.bf16.gmra.mrb[20].mxu1 %v6307_v37  ;;  %v5768_v37 = vcombine.high %v576_v30, %v580_v31  ;;  %v628_v21 = vld [vmem:[#allocation4 + $0xa20] sm:$0xff] }
  0xe2   : > { %2984 = vmatpush1.bf16.msra.mxu0 %v5703_v38  ;;  %3293 = vmatpush1.bf16.msra.mxu1 %v5705_v39  ;;  %v5770_v38 = vcombine.high %v577_v33, %v581_v34  ;;  %v584_v39 = vld [vmem:[#allocation4 + $0x8c0] sm:$0xff] }
  0xe3   : > { %2985 = vmatprep.subr.bf16.mxu0 %v5712_v40  ;;  %3294 = vmatprep.subr.bf16.mxu1 %v5714_v41  ;;  %v588_v40 = vld [vmem:[#allocation4 + $0x8e0] sm:$0xff]  ;;  %v585_v41 = vld [vmem:[#allocation4 + $0x8c8] sm:$0xff] }
  0xe4   : > { %2952 = vmatprep.mubr.bf16.mxu0 %v6308_v44  ;;  %3261 = vmatprep.mubr.bf16.mxu1 %v6308_v44  ;;  %v5767_v44 = vcombine.low %v576_v30, %v580_v31  ;;  %v5776_v46 = vcombine.high %v584_v39, %v588_v40  ;;  %v5775_v53 = vcombine.low %v584_v39, %v588_v40  ;;  %v636_v30 = vld [vmem:[#allocation4 + $0xa60] sm:$0xff]  ;;  %v633_v31 = vld [vmem:[#allocation4 + $0xa48] sm:$0xff] }
  0xe5   : > { %v5777_v54 = vcombine.low %v585_v41, %v589_v42  ;;  %v6325_v33 = vld [vmem:[%s6744_s26 + $0xc8] ss:$24 sps:$4 sm:$0xff]   ;;  %v6326_v40 = vld [vmem:[%s6744_s26 + $0xfc] ss:$24 sps:$4 sm:$0xff]  }
  0xe6   : > { %2986 = vmatpush1.bf16.msra.mxu0 %v5711_v47  ;;  %3295 = vmatpush1.bf16.msra.mxu1 %v5713_v48  ;;  %v5778_v47 = vcombine.high %v585_v41, %v589_v42  ;;  %v592_v48 = vld [vmem:[#allocation4 + $0x900] sm:$0xff]  ;;  %v641_v41 = vld [vmem:[#allocation4 + $0xa88] sm:$0xff] }
  0xe7   : > { %2987 = vmatprep.subr.bf16.mxu0 %v5720_v49  ;;  %3296 = vmatprep.subr.bf16.mxu1 %v5722_v50  ;;  %v596_v49 = vld [vmem:[#allocation4 + $0x920] sm:$0xff]  ;;  %v645_v42 = vld [vmem:[#allocation4 + $0xaa8] sm:$0xff] }
  0xe8   : > { %v6317_v50 = vld [vmem:[%s6744_s26 + $0x6c] ss:$24 sps:$4 sm:$0xff]  }
  0xe9   : > { %2953 = vmatmul.mubr.bf16.gmra.mrb[24].mxu0 %v6310_v55  ;;  %3262 = vmatmul.mubr.bf16.gmra.mrb[24].mxu1 %v6310_v55  ;;  %v5784_v55 = vcombine.high %v592_v48, %v596_v49  ;;  %v644_v39 = vld [vmem:[#allocation4 + $0xaa0] sm:$0xff] }
  0xea   : > { %2988 = vmatpush1.bf16.msra.mxu0 %v5719_v56  ;;  %3297 = vmatpush1.bf16.msra.mxu1 %v5721_v57  ;;  %v5786_v56 = vcombine.high %v593_v51, %v597_v52  ;;  %v600_v57 = vld [vmem:[#allocation4 + $0x940] sm:$0xff] }
  0xeb   : > { %2989 = vmatprep.subr.bf16.mxu0 %v5728_v58  ;;  %3298 = vmatprep.subr.bf16.mxu1 %v5730_v59  ;;  %v604_v58 = vld [vmem:[#allocation4 + $0x960] sm:$0xff]  ;;  %v601_v59 = vld [vmem:[#allocation4 + $0x948] sm:$0xff] }
  0xec   : > { %2995 = vmatprep.mubr.bf16.mxu0 %v6313_v62  ;;  %3304 = vmatprep.mubr.bf16.mxu1 %v6313_v62  ;;  %v5783_v62 = vcombine.low %v592_v48, %v596_v49  ;;  %v5792_v0 = vcombine.high %v600_v57, %v604_v58  ;;  %v5791_v7 = vcombine.low %v600_v57, %v604_v58  ;;  %v652_v48 = vld [vmem:[#allocation4 + $0xae0] sm:$0xff]  ;;  %v649_v49 = vld [vmem:[#allocation4 + $0xac8] sm:$0xff] }
  0xed   : > { %v5793_v8 = vcombine.low %v601_v59, %v605_v60  ;;  %v6328_v51 = vld [vmem:[%s6744_s26 + $0xf8] ss:$24 sps:$4 sm:$0xff]   ;;  %v6329_v58 = vld [vmem:[%s6744_s26 + $0x12c] ss:$24 sps:$4 sm:$0xff]  }
  0xee   : > { %2990 = vmatpush1.bf16.msra.mxu0 %v5727_v1  ;;  %3299 = vmatpush1.bf16.msra.mxu1 %v5729_v2  ;;  %v5794_v1 = vcombine.high %v601_v59, %v605_v60  ;;  %v608_v2 = vld [vmem:[#allocation4 + $0x980] sm:$0xff]  ;;  %v657_v59 = vld [vmem:[#allocation4 + $0xb08] sm:$0xff] }
  0xef   : > { %2991 = vmatprep.subr.bf16.mxu0 %v5736_v3  ;;  %3300 = vmatprep.subr.bf16.mxu1 %v5738_v4  ;;  %v612_v3 = vld [vmem:[#allocation4 + $0x9a0] sm:$0xff]  ;;  %v661_v60 = vld [vmem:[#allocation4 + $0xb28] sm:$0xff] }
  0xf0   : > { %v6320_v4 = vld [vmem:[%s6744_s26 + $0x9c] ss:$24 sps:$4 sm:$0xff]   ;;  %v5799_v16 = vcombine.low %v608_v2, %v612_v3 }
  0xf1   : > { %v660_v57 = vld [vmem:[#allocation4 + $0xb20] sm:$0xff] }
  0xf2   : > { %2992 = vmatpush1.bf16.msra.mxu0 %v5735_v9  ;;  %3301 = vmatpush1.bf16.msra.mxu1 %v5737_v10  ;;  %v5800_v9 = vcombine.high %v608_v2, %v612_v3  ;;  %v5802_v10 = vcombine.high %v609_v5, %v613_v6  ;;  %v668_v2 = vld [vmem:[#allocation4 + $0xb60] sm:$0xff]  ;;  %v665_v3 = vld [vmem:[#allocation4 + $0xb48] sm:$0xff] }
  0xf3   : > { %2993 = vmatprep.subr.bf16.mxu0 %v5744_v11  ;;  %3302 = vmatprep.subr.bf16.mxu1 %v5746_v12  ;;  %v616_v11 = vld [vmem:[#allocation4 + $0x9c0] sm:$0xff] }
  0xf4   : > { %v620_v12 = vld [vmem:[#allocation4 + $0x9e0] sm:$0xff] }
  0xf5   : > { %v5807_v25 = vcombine.low %v616_v11, %v620_v12 }
  0xf6   : > { %2994 = vmatpush1.bf16.msra.mxu0 %v5743_v17  ;;  %3303 = vmatpush1.bf16.msra.mxu1 %v5745_v18  ;;  %v5801_v17 = vcombine.low %v609_v5, %v613_v6  ;;  %v5808_v18 = vcombine.high %v616_v11, %v620_v12  ;;  %v6331_v5 = vld [vmem:[%s6744_s26 + $0x128] ss:$24 sps:$4 sm:$0xff]   ;;  %v6334_v12 = vld [vmem:[%s6744_s26 + $0x14] ss:$24 sps:$4 sm:$0xff]  }
  0xf7   : > { %3066 = vmatprep.subr.bf16.mxu0 %v5752_v19  ;;  %3375 = vmatprep.subr.bf16.mxu1 %v5754_v20  ;;  %v5810_v19 = vcombine.high %v617_v13, %v621_v14  ;;  %v624_v20 = vld [vmem:[#allocation4 + $0xa00] sm:$0xff] }
  0xf8   : > { %v5815_v34 = vcombine.low %v624_v20, %v628_v21  ;;  %v676_v11 = vld [vmem:[#allocation4 + $0xba0] sm:$0xff] }
  0xf9   : > { %2996 = vmatmul.mubr.bf16.vlgmr.msra.gmra.mrb[0].mxu0 %v6311_v23  ;;  %3305 = vmatmul.mubr.bf16.vlgmr.msra.gmra.mrb[0].mxu1 %v6311_v23  ;;  %v625_v23 = vld [vmem:[#allocation4 + $0xa08] sm:$0xff] }
  0xfa   : > { %3067 = vmatpush1.bf16.msra.mxu0 %v5751_v26  ;;  %3376 = vmatpush1.bf16.msra.mxu1 %v5753_v27  ;;  %v5809_v26 = vcombine.low %v617_v13, %v621_v14  ;;  %v5816_v27 = vcombine.high %v624_v20, %v628_v21  ;;  %v673_v13 = vld [vmem:[#allocation4 + $0xb88] sm:$0xff]  ;;  %v684_v20 = vld [vmem:[#allocation4 + $0xbe0] sm:$0xff] }
  0xfb   : > { %3068 = vmatprep.subr.bf16.mxu0 %v5760_v28  ;;  %3377 = vmatprep.subr.bf16.mxu1 %v5762_v29  ;;  %v5818_v28 = vcombine.high %v625_v23, %v629_v24  ;;  %v632_v29 = vld [vmem:[#allocation4 + $0xa40] sm:$0xff]  ;;  %v677_v14 = vld [vmem:[#allocation4 + $0xba8] sm:$0xff] }
  0xfc   : > { %3005 = vmatprep.mubr.bf16.mxu0 %v6314_v32  ;;  %3314 = vmatprep.mubr.bf16.mxu1 %v6314_v32  ;;  %v637_v32 = vld [vmem:[#allocation4 + $0xa68] sm:$0xff] }
  0xfd   : > { %v681_v21 = vld [vmem:[#allocation4 + $0xbc8] sm:$0xff] }
  0xfe   : > { %3069 = vmatpush1.bf16.msra.mxu0 %v5759_v35  ;;  %3378 = vmatpush1.bf16.msra.mxu1 %v5761_v36  ;;  %v5817_v35 = vcombine.low %v625_v23, %v629_v24  ;;  %v5824_v36 = vcombine.high %v632_v29, %v636_v30  ;;  %v5865_v24 = vcombine.low %v673_v13, %v677_v14 }
  0xff   : > { %3070 = vmatprep.subr.bf16.mxu0 %v5768_v37  ;;  %3379 = vmatprep.subr.bf16.mxu1 %v5770_v38  ;;  %v5826_v37 = vcombine.high %v633_v31, %v637_v32  ;;  %v640_v38 = vld [vmem:[#allocation4 + $0xa80] sm:$0xff] }
 0x100   : > { %v5831_v52 = vcombine.low %v640_v38, %v644_v39 }
 0x101   : > { %3006 = vmatmul.mubr.bf16.gmra.mrb[4].mxu0 %v6316_v43  ;;  %3315 = vmatmul.mubr.bf16.gmra.mrb[4].mxu1 %v6316_v43  ;;  %v5823_v43 = vcombine.low %v632_v29, %v636_v30  ;;  %v307_v29 = vld [vmem:[#allocation4 + $0x18] sm:$0xff] }
 0x102   : > { %3071 = vmatpush1.bf16.msra.mxu0 %v5767_v44  ;;  %3380 = vmatpush1.bf16.msra.mxu1 %v5769_v45  ;;  %v5825_v44 = vcombine.low %v633_v31, %v637_v32  ;;  %v5832_v45 = vcombine.high %v640_v38, %v644_v39  ;;  %v311_v30 = vld [vmem:[#allocation4 + $0x38] sm:$0xff] }
 0x103   : > { %3072 = vmatprep.subr.bf16.mxu0 %v5776_v46  ;;  %3381 = vmatprep.subr.bf16.mxu1 %v5778_v47  ;;  %v5834_v46 = vcombine.high %v641_v41, %v645_v42  ;;  %v648_v47 = vld [vmem:[#allocation4 + $0xac0] sm:$0xff]  ;;  %v315_v38 = vld [vmem:[#allocation4 + $0x58] sm:$0xff] }
 0x104   : > { %3015 = vmatprep.mubr.bf16.mxu0 %v6317_v50  ;;  %3324 = vmatprep.mubr.bf16.mxu1 %v6317_v50  ;;  %v653_v50 = vld [vmem:[#allocation4 + $0xae8] sm:$0xff]  ;;  %v319_v39 = vld [vmem:[#allocation4 + $0x78] sm:$0xff] }
 0x106   : > { %3073 = vmatpush1.bf16.msra.mxu0 %v5775_v53  ;;  %3382 = vmatpush1.bf16.msra.mxu1 %v5777_v54  ;;  %v5833_v53 = vcombine.low %v641_v41, %v645_v42  ;;  %v5840_v54 = vcombine.high %v648_v47, %v652_v48  ;;  %v5501_v41 = vcombine.low %v307_v29, %v311_v30 }
 0x107   : > { %3074 = vmatprep.subr.bf16.mxu0 %v5784_v55  ;;  %3383 = vmatprep.subr.bf16.mxu1 %v5786_v56  ;;  %v5842_v55 = vcombine.high %v649_v49, %v653_v50  ;;  %v656_v56 = vld [vmem:[#allocation4 + $0xb00] sm:$0xff] }
 0x108   : > { %v5847_v6 = vcombine.low %v656_v56, %v660_v57 }
 0x109   : > { %3016 = vmatmul.mubr.bf16.gmra.mrb[8].mxu0 %v6319_v61  ;;  %3325 = vmatmul.mubr.bf16.gmra.mrb[8].mxu1 %v6319_v61  ;;  %v5839_v61 = vcombine.low %v648_v47, %v652_v48  ;;  %v323_v47 = vld [vmem:[#allocation4 + $0x98] sm:$0xff] }
 0x10a   : > { %3075 = vmatpush1.bf16.msra.mxu0 %v5783_v62  ;;  %3384 = vmatpush1.bf16.msra.mxu1 %v5785_v63  ;;  %v5841_v62 = vcombine.low %v649_v49, %v653_v50  ;;  %v5848_v63 = vcombine.high %v656_v56, %v660_v57  ;;  %v327_v48 = vld [vmem:[#allocation4 + $0xb8] sm:$0xff]  ;;  %v5509_v50 = vcombine.low %v315_v38, %v319_v39 }
 0x10b   : > { %3076 = vmatprep.subr.bf16.mxu0 %v5792_v0  ;;  %3385 = vmatprep.subr.bf16.mxu1 %v5794_v1  ;;  %v5850_v0 = vcombine.high %v657_v59, %v661_v60  ;;  %v664_v1 = vld [vmem:[#allocation4 + $0xb40] sm:$0xff]  ;;  %v331_v56 = vld [vmem:[#allocation4 + $0xd8] sm:$0xff] }
 0x10c   : > { %3025 = vmatprep.mubr.bf16.mxu0 %v6320_v4  ;;  %3334 = vmatprep.mubr.bf16.mxu1 %v6320_v4  ;;  %v669_v4 = vld [vmem:[#allocation4 + $0xb68] sm:$0xff]  ;;  %v335_v57 = vld [vmem:[#allocation4 + $0xf8] sm:$0xff] }
 0x10e   : > { %3077 = vmatpush1.bf16.msra.mxu0 %v5791_v7  ;;  %3386 = vmatpush1.bf16.msra.mxu1 %v5793_v8  ;;  %v5849_v7 = vcombine.low %v657_v59, %v661_v60  ;;  %v5856_v8 = vcombine.high %v664_v1, %v668_v2  ;;  %v5517_v59 = vcombine.low %v323_v47, %v327_v48 }
 0x10f   : > { %3078 = vmatprep.subr.bf16.mxu0 %v5800_v9  ;;  %3387 = vmatprep.subr.bf16.mxu1 %v5802_v10  ;;  %v5858_v9 = vcombine.high %v665_v3, %v669_v4  ;;  %v672_v10 = vld [vmem:[#allocation4 + $0xb80] sm:$0xff] }
 0x110   : > { %v5863_v23 = vcombine.low %v672_v10, %v676_v11 }
 0x111   : > { %3026 = vmatmul.mubr.bf16.gmra.mrb[12].mxu0 %v6322_v15  ;;  %3335 = vmatmul.mubr.bf16.gmra.mrb[12].mxu1 %v6322_v15  ;;  %v5855_v15 = vcombine.low %v664_v1, %v668_v2  ;;  %v339_v1 = vld [vmem:[#allocation4 + $0x118] sm:$0xff] }
 0x112   : > { %3079 = vmatpush1.bf16.msra.mxu0 %v5799_v16  ;;  %3388 = vmatpush1.bf16.msra.mxu1 %v5801_v17  ;;  %v5857_v16 = vcombine.low %v665_v3, %v669_v4  ;;  %v5864_v17 = vcombine.high %v672_v10, %v676_v11  ;;  %v343_v2 = vld [vmem:[#allocation4 + $0x138] sm:$0xff]  ;;  %v5525_v4 = vcombine.low %v331_v56, %v335_v57 }
 0x113   : > { %3080 = vmatprep.subr.bf16.mxu0 %v5808_v18  ;;  %3389 = vmatprep.subr.bf16.mxu1 %v5810_v19  ;;  %v5866_v18 = vcombine.high %v673_v13, %v677_v14  ;;  %v680_v19 = vld [vmem:[#allocation4 + $0xbc0] sm:$0xff]  ;;  %v347_v10 = vld [vmem:[#allocation4 + $0x158] sm:$0xff]  ;;  %v5533_v13 = vcombine.low %v339_v1, %v343_v2 }
 0x114   : > { %3035 = vmatprep.mubr.bf16.mxu0 %v6323_v22  ;;  %3344 = vmatprep.mubr.bf16.mxu1 %v6323_v22  ;;  %v685_v22 = vld [vmem:[#allocation4 + $0xbe8] sm:$0xff]  ;;  %v5871_v31 = vcombine.low %v680_v19, %v684_v20  ;;  %v351_v11 = vld [vmem:[#allocation4 + $0x178] sm:$0xff] }
 0x115   : > { %v5873_v32 = vcombine.low %v681_v21, %v685_v22 }
 0x116   : > { %3081 = vmatpush1.bf16.msra.mxu0 %v5807_v25  ;;  %3390 = vmatpush1.bf16.msra.mxu1 %v5809_v26  ;;  %v5872_v25 = vcombine.high %v680_v19, %v684_v20  ;;  %v5874_v26 = vcombine.high %v681_v21, %v685_v22  ;;  %v355_v19 = vld [vmem:[#allocation4 + $0x198] sm:$0xff]  ;;  %v5541_v22 = vcombine.low %v347_v10, %v351_v11 }
 0x117   : > { %3082 = vmatprep.subr.bf16.mxu0 %v5816_v27  ;;  %3391 = vmatprep.subr.bf16.mxu1 %v5818_v28  ;;  %v306_v27 = vld [vmem:[#allocation4 + $0x10] sm:$0xff]  ;;  %v359_v20 = vld [vmem:[#allocation4 + $0x1b8] sm:$0xff] }
 0x118   : > { %v310_v28 = vld [vmem:[#allocation4 + $0x30] sm:$0xff] }
 0x119   : > { %3036 = vmatmul.mubr.bf16.gmra.mrb[16].mxu0 %v6325_v33  ;;  %3345 = vmatmul.mubr.bf16.gmra.mrb[16].mxu1 %v6325_v33  ;;  %v5500_v33 = vcombine.high %v306_v27, %v310_v28 }
 0x11a   : > { %3083 = vmatpush1.bf16.msra.mxu0 %v5815_v34  ;;  %3392 = vmatpush1.bf16.msra.mxu1 %v5817_v35  ;;  %v5502_v34 = vcombine.high %v307_v29, %v311_v30  ;;  %v314_v35 = vld [vmem:[#allocation4 + $0x50] sm:$0xff]  ;;  %v367_v29 = vld [vmem:[#allocation4 + $0x1f8] sm:$0xff] }
 0x11b   : > { %3084 = vmatprep.subr.bf16.mxu0 %v5824_v36  ;;  %3393 = vmatprep.subr.bf16.mxu1 %v5826_v37  ;;  %v318_v36 = vld [vmem:[#allocation4 + $0x70] sm:$0xff] }
 0x11c   : > { %3045 = vmatprep.mubr.bf16.mxu0 %v6326_v40  ;;  %3354 = vmatprep.mubr.bf16.mxu1 %v6326_v40  ;;  %v6332_v37 = vld [vmem:[%s6744_s26 + $0x10] ss:$24 sps:$4 sm:$0xff]   ;;  %v5499_v40 = vcombine.low %v306_v27, %v310_v28  ;;  %v5508_v42 = vcombine.high %v314_v35, %v318_v36  ;;  %v5507_v49 = vcombine.low %v314_v35, %v318_v36  ;;  %v6343_v27 = vld [vmem:[%s6744_s26 + $0xa0] ss:$24 sps:$4 sm:$0xff]  }
 0x11d   : > { %v363_v28 = vld [vmem:[#allocation4 + $0x1d8] sm:$0xff]  ;;  %v370_v35 = vld [vmem:[#allocation4 + $0x210] sm:$0xff] }
 0x11e   : > { %3085 = vmatpush1.bf16.msra.mxu0 %v5823_v43  ;;  %3394 = vmatpush1.bf16.msra.mxu1 %v5825_v44  ;;  %v5510_v43 = vcombine.high %v315_v38, %v319_v39  ;;  %v6335_v44 = vld [vmem:[%s6744_s26 + $0x44] ss:$24 sps:$4 sm:$0xff]  }
 0x11f   : > { %3086 = vmatprep.subr.bf16.mxu0 %v5832_v45  ;;  %3395 = vmatprep.subr.bf16.mxu1 %v5834_v46  ;;  %v322_v45 = vld [vmem:[#allocation4 + $0x90] sm:$0xff]  ;;  %v375_v38 = vld [vmem:[#allocation4 + $0x238] sm:$0xff] }
 0x120   : > { %v326_v46 = vld [vmem:[#allocation4 + $0xb0] sm:$0xff] }
 0x121   : > { %3046 = vmatmul.mubr.bf16.gmra.mrb[20].mxu0 %v6328_v51  ;;  %3355 = vmatmul.mubr.bf16.gmra.mrb[20].mxu1 %v6328_v51  ;;  %v5516_v51 = vcombine.high %v322_v45, %v326_v46  ;;  %v374_v36 = vld [vmem:[#allocation4 + $0x230] sm:$0xff] }
 0x122   : > { %3087 = vmatpush1.bf16.msra.mxu0 %v5831_v52  ;;  %3396 = vmatpush1.bf16.msra.mxu1 %v5833_v53  ;;  %v5518_v52 = vcombine.high %v323_v47, %v327_v48  ;;  %v330_v53 = vld [vmem:[#allocation4 + $0xd0] sm:$0xff]  ;;  %v383_v47 = vld [vmem:[#allocation4 + $0x278] sm:$0xff]  ;;  %v5563_v48 = vcombine.low %v370_v35, %v374_v36 }
 0x123   : > { %3088 = vmatprep.subr.bf16.mxu0 %v5840_v54  ;;  %3397 = vmatprep.subr.bf16.mxu1 %v5842_v55  ;;  %v334_v54 = vld [vmem:[#allocation4 + $0xf0] sm:$0xff] }
 0x124   : > { %3055 = vmatprep.mubr.bf16.mxu0 %v6329_v58  ;;  %3364 = vmatprep.mubr.bf16.mxu1 %v6329_v58  ;;  %v6337_v55 = vld [vmem:[%s6744_s26 + $0x40] ss:$24 sps:$4 sm:$0xff]   ;;  %v5515_v58 = vcombine.low %v322_v45, %v326_v46  ;;  %v5524_v60 = vcombine.high %v330_v53, %v334_v54  ;;  %v5523_v3 = vcombine.low %v330_v53, %v334_v54  ;;  %v6346_v45 = vld [vmem:[%s6744_s26 + $0xd0] ss:$24 sps:$4 sm:$0xff]  }
 0x125   : > { %v379_v46 = vld [vmem:[#allocation4 + $0x258] sm:$0xff]  ;;  %v386_v53 = vld [vmem:[#allocation4 + $0x290] sm:$0xff] }
 0x126   : > { %3089 = vmatpush1.bf16.msra.mxu0 %v5839_v61  ;;  %3398 = vmatpush1.bf16.msra.mxu1 %v5841_v62  ;;  %v5526_v61 = vcombine.high %v331_v56, %v335_v57  ;;  %v6338_v62 = vld [vmem:[%s6744_s26 + $0x74] ss:$24 sps:$4 sm:$0xff]  }
 0x127   : > { %3090 = vmatprep.subr.bf16.mxu0 %v5848_v63  ;;  %3399 = vmatprep.subr.bf16.mxu1 %v5850_v0  ;;  %v338_v63 = vld [vmem:[#allocation4 + $0x110] sm:$0xff]  ;;  %v391_v56 = vld [vmem:[#allocation4 + $0x2b8] sm:$0xff] }
 0x128   : > { %v342_v0 = vld [vmem:[#allocation4 + $0x130] sm:$0xff] }
 0x129   : > { %3056 = vmatmul.mubr.bf16.gmra.mrb[24].mxu0 %v6331_v5  ;;  %3365 = vmatmul.mubr.bf16.gmra.mrb[24].mxu1 %v6331_v5  ;;  %v5532_v5 = vcombine.high %v338_v63, %v342_v0  ;;  %v390_v54 = vld [vmem:[#allocation4 + $0x2b0] sm:$0xff] }
 0x12a   : > { %3091 = vmatpush1.bf16.msra.mxu0 %v5847_v6  ;;  %3400 = vmatpush1.bf16.msra.mxu1 %v5849_v7  ;;  %v5534_v6 = vcombine.high %v339_v1, %v343_v2  ;;  %v346_v7 = vld [vmem:[#allocation4 + $0x150] sm:$0xff]  ;;  %v399_v1 = vld [vmem:[#allocation4 + $0x2f8] sm:$0xff]  ;;  %v5579_v2 = vcombine.low %v386_v53, %v390_v54 }
 0x12b   : > { %3092 = vmatprep.subr.bf16.mxu0 %v5856_v8  ;;  %3401 = vmatprep.subr.bf16.mxu1 %v5858_v9  ;;  %v350_v8 = vld [vmem:[#allocation4 + $0x170] sm:$0xff] }
 0x12c   : > { %3098 = vmatprep.mubr.bf16.mxu0 %v6334_v12  ;;  %3407 = vmatprep.mubr.bf16.mxu1 %v6334_v12  ;;  %v6340_v9 = vld [vmem:[%s6744_s26 + $0x70] ss:$24 sps:$4 sm:$0xff]   ;;  %v5531_v12 = vcombine.low %v338_v63, %v342_v0  ;;  %v5540_v14 = vcombine.high %v346_v7, %v350_v8  ;;  %v5539_v21 = vcombine.low %v346_v7, %v350_v8  ;;  %v6349_v63 = vld [vmem:[%s6744_s26 + $0x100] ss:$24 sps:$4 sm:$0xff]  }
 0x12d   : > { %v395_v0 = vld [vmem:[#allocation4 + $0x2d8] sm:$0xff]  ;;  %v402_v7 = vld [vmem:[#allocation4 + $0x310] sm:$0xff] }
 0x12e   : > { %3093 = vmatpush1.bf16.msra.mxu0 %v5855_v15  ;;  %3402 = vmatpush1.bf16.msra.mxu1 %v5857_v16  ;;  %v5542_v15 = vcombine.high %v347_v10, %v351_v11  ;;  %v6341_v16 = vld [vmem:[%s6744_s26 + $0xa4] ss:$24 sps:$4 sm:$0xff]  }
 0x12f   : > { %3094 = vmatprep.subr.bf16.mxu0 %v5864_v17  ;;  %3403 = vmatprep.subr.bf16.mxu1 %v5866_v18  ;;  %v354_v17 = vld [vmem:[#allocation4 + $0x190] sm:$0xff]  ;;  %v407_v10 = vld [vmem:[#allocation4 + $0x338] sm:$0xff] }
 0x130   : > { %v358_v18 = vld [vmem:[#allocation4 + $0x1b0] sm:$0xff] }
 0x131   : > { %v5547_v30 = vcombine.low %v354_v17, %v358_v18  ;;  %v406_v8 = vld [vmem:[#allocation4 + $0x330] sm:$0xff] }
 0x132   : > { %3095 = vmatpush1.bf16.msra.mxu0 %v5863_v23  ;;  %3404 = vmatpush1.bf16.msra.mxu1 %v5865_v24  ;;  %v5548_v23 = vcombine.high %v354_v17, %v358_v18  ;;  %v5550_v24 = vcombine.high %v355_v19, %v359_v20  ;;  %v6352_v17 = vld [vmem:[%s6744_s26 + $0x130] ss:$24 sps:$4 sm:$0xff]  }
 0x133   : > { %3096 = vmatprep.subr.bf16.mxu0 %v5872_v25  ;;  %3405 = vmatprep.subr.bf16.mxu1 %v5874_v26  ;;  %v362_v25 = vld [vmem:[#allocation4 + $0x1d0] sm:$0xff]  ;;  %v411_v18 = vld [vmem:[#allocation4 + $0x358] sm:$0xff] }
 0x134   : > { %v366_v26 = vld [vmem:[#allocation4 + $0x1f0] sm:$0xff] }
 0x135   : > { %v5555_v39 = vcombine.low %v362_v25, %v366_v26 }
 0x136   : > { %3097 = vmatpush1.bf16.msra.mxu0 %v5871_v31  ;;  %3406 = vmatpush1.bf16.msra.mxu1 %v5873_v32  ;;  %v5549_v31 = vcombine.low %v355_v19, %v359_v20  ;;  %v5556_v32 = vcombine.high %v362_v25, %v366_v26  ;;  %v415_v19 = vld [vmem:[#allocation4 + $0x378] sm:$0xff]  ;;  %v5595_v20 = vcombine.low %v402_v7, %v406_v8  ;;  %v422_v25 = vld [vmem:[#allocation4 + $0x3b0] sm:$0xff] }
 0x137   : > { %3478 = vmatprep.subr.bf16.mxu0 %v5500_v33  ;;  %3787 = vmatprep.subr.bf16.mxu1 %v5502_v34  ;;  %v5558_v33 = vcombine.high %v363_v28, %v367_v29  ;;  %v6344_v34 = vld [vmem:[%s6744_s26 + $0xd4] ss:$24 sps:$4 sm:$0xff]  }
 0x138   : > { %v419_v26 = vld [vmem:[#allocation4 + $0x398] sm:$0xff] }
 0x139   : > { %3099 = vmatmul.mubr.bf16.vlgmr.msra.gmra.mrb[0].mxu0 %v6332_v37  ;;  %3408 = vmatmul.mubr.bf16.vlgmr.msra.gmra.mrb[0].mxu1 %v6332_v37  ;;  %v371_v37 = vld [vmem:[#allocation4 + $0x218] sm:$0xff] }
 0x13a   : > { %3479 = vmatpush1.bf16.msra.mxu0 %v5499_v40  ;;  %3788 = vmatpush1.bf16.msra.mxu1 %v5501_v41  ;;  %v5557_v40 = vcombine.low %v363_v28, %v367_v29  ;;  %v5564_v41 = vcombine.high %v370_v35, %v374_v36  ;;  %v5605_v29 = vcombine.low %v411_v18, %v415_v19  ;;  %v427_v35 = vld [vmem:[#allocation4 + $0x3d8] sm:$0xff] }
 0x13b   : > { %3480 = vmatprep.subr.bf16.mxu0 %v5508_v42  ;;  %3789 = vmatprep.subr.bf16.mxu1 %v5510_v43  ;;  %v5566_v42 = vcombine.high %v371_v37, %v375_v38  ;;  %v378_v43 = vld [vmem:[#allocation4 + $0x250] sm:$0xff]  ;;  %v431_v36 = vld [vmem:[#allocation4 + $0x3f8] sm:$0xff] }
 0x13c   : > { %3108 = vmatprep.mubr.bf16.mxu0 %v6335_v44  ;;  %3417 = vmatprep.mubr.bf16.mxu1 %v6335_v44  ;;  %v382_v44 = vld [vmem:[#allocation4 + $0x270] sm:$0xff] }
 0x13d   : > { %v5571_v57 = vcombine.low %v378_v43, %v382_v44 }
 0x13e   : > { %3481 = vmatpush1.bf16.msra.mxu0 %v5507_v49  ;;  %3790 = vmatpush1.bf16.msra.mxu1 %v5509_v50  ;;  %v5565_v49 = vcombine.low %v371_v37, %v375_v38  ;;  %v5572_v50 = vcombine.high %v378_v43, %v382_v44  ;;  %v435_v43 = vld [vmem:[#allocation4 + $0x418] sm:$0xff] }
 0x13f   : > { %3482 = vmatprep.subr.bf16.mxu0 %v5516_v51  ;;  %3791 = vmatprep.subr.bf16.mxu1 %v5518_v52  ;;  %v5574_v51 = vcombine.high %v379_v46, %v383_v47  ;;  %v6347_v52 = vld [vmem:[%s6744_s26 + $0x104] ss:$24 sps:$4 sm:$0xff]  }
 0x140   : > { %v439_v44 = vld [vmem:[#allocation4 + $0x438] sm:$0xff] }
 0x141   : > { %3109 = vmatmul.mubr.bf16.gmra.mrb[4].mxu0 %v6337_v55  ;;  %3418 = vmatmul.mubr.bf16.gmra.mrb[4].mxu1 %v6337_v55  ;;  %v387_v55 = vld [vmem:[#allocation4 + $0x298] sm:$0xff] }
 0x142   : > { %3483 = vmatpush1.bf16.msra.mxu0 %v5515_v58  ;;  %3792 = vmatpush1.bf16.msra.mxu1 %v5517_v59  ;;  %v5573_v58 = vcombine.low %v379_v46, %v383_v47  ;;  %v5580_v59 = vcombine.high %v386_v53, %v390_v54  ;;  %v5621_v46 = vcombine.low %v427_v35, %v431_v36 }
 0x143   : > { %3484 = vmatprep.subr.bf16.mxu0 %v5524_v60  ;;  %3793 = vmatprep.subr.bf16.mxu1 %v5526_v61  ;;  %v5582_v60 = vcombine.high %v387_v55, %v391_v56  ;;  %v394_v61 = vld [vmem:[#allocation4 + $0x2d0] sm:$0xff]  ;;  %v5629_v54 = vcombine.low %v435_v43, %v439_v44 }
 0x144   : > { %3118 = vmatprep.mubr.bf16.mxu0 %v6338_v62  ;;  %3427 = vmatprep.mubr.bf16.mxu1 %v6338_v62  ;;  %v398_v62 = vld [vmem:[#allocation4 + $0x2f0] sm:$0xff] }
 0x145   : > { %v5587_v11 = vcombine.low %v394_v61, %v398_v62 }
 0x146   : > { %3485 = vmatpush1.bf16.msra.mxu0 %v5523_v3  ;;  %3794 = vmatpush1.bf16.msra.mxu1 %v5525_v4  ;;  %v5581_v3 = vcombine.low %v387_v55, %v391_v56  ;;  %v5588_v4 = vcombine.high %v394_v61, %v398_v62  ;;  %v455_v61 = vld [vmem:[#allocation4 + $0x4b8] sm:$0xff] }
 0x147   : > { %3486 = vmatprep.subr.bf16.mxu0 %v5532_v5  ;;  %3795 = vmatprep.subr.bf16.mxu1 %v5534_v6  ;;  %v5590_v5 = vcombine.high %v395_v0, %v399_v1  ;;  %v6350_v6 = vld [vmem:[%s6744_s26 + $0x134] ss:$24 sps:$4 sm:$0xff]  }
 0x149   : > { %3119 = vmatmul.mubr.bf16.gmra.mrb[8].mxu0 %v6340_v9  ;;  %3428 = vmatmul.mubr.bf16.gmra.mrb[8].mxu1 %v6340_v9  ;;  %v403_v9 = vld [vmem:[#allocation4 + $0x318] sm:$0xff] }
 0x14a   : > { %3487 = vmatpush1.bf16.msra.mxu0 %v5531_v12  ;;  %3796 = vmatpush1.bf16.msra.mxu1 %v5533_v13  ;;  %v5589_v12 = vcombine.low %v395_v0, %v399_v1  ;;  %v5596_v13 = vcombine.high %v402_v7, %v406_v8 }
 0x14b   : > { %3488 = vmatprep.subr.bf16.mxu0 %v5540_v14  ;;  %3797 = vmatprep.subr.bf16.mxu1 %v5542_v15  ;;  %v5598_v14 = vcombine.high %v403_v9, %v407_v10  ;;  %v410_v15 = vld [vmem:[#allocation4 + $0x350] sm:$0xff] }
 0x14c   : > { %3128 = vmatprep.mubr.bf16.mxu0 %v6341_v16  ;;  %3437 = vmatprep.mubr.bf16.mxu1 %v6341_v16  ;;  %v414_v16 = vld [vmem:[#allocation4 + $0x370] sm:$0xff] }
 0x14d   : > { %v5603_v28 = vcombine.low %v410_v15, %v414_v16 }
 0x14e   : > { %3489 = vmatpush1.bf16.msra.mxu0 %v5539_v21  ;;  %3798 = vmatpush1.bf16.msra.mxu1 %v5541_v22  ;;  %v5597_v21 = vcombine.low %v403_v9, %v407_v10  ;;  %v5604_v22 = vcombine.high %v410_v15, %v414_v16  ;;  %v6356_v15 = vld [vmem:[%s6744_s26 + $0x30] ss:$24 sps:$4 sm:$0xff]  }
 0x14f   : > { %3490 = vmatprep.subr.bf16.mxu0 %v5548_v23  ;;  %3799 = vmatprep.subr.bf16.mxu1 %v5550_v24  ;;  %v5606_v23 = vcombine.high %v411_v18, %v415_v19  ;;  %v418_v24 = vld [vmem:[#allocation4 + $0x390] sm:$0xff] }
 0x150   : > { %v5611_v37 = vcombine.low %v418_v24, %v422_v25 }
 0x151   : > { %3129 = vmatmul.mubr.bf16.gmra.mrb[12].mxu0 %v6343_v27  ;;  %3438 = vmatmul.mubr.bf16.gmra.mrb[12].mxu1 %v6343_v27  ;;  %v423_v27 = vld [vmem:[#allocation4 + $0x3b8] sm:$0xff] }
 0x152   : > { %3491 = vmatpush1.bf16.msra.mxu0 %v5547_v30  ;;  %3800 = vmatpush1.bf16.msra.mxu1 %v5549_v31  ;;  %v5612_v30 = vcombine.high %v418_v24, %v422_v25  ;;  %v5614_v31 = vcombine.high %v419_v26, %v423_v27  ;;  %v5613_v38 = vcombine.low %v419_v26, %v423_v27  ;;  %v479_v24 = vld [vmem:[#allocation4 + $0x578] sm:$0xff] }
 0x153   : > { %3492 = vmatprep.subr.bf16.mxu0 %v5556_v32  ;;  %3801 = vmatprep.subr.bf16.mxu1 %v5558_v33  ;;  %v426_v32 = vld [vmem:[#allocation4 + $0x3d0] sm:$0xff] }
 0x154   : > { %3138 = vmatprep.mubr.bf16.mxu0 %v6344_v34  ;;  %3447 = vmatprep.mubr.bf16.mxu1 %v6344_v34  ;;  %v430_v33 = vld [vmem:[#allocation4 + $0x3f0] sm:$0xff] }
 0x155   : > { %v6353_v34 = vld [vmem:[%s6744_s26 + $0x4] ss:$24 sps:$4 sm:$0xff]  }
 0x156   : > { %3493 = vmatpush1.bf16.msra.mxu0 %v5555_v39  ;;  %3802 = vmatpush1.bf16.msra.mxu1 %v5557_v40  ;;  %v5620_v39 = vcombine.high %v426_v32, %v430_v33  ;;  %v5622_v40 = vcombine.high %v427_v35, %v431_v36 }
 0x157   : > { %3494 = vmatprep.subr.bf16.mxu0 %v5564_v41  ;;  %3803 = vmatprep.subr.bf16.mxu1 %v5566_v42  ;;  %v434_v41 = vld [vmem:[#allocation4 + $0x410] sm:$0xff] }
 0x158   : > { %v438_v42 = vld [vmem:[#allocation4 + $0x430] sm:$0xff] }
 0x159   : > { %3139 = vmatmul.mubr.bf16.gmra.mrb[16].mxu0 %v6346_v45  ;;  %3448 = vmatmul.mubr.bf16.gmra.mrb[16].mxu1 %v6346_v45  ;;  %v5619_v45 = vcombine.low %v426_v32, %v430_v33  ;;  %v5628_v47 = vcombine.high %v434_v41, %v438_v42  ;;  %v5627_v53 = vcombine.low %v434_v41, %v438_v42  ;;  %v487_v32 = vld [vmem:[#allocation4 + $0x5b8] sm:$0xff] }
 0x15a   : > { %3495 = vmatpush1.bf16.msra.mxu0 %v5563_v48  ;;  %3804 = vmatpush1.bf16.msra.mxu1 %v5565_v49  ;;  %v5630_v48 = vcombine.high %v435_v43, %v439_v44  ;;  %v442_v49 = vld [vmem:[#allocation4 + $0x450] sm:$0xff]  ;;  %v491_v41 = vld [vmem:[#allocation4 + $0x5d8] sm:$0xff] }
 0x15b   : > { %3496 = vmatprep.subr.bf16.mxu0 %v5572_v50  ;;  %3805 = vmatprep.subr.bf16.mxu1 %v5574_v51  ;;  %v446_v50 = vld [vmem:[#allocation4 + $0x470] sm:$0xff]  ;;  %v443_v51 = vld [vmem:[#allocation4 + $0x458] sm:$0xff] }
 0x15c   : > { %3148 = vmatprep.mubr.bf16.mxu0 %v6347_v52  ;;  %3457 = vmatprep.mubr.bf16.mxu1 %v6347_v52  ;;  %v447_v52 = vld [vmem:[#allocation4 + $0x478] sm:$0xff]  ;;  %v5636_v55 = vcombine.high %v442_v49, %v446_v50  ;;  %v5635_v62 = vcombine.low %v442_v49, %v446_v50 }
 0x15d   : > { %v5638_v56 = vcombine.high %v443_v51, %v447_v52  ;;  %v6358_v33 = vld [vmem:[%s6744_s26 + $0x60] ss:$24 sps:$4 sm:$0xff]  }
 0x15e   : > { %3497 = vmatpush1.bf16.msra.mxu0 %v5571_v57  ;;  %3806 = vmatpush1.bf16.msra.mxu1 %v5573_v58  ;;  %v450_v57 = vld [vmem:[#allocation4 + $0x490] sm:$0xff]  ;;  %v495_v42 = vld [vmem:[#allocation4 + $0x5f8] sm:$0xff] }
 0x15f   : > { %3498 = vmatprep.subr.bf16.mxu0 %v5580_v59  ;;  %3807 = vmatprep.subr.bf16.mxu1 %v5582_v60  ;;  %v454_v58 = vld [vmem:[#allocation4 + $0x4b0] sm:$0xff]  ;;  %v451_v60 = vld [vmem:[#allocation4 + $0x498] sm:$0xff] }
 0x160   : > { %v6354_v59 = vld [vmem:[%s6744_s26] ss:$24 sps:$4 sm:$0xff]   ;;  %v5644_v0 = vcombine.high %v450_v57, %v454_v58  ;;  %v5646_v1 = vcombine.high %v451_v60, %v455_v61  ;;  %v5643_v7 = vcombine.low %v450_v57, %v454_v58  ;;  %v5645_v8 = vcombine.low %v451_v60, %v455_v61  ;;  %v6361_v58 = vld [vmem:[%s6744_s26 + $0xc4] ss:$24 sps:$4 sm:$0xff]  }
 0x161   : > { %3149 = vmatmul.mubr.bf16.gmra.mrb[20].mxu0 %v6349_v63  ;;  %3458 = vmatmul.mubr.bf16.gmra.mrb[20].mxu1 %v6349_v63  ;;  %v5637_v63 = vcombine.low %v443_v51, %v447_v52  ;;  %v499_v49 = vld [vmem:[#allocation4 + $0x618] sm:$0xff]  ;;  %v510_v57 = vld [vmem:[#allocation4 + $0x670] sm:$0xff] }
 0x162   : > { %3499 = vmatpush1.bf16.msra.mxu0 %v5579_v2  ;;  %3808 = vmatpush1.bf16.msra.mxu1 %v5581_v3  ;;  %v458_v2 = vld [vmem:[#allocation4 + $0x4d0] sm:$0xff]  ;;  %v503_v50 = vld [vmem:[#allocation4 + $0x638] sm:$0xff] }
 0x163   : > { %3500 = vmatprep.subr.bf16.mxu0 %v5588_v4  ;;  %3809 = vmatprep.subr.bf16.mxu1 %v5590_v5  ;;  %v462_v3 = vld [vmem:[#allocation4 + $0x4f0] sm:$0xff]  ;;  %v459_v5 = vld [vmem:[#allocation4 + $0x4d8] sm:$0xff] }
 0x164   : > { %3158 = vmatprep.mubr.bf16.mxu0 %v6350_v6  ;;  %3467 = vmatprep.mubr.bf16.mxu1 %v6350_v6  ;;  %v6355_v4 = vld [vmem:[%s6744_s26 + $0x34] ss:$24 sps:$4 sm:$0xff]   ;;  %v5652_v9 = vcombine.high %v458_v2, %v462_v3  ;;  %v5651_v16 = vcombine.low %v458_v2, %v462_v3  ;;  %v6360_v51 = vld [vmem:[%s6744_s26 + $0x90] ss:$24 sps:$4 sm:$0xff]  }
 0x165   : > { %v463_v6 = vld [vmem:[#allocation4 + $0x4f8] sm:$0xff]  ;;  %v518_v2 = vld [vmem:[#allocation4 + $0x6b0] sm:$0xff] }
 0x166   : > { %3501 = vmatpush1.bf16.msra.mxu0 %v5587_v11  ;;  %3810 = vmatpush1.bf16.msra.mxu1 %v5589_v12  ;;  %v5654_v10 = vcombine.high %v459_v5, %v463_v6  ;;  %v466_v11 = vld [vmem:[#allocation4 + $0x510] sm:$0xff]  ;;  %v511_v60 = vld [vmem:[#allocation4 + $0x678] sm:$0xff] }
 0x167   : > { %3502 = vmatprep.subr.bf16.mxu0 %v5596_v13  ;;  %3811 = vmatprep.subr.bf16.mxu1 %v5598_v14  ;;  %v470_v12 = vld [vmem:[#allocation4 + $0x530] sm:$0xff]  ;;  %v467_v13 = vld [vmem:[#allocation4 + $0x518] sm:$0xff] }
 0x168   : > { %v471_v14 = vld [vmem:[#allocation4 + $0x538] sm:$0xff]  ;;  %v5660_v18 = vcombine.high %v466_v11, %v470_v12  ;;  %v5659_v25 = vcombine.low %v466_v11, %v470_v12  ;;  %v526_v11 = vld [vmem:[#allocation4 + $0x6f0] sm:$0xff] }
 0x169   : > { %3159 = vmatmul.mubr.bf16.gmra.mrb[24].mxu0 %v6352_v17  ;;  %3468 = vmatmul.mubr.bf16.gmra.mrb[24].mxu1 %v6352_v17  ;;  %v5653_v17 = vcombine.low %v459_v5, %v463_v6  ;;  %v5662_v19 = vcombine.high %v467_v13, %v471_v14  ;;  %v5661_v26 = vcombine.low %v467_v13, %v471_v14  ;;  %v515_v3 = vld [vmem:[#allocation4 + $0x698] sm:$0xff] }
 0x16a   : > { %3503 = vmatpush1.bf16.msra.mxu0 %v5595_v20  ;;  %3812 = vmatpush1.bf16.msra.mxu1 %v5597_v21  ;;  %v474_v20 = vld [vmem:[#allocation4 + $0x550] sm:$0xff]  ;;  %v523_v13 = vld [vmem:[#allocation4 + $0x6d8] sm:$0xff] }
 0x16b   : > { %3504 = vmatprep.subr.bf16.mxu0 %v5604_v22  ;;  %3813 = vmatprep.subr.bf16.mxu1 %v5606_v23  ;;  %v478_v21 = vld [vmem:[#allocation4 + $0x570] sm:$0xff]  ;;  %v475_v23 = vld [vmem:[#allocation4 + $0x558] sm:$0xff] }
 0x16c   : > { %3510 = vmatprep.mubr.bf16.mxu0 %v6353_v34  ;;  %3819 = vmatprep.mubr.bf16.mxu1 %v6353_v34  ;;  %v6357_v22 = vld [vmem:[%s6744_s26 + $0x64] ss:$24 sps:$4 sm:$0xff]   ;;  %v5668_v27 = vcombine.high %v474_v20, %v478_v21  ;;  %v5667_v34 = vcombine.low %v474_v20, %v478_v21  ;;  %v5669_v35 = vcombine.low %v475_v23, %v479_v24  ;;  %v6362_v5 = vld [vmem:[%s6744_s26 + $0xc0] ss:$24 sps:$4 sm:$0xff]   ;;  %v6363_v12 = vld [vmem:[%s6744_s26 + $0xf4] ss:$24 sps:$4 sm:$0xff]  }
 0x16d   : > { %v527_v14 = vld [vmem:[#allocation4 + $0x6f8] sm:$0xff]  ;;  %v534_v20 = vld [vmem:[#allocation4 + $0x730] sm:$0xff] }
 0x16e   : > { %3505 = vmatpush1.bf16.msra.mxu0 %v5603_v28  ;;  %3814 = vmatpush1.bf16.msra.mxu1 %v5605_v29  ;;  %v5670_v28 = vcombine.high %v475_v23, %v479_v24  ;;  %v482_v29 = vld [vmem:[#allocation4 + $0x590] sm:$0xff]  ;;  %v531_v21 = vld [vmem:[#allocation4 + $0x718] sm:$0xff] }
 0x16f   : > { %3506 = vmatprep.subr.bf16.mxu0 %v5612_v30  ;;  %3815 = vmatprep.subr.bf16.mxu1 %v5614_v31  ;;  %v486_v30 = vld [vmem:[#allocation4 + $0x5b0] sm:$0xff]  ;;  %v483_v31 = vld [vmem:[#allocation4 + $0x598] sm:$0xff] }
 0x170   : > { %v5676_v36 = vcombine.high %v482_v29, %v486_v30  ;;  %v5675_v43 = vcombine.low %v482_v29, %v486_v30  ;;  %v5677_v44 = vcombine.low %v483_v31, %v487_v32  ;;  %v6364_v23 = vld [vmem:[%s6744_s26 + $0xf0] ss:$24 sps:$4 sm:$0xff]   ;;  %v6365_v30 = vld [vmem:[%s6744_s26 + $0x124] ss:$24 sps:$4 sm:$0xff]  }
 0x171   : > { %v542_v29 = vld [vmem:[#allocation4 + $0x770] sm:$0xff] }
 0x172   : > { %3507 = vmatpush1.bf16.msra.mxu0 %v5611_v37  ;;  %3816 = vmatpush1.bf16.msra.mxu1 %v5613_v38  ;;  %v5678_v37 = vcombine.high %v483_v31, %v487_v32  ;;  %v490_v38 = vld [vmem:[#allocation4 + $0x5d0] sm:$0xff]  ;;  %v539_v31 = vld [vmem:[#allocation4 + $0x758] sm:$0xff] }
 0x173   : > { %3508 = vmatprep.subr.bf16.mxu0 %v5620_v39  ;;  %3817 = vmatprep.subr.bf16.mxu1 %v5622_v40  ;;  %v494_v39 = vld [vmem:[#allocation4 + $0x5f0] sm:$0xff]  ;;  %v543_v32 = vld [vmem:[#allocation4 + $0x778] sm:$0xff] }
 0x174   : > { %v6359_v40 = vld [vmem:[%s6744_s26 + $0x94] ss:$24 sps:$4 sm:$0xff]   ;;  %v5683_v52 = vcombine.low %v490_v38, %v494_v39 }
 0x176   : > { %3509 = vmatpush1.bf16.msra.mxu0 %v5619_v45  ;;  %3818 = vmatpush1.bf16.msra.mxu1 %v5621_v46  ;;  %v5684_v45 = vcombine.high %v490_v38, %v494_v39  ;;  %v5686_v46 = vcombine.high %v491_v41, %v495_v42  ;;  %v550_v38 = vld [vmem:[#allocation4 + $0x7b0] sm:$0xff]  ;;  %v547_v39 = vld [vmem:[#allocation4 + $0x798] sm:$0xff] }
 0x177   : > { %3581 = vmatprep.subr.bf16.mxu0 %v5628_v47  ;;  %3890 = vmatprep.subr.bf16.mxu1 %v5630_v48  ;;  %v498_v47 = vld [vmem:[#allocation4 + $0x610] sm:$0xff] }
 0x178   : > { %v502_v48 = vld [vmem:[#allocation4 + $0x630] sm:$0xff] }
 0x179   : > { %3511 = vmatmul.mubr.bf16.vlgmr.msra.gmra.mrb[28].mxu0 %v6354_v59  ;;  %3820 = vmatmul.mubr.bf16.vlgmr.msra.gmra.mrb[28].mxu1 %v6354_v59  ;;  %v507_v59 = vld [vmem:[#allocation4 + $0x658] sm:$0xff]  ;;  %v5691_v61 = vcombine.low %v498_v47, %v502_v48 }
 0x17a   : > { %3582 = vmatpush1.bf16.msra.mxu0 %v5627_v53  ;;  %3891 = vmatpush1.bf16.msra.mxu1 %v5629_v54  ;;  %v5685_v53 = vcombine.low %v491_v41, %v495_v42  ;;  %v5692_v54 = vcombine.high %v498_v47, %v502_v48  ;;  %v6366_v41 = vld [vmem:[%s6744_s26 + $0x120] ss:$24 sps:$4 sm:$0xff]   ;;  %v6367_v48 = vld [vmem:[%s6744_s26 + $0xc] ss:$24 sps:$4 sm:$0xff]  }
 0x17b   : > { %3583 = vmatprep.subr.bf16.mxu0 %v5636_v55  ;;  %3892 = vmatprep.subr.bf16.mxu1 %v5638_v56  ;;  %v5694_v55 = vcombine.high %v499_v49, %v503_v50  ;;  %v506_v56 = vld [vmem:[#allocation4 + $0x650] sm:$0xff] }
 0x17c   : > { %3520 = vmatprep.mubr.bf16.mxu0 %v6355_v4  ;;  %3829 = vmatprep.mubr.bf16.mxu1 %v6355_v4  ;;  %v519_v4 = vld [vmem:[#allocation4 + $0x6b8] sm:$0xff]  ;;  %v5699_v6 = vcombine.low %v506_v56, %v510_v57  ;;  %v558_v47 = vld [vmem:[#allocation4 + $0x7f0] sm:$0xff] }
 0x17e   : > { %3584 = vmatpush1.bf16.msra.mxu0 %v5635_v62  ;;  %3893 = vmatpush1.bf16.msra.mxu1 %v5637_v63  ;;  %v5693_v62 = vcombine.low %v499_v49, %v503_v50  ;;  %v5700_v63 = vcombine.high %v506_v56, %v510_v57  ;;  %v555_v49 = vld [vmem:[#allocation4 + $0x7d8] sm:$0xff]  ;;  %v566_v56 = vld [vmem:[#allocation4 + $0x830] sm:$0xff] }
 0x17f   : > { %3585 = vmatprep.subr.bf16.mxu0 %v5644_v0  ;;  %3894 = vmatprep.subr.bf16.mxu1 %v5646_v1  ;;  %v5702_v0 = vcombine.high %v507_v59, %v511_v60  ;;  %v514_v1 = vld [vmem:[#allocation4 + $0x690] sm:$0xff]  ;;  %v559_v50 = vld [vmem:[#allocation4 + $0x7f8] sm:$0xff] }
 0x180   : > { %v563_v57 = vld [vmem:[#allocation4 + $0x818] sm:$0xff] }
 0x181   : > { %3521 = vmatmul.mubr.bf16.gmra.mrb[32].mxu0 %v6356_v15  ;;  %3830 = vmatmul.mubr.bf16.gmra.mrb[32].mxu1 %v6356_v15  ;;  %v5707_v15 = vcombine.low %v514_v1, %v518_v2 }
 0x182   : > { %3586 = vmatpush1.bf16.msra.mxu0 %v5643_v7  ;;  %3895 = vmatpush1.bf16.msra.mxu1 %v5645_v8  ;;  %v5701_v7 = vcombine.low %v507_v59, %v511_v60  ;;  %v5708_v8 = vcombine.high %v514_v1, %v518_v2  ;;  %v5749_v60 = vcombine.low %v555_v49, %v559_v50  ;;  %v571_v1 = vld [vmem:[#allocation4 + $0x858] sm:$0xff] }
 0x183   : > { %3587 = vmatprep.subr.bf16.mxu0 %v5652_v9  ;;  %3896 = vmatprep.subr.bf16.mxu1 %v5654_v10  ;;  %v5710_v9 = vcombine.high %v515_v3, %v519_v4  ;;  %v522_v10 = vld [vmem:[#allocation4 + $0x6d0] sm:$0xff]  ;;  %v575_v2 = vld [vmem:[#allocation4 + $0x878] sm:$0xff] }
 0x184   : > { %3530 = vmatprep.mubr.bf16.mxu0 %v6357_v22  ;;  %3839 = vmatprep.mubr.bf16.mxu1 %v6357_v22  ;;  %v535_v22 = vld [vmem:[#allocation4 + $0x738] sm:$0xff]  ;;  %v5715_v24 = vcombine.low %v522_v10, %v526_v11 }
 0x186   : > { %3588 = vmatpush1.bf16.msra.mxu0 %v5651_v16  ;;  %3897 = vmatpush1.bf16.msra.mxu1 %v5653_v17  ;;  %v5709_v16 = vcombine.low %v515_v3, %v519_v4  ;;  %v5716_v17 = vcombine.high %v522_v10, %v526_v11  ;;  %v579_v10 = vld [vmem:[#allocation4 + $0x898] sm:$0xff] }
 0x187   : > { %3589 = vmatprep.subr.bf16.mxu0 %v5660_v18  ;;  %3898 = vmatprep.subr.bf16.mxu1 %v5662_v19  ;;  %v5718_v18 = vcombine.high %v523_v13, %v527_v14  ;;  %v530_v19 = vld [vmem:[#allocation4 + $0x710] sm:$0xff]  ;;  %v583_v11 = vld [vmem:[#allocation4 + $0x8b8] sm:$0xff] }
 0x189   : > { %3531 = vmatmul.mubr.bf16.gmra.mrb[36].mxu0 %v6358_v33  ;;  %3840 = vmatmul.mubr.bf16.gmra.mrb[36].mxu1 %v6358_v33  ;;  %v5723_v33 = vcombine.low %v530_v19, %v534_v20 }
 0x18a   : > { %3590 = vmatpush1.bf16.msra.mxu0 %v5659_v25  ;;  %3899 = vmatpush1.bf16.msra.mxu1 %v5661_v26  ;;  %v5717_v25 = vcombine.low %v523_v13, %v527_v14  ;;  %v5724_v26 = vcombine.high %v530_v19, %v534_v20  ;;  %v5765_v13 = vcombine.low %v571_v1, %v575_v2  ;;  %v587_v19 = vld [vmem:[#allocation4 + $0x8d8] sm:$0xff] }
 0x18b   : > { %3591 = vmatprep.subr.bf16.mxu0 %v5668_v27  ;;  %3900 = vmatprep.subr.bf16.mxu1 %v5670_v28  ;;  %v5726_v27 = vcombine.high %v531_v21, %v535_v22  ;;  %v538_v28 = vld [vmem:[#allocation4 + $0x750] sm:$0xff]  ;;  %v591_v20 = vld [vmem:[#allocation4 + $0x8f8] sm:$0xff] }
 0x18c   : > { %3540 = vmatprep.mubr.bf16.mxu0 %v6359_v40  ;;  %3849 = vmatprep.mubr.bf16.mxu1 %v6359_v40  ;;  %v551_v40 = vld [vmem:[#allocation4 + $0x7b8] sm:$0xff]  ;;  %v5731_v42 = vcombine.low %v538_v28, %v542_v29 }
 0x18e   : > { %3592 = vmatpush1.bf16.msra.mxu0 %v5667_v34  ;;  %3901 = vmatpush1.bf16.msra.mxu1 %v5669_v35  ;;  %v5725_v34 = vcombine.low %v531_v21, %v535_v22  ;;  %v5732_v35 = vcombine.high %v538_v28, %v542_v29  ;;  %v5773_v22 = vcombine.low %v579_v10, %v583_v11  ;;  %v595_v28 = vld [vmem:[#allocation4 + $0x918] sm:$0xff] }
 0x18f   : > { %3593 = vmatprep.subr.bf16.mxu0 %v5676_v36  ;;  %3902 = vmatprep.subr.bf16.mxu1 %v5678_v37  ;;  %v5734_v36 = vcombine.high %v539_v31, %v543_v32  ;;  %v546_v37 = vld [vmem:[#allocation4 + $0x790] sm:$0xff]  ;;  %v599_v29 = vld [vmem:[#allocation4 + $0x938] sm:$0xff] }
 0x191   : > { %3541 = vmatmul.mubr.bf16.gmra.mrb[40].mxu0 %v6360_v51  ;;  %3850 = vmatmul.mubr.bf16.gmra.mrb[40].mxu1 %v6360_v51  ;;  %v5739_v51 = vcombine.low %v546_v37, %v550_v38 }
 0x192   : > { %3594 = vmatpush1.bf16.msra.mxu0 %v5675_v43  ;;  %3903 = vmatpush1.bf16.msra.mxu1 %v5677_v44  ;;  %v5733_v43 = vcombine.low %v539_v31, %v543_v32  ;;  %v5740_v44 = vcombine.high %v546_v37, %v550_v38  ;;  %v5781_v31 = vcombine.low %v587_v19, %v591_v20  ;;  %v603_v37 = vld [vmem:[#allocation4 + $0x958] sm:$0xff] }
 0x193   : > { %3595 = vmatprep.subr.bf16.mxu0 %v5684_v45  ;;  %3904 = vmatprep.subr.bf16.mxu1 %v5686_v46  ;;  %v5742_v45 = vcombine.high %v547_v39, %v551_v40  ;;  %v554_v46 = vld [vmem:[#allocation4 + $0x7d0] sm:$0xff]  ;;  %v607_v38 = vld [vmem:[#allocation4 + $0x978] sm:$0xff] }
 0x194   : > { %3550 = vmatprep.mubr.bf16.mxu0 %v6361_v58  ;;  %3859 = vmatprep.mubr.bf16.mxu1 %v6361_v58  ;;  %v567_v58 = vld [vmem:[#allocation4 + $0x838] sm:$0xff]  ;;  %v5747_v59 = vcombine.low %v554_v46, %v558_v47 }
 0x195   : > { %v5757_v4 = vcombine.low %v563_v57, %v567_v58 }
 0x196   : > { %3596 = vmatpush1.bf16.msra.mxu0 %v5683_v52  ;;  %3905 = vmatpush1.bf16.msra.mxu1 %v5685_v53  ;;  %v5741_v52 = vcombine.low %v547_v39, %v551_v40  ;;  %v5748_v53 = vcombine.high %v554_v46, %v558_v47  ;;  %v5789_v40 = vcombine.low %v595_v28, %v599_v29  ;;  %v611_v46 = vld [vmem:[#allocation4 + $0x998] sm:$0xff] }
 0x197   : > { %3597 = vmatprep.subr.bf16.mxu0 %v5692_v54  ;;  %3906 = vmatprep.subr.bf16.mxu1 %v5694_v55  ;;  %v5750_v54 = vcombine.high %v555_v49, %v559_v50  ;;  %v562_v55 = vld [vmem:[#allocation4 + $0x810] sm:$0xff]  ;;  %v615_v47 = vld [vmem:[#allocation4 + $0x9b8] sm:$0xff]  ;;  %v5797_v49 = vcombine.low %v603_v37, %v607_v38 }
 0x198   : > { %v5755_v3 = vcombine.low %v562_v55, %v566_v56 }
 0x199   : > { %3551 = vmatmul.mubr.bf16.gmra.mrb[44].mxu0 %v6362_v5  ;;  %3860 = vmatmul.mubr.bf16.gmra.mrb[44].mxu1 %v6362_v5 }
 0x19a   : > { %3598 = vmatpush1.bf16.msra.mxu0 %v5691_v61  ;;  %3907 = vmatpush1.bf16.msra.mxu1 %v5693_v62  ;;  %v5756_v61 = vcombine.high %v562_v55, %v566_v56  ;;  %v5758_v62 = vcombine.high %v563_v57, %v567_v58  ;;  %v619_v55 = vld [vmem:[#allocation4 + $0x9d8] sm:$0xff]  ;;  %v5805_v58 = vcombine.low %v611_v46, %v615_v47 }
 0x19b   : > { %3599 = vmatprep.subr.bf16.mxu0 %v5700_v63  ;;  %3908 = vmatprep.subr.bf16.mxu1 %v5702_v0  ;;  %v570_v63 = vld [vmem:[#allocation4 + $0x850] sm:$0xff]  ;;  %v623_v56 = vld [vmem:[#allocation4 + $0x9f8] sm:$0xff] }
 0x19c   : > { %3560 = vmatprep.mubr.bf16.mxu0 %v6363_v12  ;;  %3869 = vmatprep.mubr.bf16.mxu1 %v6363_v12  ;;  %v574_v0 = vld [vmem:[#allocation4 + $0x870] sm:$0xff] }
 0x19d   : > { %v5764_v5 = vcombine.high %v570_v63, %v574_v0  ;;  %v5763_v12 = vcombine.low %v570_v63, %v574_v0  ;;  %v6374_v63 = vld [vmem:[%s6744_s26 + $0x98] ss:$24 sps:$4 sm:$0xff]  }
 0x19e   : > { %3600 = vmatpush1.bf16.msra.mxu0 %v5699_v6  ;;  %3909 = vmatpush1.bf16.msra.mxu1 %v5701_v7  ;;  %v5766_v6 = vcombine.high %v571_v1, %v575_v2  ;;  %v578_v7 = vld [vmem:[#allocation4 + $0x890] sm:$0xff]  ;;  %v627_v0 = vld [vmem:[#allocation4 + $0xa18] sm:$0xff] }
 0x19f   : > { %3601 = vmatprep.subr.bf16.mxu0 %v5708_v8  ;;  %3910 = vmatprep.subr.bf16.mxu1 %v5710_v9  ;;  %v582_v8 = vld [vmem:[#allocation4 + $0x8b0] sm:$0xff]  ;;  %v631_v1 = vld [vmem:[#allocation4 + $0xa38] sm:$0xff] }
 0x1a0   : > { %v6368_v9 = vld [vmem:[%s6744_s26 + $0x8] ss:$24 sps:$4 sm:$0xff]   ;;  %v5772_v14 = vcombine.high %v578_v7, %v582_v8  ;;  %v5771_v21 = vcombine.low %v578_v7, %v582_v8  ;;  %v6375_v8 = vld [vmem:[%s6744_s26 + $0xcc] ss:$24 sps:$4 sm:$0xff]  }
 0x1a1   : > { %3561 = vmatmul.mubr.bf16.gmra.mrb[48].mxu0 %v6364_v23  ;;  %3870 = vmatmul.mubr.bf16.gmra.mrb[48].mxu1 %v6364_v23  ;;  %v638_v7 = vld [vmem:[#allocation4 + $0xa70] sm:$0xff] }
 0x1a2   : > { %3602 = vmatpush1.bf16.msra.mxu0 %v5707_v15  ;;  %3911 = vmatpush1.bf16.msra.mxu1 %v5709_v16  ;;  %v5774_v15 = vcombine.high %v579_v10, %v583_v11  ;;  %v586_v16 = vld [vmem:[#allocation4 + $0x8d0] sm:$0xff]  ;;  %v639_v10 = vld [vmem:[#allocation4 + $0xa78] sm:$0xff] }
 0x1a3   : > { %3603 = vmatprep.subr.bf16.mxu0 %v5716_v17  ;;  %3912 = vmatprep.subr.bf16.mxu1 %v5718_v18  ;;  %v590_v17 = vld [vmem:[#allocation4 + $0x8f0] sm:$0xff] }
 0x1a4   : > { %3570 = vmatprep.mubr.bf16.mxu0 %v6365_v30  ;;  %3879 = vmatprep.mubr.bf16.mxu1 %v6365_v30  ;;  %v6369_v18 = vld [vmem:[%s6744_s26 + $0x3c] ss:$24 sps:$4 sm:$0xff]   ;;  %v5780_v23 = vcombine.high %v586_v16, %v590_v17  ;;  %v5779_v30 = vcombine.low %v586_v16, %v590_v17  ;;  %v6376_v17 = vld [vmem:[%s6744_s26 + $0xc8] ss:$24 sps:$4 sm:$0xff]  }
 0x1a5   : > { %v646_v16 = vld [vmem:[#allocation4 + $0xab0] sm:$0xff] }
 0x1a6   : > { %3604 = vmatpush1.bf16.msra.mxu0 %v5715_v24  ;;  %3913 = vmatpush1.bf16.msra.mxu1 %v5717_v25  ;;  %v5782_v24 = vcombine.high %v587_v19, %v591_v20  ;;  %v594_v25 = vld [vmem:[#allocation4 + $0x910] sm:$0xff]  ;;  %v647_v19 = vld [vmem:[#allocation4 + $0xab8] sm:$0xff] }
 0x1a7   : > { %3605 = vmatprep.subr.bf16.mxu0 %v5724_v26  ;;  %3914 = vmatprep.subr.bf16.mxu1 %v5726_v27  ;;  %v598_v26 = vld [vmem:[#allocation4 + $0x930] sm:$0xff] }
 0x1a8   : > { %v6370_v27 = vld [vmem:[%s6744_s26 + $0x38] ss:$24 sps:$4 sm:$0xff]   ;;  %v5788_v32 = vcombine.high %v594_v25, %v598_v26  ;;  %v5787_v39 = vcombine.low %v594_v25, %v598_v26  ;;  %v6377_v26 = vld [vmem:[%s6744_s26 + $0xfc] ss:$24 sps:$4 sm:$0xff]  }
 0x1a9   : > { %3571 = vmatmul.mubr.bf16.gmra.mrb[52].mxu0 %v6366_v41  ;;  %3880 = vmatmul.mubr.bf16.gmra.mrb[52].mxu1 %v6366_v41  ;;  %v654_v25 = vld [vmem:[#allocation4 + $0xaf0] sm:$0xff] }
 0x1aa   : > { %3606 = vmatpush1.bf16.msra.mxu0 %v5723_v33  ;;  %3915 = vmatpush1.bf16.msra.mxu1 %v5725_v34  ;;  %v5790_v33 = vcombine.high %v595_v28, %v599_v29  ;;  %v602_v34 = vld [vmem:[#allocation4 + $0x950] sm:$0xff]  ;;  %v655_v28 = vld [vmem:[#allocation4 + $0xaf8] sm:$0xff] }
 0x1ab   : > { %3607 = vmatprep.subr.bf16.mxu0 %v5732_v35  ;;  %3916 = vmatprep.subr.bf16.mxu1 %v5734_v36  ;;  %v606_v35 = vld [vmem:[#allocation4 + $0x970] sm:$0xff] }
 0x1ac   : > { %3613 = vmatprep.mubr.bf16.mxu0 %v6367_v48  ;;  %3922 = vmatprep.mubr.bf16.mxu1 %v6367_v48  ;;  %v6371_v36 = vld [vmem:[%s6744_s26 + $0x6c] ss:$24 sps:$4 sm:$0xff]   ;;  %v5796_v41 = vcombine.high %v602_v34, %v606_v35  ;;  %v5795_v48 = vcombine.low %v602_v34, %v606_v35  ;;  %v6378_v35 = vld [vmem:[%s6744_s26 + $0xf8] ss:$24 sps:$4 sm:$0xff]  }
 0x1ad   : > { %v662_v34 = vld [vmem:[#allocation4 + $0xb30] sm:$0xff] }
 0x1ae   : > { %3608 = vmatpush1.bf16.msra.mxu0 %v5731_v42  ;;  %3917 = vmatpush1.bf16.msra.mxu1 %v5733_v43  ;;  %v5798_v42 = vcombine.high %v603_v37, %v607_v38  ;;  %v610_v43 = vld [vmem:[#allocation4 + $0x990] sm:$0xff]  ;;  %v663_v37 = vld [vmem:[#allocation4 + $0xb38] sm:$0xff] }
 0x1af   : > { %3609 = vmatprep.subr.bf16.mxu0 %v5740_v44  ;;  %3918 = vmatprep.subr.bf16.mxu1 %v5742_v45  ;;  %v614_v44 = vld [vmem:[#allocation4 + $0x9b0] sm:$0xff] }
 0x1b0   : > { %v6372_v45 = vld [vmem:[%s6744_s26 + $0x68] ss:$24 sps:$4 sm:$0xff]   ;;  %v5804_v50 = vcombine.high %v610_v43, %v614_v44  ;;  %v5803_v57 = vcombine.low %v610_v43, %v614_v44  ;;  %v6379_v44 = vld [vmem:[%s6744_s26 + $0x12c] ss:$24 sps:$4 sm:$0xff]  }
 0x1b1   : > { %v670_v43 = vld [vmem:[#allocation4 + $0xb70] sm:$0xff] }
 0x1b2   : > { %3610 = vmatpush1.bf16.msra.mxu0 %v5739_v51  ;;  %3919 = vmatpush1.bf16.msra.mxu1 %v5741_v52  ;;  %v5806_v51 = vcombine.high %v611_v46, %v615_v47  ;;  %v618_v52 = vld [vmem:[#allocation4 + $0x9d0] sm:$0xff]  ;;  %v671_v46 = vld [vmem:[#allocation4 + $0xb78] sm:$0xff] }
 0x1b3   : > { %3611 = vmatprep.subr.bf16.mxu0 %v5748_v53  ;;  %3920 = vmatprep.subr.bf16.mxu1 %v5750_v54  ;;  %v622_v53 = vld [vmem:[#allocation4 + $0x9f0] sm:$0xff] }
 0x1b4   : > { %v6373_v54 = vld [vmem:[%s6744_s26 + $0x9c] ss:$24 sps:$4 sm:$0xff]   ;;  %v5811_v2 = vcombine.low %v618_v52, %v622_v53 }
 0x1b6   : > { %3612 = vmatpush1.bf16.msra.mxu0 %v5747_v59  ;;  %3921 = vmatpush1.bf16.msra.mxu1 %v5749_v60  ;;  %v5812_v59 = vcombine.high %v618_v52, %v622_v53  ;;  %v5814_v60 = vcombine.high %v619_v55, %v623_v56  ;;  %v678_v52 = vld [vmem:[#allocation4 + $0xbb0] sm:$0xff] }
 0x1b7   : > { %3684 = vmatprep.subr.bf16.mxu0 %v5756_v61  ;;  %3993 = vmatprep.subr.bf16.mxu1 %v5758_v62  ;;  %v626_v61 = vld [vmem:[#allocation4 + $0xa10] sm:$0xff] }
 0x1b8   : > { %v630_v62 = vld [vmem:[#allocation4 + $0xa30] sm:$0xff] }
 0x1b9   : > { %3614 = vmatmul.mubr.bf16.vlgmr.msra.gmra.mrb[28].mxu0 %v6368_v9  ;;  %3923 = vmatmul.mubr.bf16.vlgmr.msra.gmra.mrb[28].mxu1 %v6368_v9  ;;  %v635_v9 = vld [vmem:[#allocation4 + $0xa58] sm:$0xff]  ;;  %v5819_v11 = vcombine.low %v626_v61, %v630_v62 }
 0x1ba   : > { %3685 = vmatpush1.bf16.msra.mxu0 %v5755_v3  ;;  %3994 = vmatpush1.bf16.msra.mxu1 %v5757_v4  ;;  %v5813_v3 = vcombine.low %v619_v55, %v623_v56  ;;  %v5820_v4 = vcombine.high %v626_v61, %v630_v62  ;;  %v6380_v53 = vld [vmem:[%s6744_s26 + $0x128] ss:$24 sps:$4 sm:$0xff]   ;;  %v6381_v62 = vld [vmem:[%s6744_s26 + $0x14] ss:$24 sps:$4 sm:$0xff]  }
 0x1bb   : > { %3686 = vmatprep.subr.bf16.mxu0 %v5764_v5  ;;  %3995 = vmatprep.subr.bf16.mxu1 %v5766_v6  ;;  %v5822_v5 = vcombine.high %v627_v0, %v631_v1  ;;  %v634_v6 = vld [vmem:[#allocation4 + $0xa50] sm:$0xff]  ;;  %v679_v55 = vld [vmem:[#allocation4 + $0xbb8] sm:$0xff] }
 0x1bc   : > { %3623 = vmatprep.mubr.bf16.mxu0 %v6369_v18  ;;  %3932 = vmatprep.mubr.bf16.mxu1 %v6369_v18  ;;  %v643_v18 = vld [vmem:[#allocation4 + $0xa98] sm:$0xff]  ;;  %v5827_v20 = vcombine.low %v634_v6, %v638_v7  ;;  %v686_v61 = vld [vmem:[#allocation4 + $0xbf0] sm:$0xff] }
 0x1be   : > { %3687 = vmatpush1.bf16.msra.mxu0 %v5763_v12  ;;  %3996 = vmatpush1.bf16.msra.mxu1 %v5765_v13  ;;  %v5821_v12 = vcombine.low %v627_v0, %v631_v1  ;;  %v5828_v13 = vcombine.high %v634_v6, %v638_v7  ;;  %v687_v0 = vld [vmem:[#allocation4 + $0xbf8] sm:$0xff] }
 0x1bf   : > { %3688 = vmatprep.subr.bf16.mxu0 %v5772_v14  ;;  %3997 = vmatprep.subr.bf16.mxu1 %v5774_v15  ;;  %v5830_v14 = vcombine.high %v635_v9, %v639_v10  ;;  %v642_v15 = vld [vmem:[#allocation4 + $0xa90] sm:$0xff] }
 0x1c0   : > { %v5835_v29 = vcombine.low %v642_v15, %v646_v16  ;;  %v6382_v7 = vld [vmem:[%s6744_s26 + $0x10] ss:$24 sps:$4 sm:$0xff]  }
 0x1c1   : > { %3624 = vmatmul.mubr.bf16.gmra.mrb[32].mxu0 %v6370_v27  ;;  %3933 = vmatmul.mubr.bf16.gmra.mrb[32].mxu1 %v6370_v27  ;;  %v651_v27 = vld [vmem:[#allocation4 + $0xad8] sm:$0xff] }
 0x1c2   : > { %3689 = vmatpush1.bf16.msra.mxu0 %v5771_v21  ;;  %3998 = vmatpush1.bf16.msra.mxu1 %v5773_v22  ;;  %v5829_v21 = vcombine.low %v635_v9, %v639_v10  ;;  %v5836_v22 = vcombine.high %v642_v15, %v646_v16  ;;  %v6384_v9 = vld [vmem:[%s6744_s26 + $0x40] ss:$24 sps:$4 sm:$0xff]   ;;  %v6385_v10 = vld [vmem:[%s6744_s26 + $0x74] ss:$24 sps:$4 sm:$0xff]  }
 0x1c3   : > { %3690 = vmatprep.subr.bf16.mxu0 %v5780_v23  ;;  %3999 = vmatprep.subr.bf16.mxu1 %v5782_v24  ;;  %v5838_v23 = vcombine.high %v643_v18, %v647_v19  ;;  %v650_v24 = vld [vmem:[#allocation4 + $0xad0] sm:$0xff] }
 0x1c4   : > { %3633 = vmatprep.mubr.bf16.mxu0 %v6371_v36  ;;  %3942 = vmatprep.mubr.bf16.mxu1 %v6371_v36  ;;  %v659_v36 = vld [vmem:[#allocation4 + $0xb18] sm:$0xff]  ;;  %v5843_v38 = vcombine.low %v650_v24, %v654_v25 }
 0x1c6   : > { %3691 = vmatpush1.bf16.msra.mxu0 %v5779_v30  ;;  %4000 = vmatpush1.bf16.msra.mxu1 %v5781_v31  ;;  %v5837_v30 = vcombine.low %v643_v18, %v647_v19  ;;  %v5844_v31 = vcombine.high %v650_v24, %v654_v25 }
 0x1c7   : > { %3692 = vmatprep.subr.bf16.mxu0 %v5788_v32  ;;  %4001 = vmatprep.subr.bf16.mxu1 %v5790_v33  ;;  %v5846_v32 = vcombine.high %v651_v27, %v655_v28  ;;  %v658_v33 = vld [vmem:[#allocation4 + $0xb10] sm:$0xff] }
 0x1c8   : > { %v5851_v47 = vcombine.low %v658_v33, %v662_v34 }
 0x1c9   : > { %3634 = vmatmul.mubr.bf16.gmra.mrb[36].mxu0 %v6372_v45  ;;  %3943 = vmatmul.mubr.bf16.gmra.mrb[36].mxu1 %v6372_v45  ;;  %v667_v45 = vld [vmem:[#allocation4 + $0xb58] sm:$0xff] }
 0x1ca   : > { %3693 = vmatpush1.bf16.msra.mxu0 %v5787_v39  ;;  %4002 = vmatpush1.bf16.msra.mxu1 %v5789_v40  ;;  %v5845_v39 = vcombine.low %v651_v27, %v655_v28  ;;  %v5852_v40 = vcombine.high %v658_v33, %v662_v34 }
 0x1cb   : > { %3694 = vmatprep.subr.bf16.mxu0 %v5796_v41  ;;  %4003 = vmatprep.subr.bf16.mxu1 %v5798_v42  ;;  %v5854_v41 = vcombine.high %v659_v36, %v663_v37  ;;  %v666_v42 = vld [vmem:[#allocation4 + $0xb50] sm:$0xff] }
 0x1cc   : > { %3643 = vmatprep.mubr.bf16.mxu0 %v6373_v54  ;;  %3952 = vmatprep.mubr.bf16.mxu1 %v6373_v54  ;;  %v675_v54 = vld [vmem:[#allocation4 + $0xb98] sm:$0xff]  ;;  %v5859_v56 = vcombine.low %v666_v42, %v670_v43 }
 0x1ce   : > { %3695 = vmatpush1.bf16.msra.mxu0 %v5795_v48  ;;  %4004 = vmatpush1.bf16.msra.mxu1 %v5797_v49  ;;  %v5853_v48 = vcombine.low %v659_v36, %v663_v37  ;;  %v5860_v49 = vcombine.high %v666_v42, %v670_v43  ;;  %v6393_v42 = vld [vmem:[%s6744_s26 + $0x134] ss:$24 sps:$4 sm:$0xff]  }
 0x1cf   : > { %3696 = vmatprep.subr.bf16.mxu0 %v5804_v50  ;;  %4005 = vmatprep.subr.bf16.mxu1 %v5806_v51  ;;  %v5862_v50 = vcombine.high %v667_v45, %v671_v46  ;;  %v674_v51 = vld [vmem:[#allocation4 + $0xb90] sm:$0xff] }
 0x1d0   : > { %v5867_v1 = vcombine.low %v674_v51, %v678_v52 }
 0x1d1   : > { %3644 = vmatmul.mubr.bf16.gmra.mrb[40].mxu0 %v6374_v63  ;;  %3953 = vmatmul.mubr.bf16.gmra.mrb[40].mxu1 %v6374_v63  ;;  %v683_v63 = vld [vmem:[#allocation4 + $0xbd8] sm:$0xff] }
 0x1d2   : > { %3697 = vmatpush1.bf16.msra.mxu0 %v5803_v57  ;;  %4006 = vmatpush1.bf16.msra.mxu1 %v5805_v58  ;;  %v5861_v57 = vcombine.low %v667_v45, %v671_v46  ;;  %v5868_v58 = vcombine.high %v674_v51, %v678_v52  ;;  %v5877_v6 = vcombine.low %v683_v63, %v687_v0  ;;  %v6394_v51 = vld [vmem:[%s6744_s26 + $0x130] ss:$24 sps:$4 sm:$0xff]  }
 0x1d3   : > { %3698 = vmatprep.subr.bf16.mxu0 %v5812_v59  ;;  %4007 = vmatprep.subr.bf16.mxu1 %v5814_v60  ;;  %v5870_v59 = vcombine.high %v675_v54, %v679_v55  ;;  %v682_v60 = vld [vmem:[#allocation4 + $0xbd0] sm:$0xff] }
 0x1d4   : > { %3653 = vmatprep.mubr.bf16.mxu0 %v6375_v8  ;;  %3962 = vmatprep.mubr.bf16.mxu1 %v6375_v8  ;;  %v6383_v8 = vld [vmem:[%s6744_s26 + $0x44] ss:$24 sps:$4 sm:$0xff]  }
 0x1d6   : > { %3699 = vmatpush1.bf16.msra.mxu0 %v5811_v2  ;;  %4008 = vmatpush1.bf16.msra.mxu1 %v5813_v3  ;;  %v5869_v2 = vcombine.low %v675_v54, %v679_v55  ;;  %v5876_v3 = vcombine.high %v682_v60, %v686_v61 }
 0x1d7   : > { %3700 = vmatprep.subr.bf16.mxu0 %v5820_v4  ;;  %4009 = vmatprep.subr.bf16.mxu1 %v5822_v5  ;;  %v5878_v4 = vcombine.high %v683_v63, %v687_v0  ;;  %v5875_v5 = vcombine.low %v682_v60, %v686_v61 }
 0x1d9   : > { %3654 = vmatmul.mubr.bf16.gmra.mrb[44].mxu0 %v6376_v17  ;;  %3963 = vmatmul.mubr.bf16.gmra.mrb[44].mxu1 %v6376_v17 }
 0x1da   : > { %3701 = vmatpush1.bf16.msra.mxu0 %v5819_v11  ;;  %4010 = vmatpush1.bf16.msra.mxu1 %v5821_v12  ;;  %v6386_v11 = vld [vmem:[%s6744_s26 + $0x70] ss:$24 sps:$4 sm:$0xff]   ;;  %v6387_v12 = vld [vmem:[%s6744_s26 + $0xa4] ss:$24 sps:$4 sm:$0xff]  }
 0x1db   : > { %3702 = vmatprep.subr.bf16.mxu0 %v5828_v13  ;;  %4011 = vmatprep.subr.bf16.mxu1 %v5830_v14 }
 0x1dc   : > { %3663 = vmatprep.mubr.bf16.mxu0 %v6377_v26  ;;  %3972 = vmatprep.mubr.bf16.mxu1 %v6377_v26 }
 0x1de   : > { %3703 = vmatpush1.bf16.msra.mxu0 %v5827_v20  ;;  %4012 = vmatpush1.bf16.msra.mxu1 %v5829_v21  ;;  %v6388_v21 = vld [vmem:[%s6744_s26 + $0xa0] ss:$24 sps:$4 sm:$0xff]  }
 0x1df   : > { %3704 = vmatprep.subr.bf16.mxu0 %v5836_v22  ;;  %4013 = vmatprep.subr.bf16.mxu1 %v5838_v23  ;;  %v6389_v22 = vld [vmem:[%s6744_s26 + $0xd4] ss:$24 sps:$4 sm:$0xff]  }
 0x1e1   : > { %3664 = vmatmul.mubr.bf16.gmra.mrb[48].mxu0 %v6378_v35  ;;  %3973 = vmatmul.mubr.bf16.gmra.mrb[48].mxu1 %v6378_v35 }
 0x1e2   : > { %3705 = vmatpush1.bf16.msra.mxu0 %v5835_v29  ;;  %4014 = vmatpush1.bf16.msra.mxu1 %v5837_v30 }
 0x1e3   : > { %3706 = vmatprep.subr.bf16.mxu0 %v5844_v31  ;;  %4015 = vmatprep.subr.bf16.mxu1 %v5846_v32  ;;  %v6390_v31 = vld [vmem:[%s6744_s26 + $0xd0] ss:$24 sps:$4 sm:$0xff]   ;;  %v6391_v32 = vld [vmem:[%s6744_s26 + $0x104] ss:$24 sps:$4 sm:$0xff]  }
 0x1e4   : > { %3673 = vmatprep.mubr.bf16.mxu0 %v6379_v44  ;;  %3982 = vmatprep.mubr.bf16.mxu1 %v6379_v44 }
 0x1e6   : > { %3707 = vmatpush1.bf16.msra.mxu0 %v5843_v38  ;;  %4016 = vmatpush1.bf16.msra.mxu1 %v5845_v39 }
 0x1e7   : > { %3708 = vmatprep.subr.bf16.mxu0 %v5852_v40  ;;  %4017 = vmatprep.subr.bf16.mxu1 %v5854_v41  ;;  %v6392_v41 = vld [vmem:[%s6744_s26 + $0x100] ss:$24 sps:$4 sm:$0xff]  }
 0x1e9   : > { %3674 = vmatmul.mubr.bf16.gmra.mrb[52].mxu0 %v6380_v53  ;;  %3983 = vmatmul.mubr.bf16.gmra.mrb[52].mxu1 %v6380_v53 }
 0x1ea   : > { %3709 = vmatpush1.bf16.msra.mxu0 %v5851_v47  ;;  %4018 = vmatpush1.bf16.msra.mxu1 %v5853_v48 }
 0x1eb   : > { %3710 = vmatprep.subr.bf16.mxu0 %v5860_v49  ;;  %4019 = vmatprep.subr.bf16.mxu1 %v5862_v50 }
 0x1ec   : > { %3716 = vmatprep.mubr.bf16.mxu0 %v6381_v62  ;;  %4025 = vmatprep.mubr.bf16.mxu1 %v6381_v62 }
 0x1ee   : > { %3711 = vmatpush1.bf16.msra.mxu0 %v5859_v56  ;;  %4020 = vmatpush1.bf16.msra.mxu1 %v5861_v57 }
 0x1ef   : > { %3712 = vmatprep.subr.bf16.mxu0 %v5868_v58  ;;  %4021 = vmatprep.subr.bf16.mxu1 %v5870_v59 }
 0x1f2   : > { %3713 = vmatpush1.bf16.msra.mxu0 %v5867_v1  ;;  %4022 = vmatpush1.bf16.msra.mxu1 %v5869_v2 }
 0x1f3   : > { %3714 = vmatprep.subr.bf16.mxu0 %v5876_v3  ;;  %4023 = vmatprep.subr.bf16.mxu1 %v5878_v4 }
 0x1f6   : > { %3715 = vmatpush1.bf16.msra.mxu0 %v5875_v5  ;;  %4024 = vmatpush1.bf16.msra.mxu1 %v5877_v6 }
 0x1f9   : > { %3717 = vmatmul.mubr.bf16.vlgmr.msra.gmra.mrb[28].mxu0 %v6382_v7  ;;  %4026 = vmatmul.mubr.bf16.vlgmr.msra.gmra.mrb[28].mxu1 %v6382_v7 }
 0x1fa   : > { %3726 = vmatprep.mubr.bf16.mxu0 %v6383_v8  ;;  %4035 = vmatprep.mubr.bf16.mxu1 %v6383_v8 }
 0x201   : > { %3727 = vmatmul.mubr.bf16.gmra.mrb[32].mxu0 %v6384_v9  ;;  %4036 = vmatmul.mubr.bf16.gmra.mrb[32].mxu1 %v6384_v9 }
 0x202   : > { %3736 = vmatprep.mubr.bf16.mxu0 %v6385_v10  ;;  %4045 = vmatprep.mubr.bf16.mxu1 %v6385_v10 }
 0x209   : > { %3737 = vmatmul.mubr.bf16.gmra.mrb[36].mxu0 %v6386_v11  ;;  %4046 = vmatmul.mubr.bf16.gmra.mrb[36].mxu1 %v6386_v11 }
 0x20a   : > { %3746 = vmatprep.mubr.bf16.mxu0 %v6387_v12  ;;  %4055 = vmatprep.mubr.bf16.mxu1 %v6387_v12  ;;  %v8363_v12 = vlaneseq }
 0x20c   : > { %v6838_v13 = vpop.f32.mrb[0].mxu0  ;;  %v6840_v14 = vpop.f32.mrb[0].mxu1 }
 0x20d   : > { %v6842_v15 = vpop.f32.mrb[1].mxu0  ;;  %v6844_v16 = vpop.f32.mrb[1].mxu1 }
 0x20e   : > { %v6846_v17 = vpop.f32.mrb[2].mxu0  ;;  %v6848_v18 = vpop.f32.mrb[2].mxu1 }
 0x20f   : > { %v6850_v19 = vpop.f32.mrb[3].mxu0  ;;  %v6852_v20 = vpop.f32.mrb[3].mxu1 }
 0x211   : > { %3747 = vmatmul.mubr.bf16.gmra.mrb[40].mxu0 %v6388_v21  ;;  %4056 = vmatmul.mubr.bf16.gmra.mrb[40].mxu1 %v6388_v21  ;;  %v6950_v21 = vshrl.u32 %v8363_v12, 7 }
 0x212   : > { %3756 = vmatprep.mubr.bf16.mxu0 %v6389_v22  ;;  %4065 = vmatprep.mubr.bf16.mxu1 %v6389_v22 }
 0x213   : > { %8456 = vst [vmem:[#allocation14_spill] sm:$0xff] %v6950_v21  ;;  %v692_v22 = vsub.s32 0, %v6950_v21  ;;  %v708_v12 = vsub.s32 4, %v6950_v21 }
 0x214   : > { %v6856_v23 = vpop.f32.mrb[4].mxu0  ;;  %v6858_v24 = vpop.f32.mrb[4].mxu1 }
 0x215   : > { %v6860_v25 = vpop.f32.mrb[5].mxu0  ;;  %v6862_v26 = vpop.f32.mrb[5].mxu1 }
 0x216   : > { %v6864_v27 = vpop.f32.mrb[6].mxu0  ;;  %v6866_v28 = vpop.f32.mrb[6].mxu1 }
 0x217   : > { %v6868_v29 = vpop.f32.mrb[7].mxu0  ;;  %v6870_v30 = vpop.f32.mrb[7].mxu1 }
 0x219   : > { %3757 = vmatmul.mubr.bf16.gmra.mrb[44].mxu0 %v6390_v31  ;;  %4066 = vmatmul.mubr.bf16.gmra.mrb[44].mxu1 %v6390_v31  ;;  %v696_v31 = vsub.s32 1, %v6950_v21 }
 0x21a   : > { %3766 = vmatprep.mubr.bf16.mxu0 %v6391_v32  ;;  %4075 = vmatprep.mubr.bf16.mxu1 %v6391_v32  ;;  %v688_v32 = vld [vmem:[%s225_s5] sm:$0xff] }
 0x21c   : > { %v6874_v33 = vpop.f32.mrb[8].mxu0  ;;  %v6876_v34 = vpop.f32.mrb[8].mxu1 }
 0x21d   : > { %v6878_v35 = vpop.f32.mrb[9].mxu0  ;;  %v6880_v36 = vpop.f32.mrb[9].mxu1 }
 0x21e   : > { %v6882_v37 = vpop.f32.mrb[10].mxu0  ;;  %v6884_v38 = vpop.f32.mrb[10].mxu1 }
 0x21f   : > { %v6886_v39 = vpop.f32.mrb[11].mxu0  ;;  %v6888_v40 = vpop.f32.mrb[11].mxu1 }
 0x221   : > { %3767 = vmatmul.mubr.bf16.gmra.mrb[48].mxu0 %v6392_v41  ;;  %4076 = vmatmul.mubr.bf16.gmra.mrb[48].mxu1 %v6392_v41  ;;  %v6956_v41 = vrot.slane %v688_v32, %v692_v22 }
 0x222   : > { %3776 = vmatprep.mubr.bf16.mxu0 %v6393_v42  ;;  %4085 = vmatprep.mubr.bf16.mxu1 %v6393_v42  ;;  %v6958_v42 = vrot.slane %v688_v32, %v696_v31  ;;  %v704_v31 = vsub.s32 3, %v6950_v21 }
 0x224   : > { %v6892_v43 = vpop.f32.mrb[12].mxu0  ;;  %v6894_v44 = vpop.f32.mrb[12].mxu1 }
 0x225   : > { %v6896_v45 = vpop.f32.mrb[13].mxu0  ;;  %v6898_v46 = vpop.f32.mrb[13].mxu1 }
 0x226   : > { %v6900_v47 = vpop.f32.mrb[14].mxu0  ;;  %v6902_v48 = vpop.f32.mrb[14].mxu1 }
 0x227   : > { %v6904_v49 = vpop.f32.mrb[15].mxu0  ;;  %v6906_v50 = vpop.f32.mrb[15].mxu1 }
 0x229   : > { %3777 = vmatmul.mubr.bf16.gmra.mrb[52].mxu0 %v6394_v51  ;;  %4086 = vmatmul.mubr.bf16.gmra.mrb[52].mxu1 %v6394_v51  ;;  %v700_v51 = vsub.s32 2, %v6950_v21 }
 0x22b   : > { %v6977_v22 = vrot.slane %v688_v32, %v700_v51 }
 0x22c   : > { %v6909_v52 = vpop.f32.mrb[16].mxu0  ;;  %v6911_v53 = vpop.f32.mrb[16].mxu1 }
 0x22d   : > { %v6913_v54 = vpop.f32.mrb[17].mxu0  ;;  %v6915_v55 = vpop.f32.mrb[17].mxu1  ;;  %v6994_v51 = vadd.f32 %v6848_v18, %v6977_v22  ;;  %v7011_v18 = vadd.f32 %v6864_v27, %v6956_v41 }
 0x22e   : > { %v6917_v56 = vpop.f32.mrb[18].mxu0  ;;  %v6919_v57 = vpop.f32.mrb[18].mxu1 }
 0x22f   : > { %v6921_v58 = vpop.f32.mrb[19].mxu0  ;;  %v6923_v59 = vpop.f32.mrb[19].mxu1  ;;  %8462 = vst [vmem:[#allocation20_spill] sm:$0xff] %v6994_v51  ;;  %8465 = vst [vmem:[#allocation23_spill] sm:$0xff] %v7011_v18 }
 0x234   : > { %v6925_v60 = vpop.f32.mrb[20].mxu0  ;;  %v6927_v61 = vpop.f32.mrb[20].mxu1 }
 0x235   : > { %v6929_v62 = vpop.f32.mrb[21].mxu0  ;;  %v6931_v63 = vpop.f32.mrb[21].mxu1 }
 0x236   : > { %8452 = vst [vmem:[#allocation10_spill] sm:$0xff] %v6931_v63  ;;  %v6933_v0 = vpop.f32.mrb[22].mxu0  ;;  %v6935_v1 = vpop.f32.mrb[22].mxu1 }
 0x237   : > { %v6937_v2 = vpop.f32.mrb[23].mxu0  ;;  %v6939_v3 = vpop.f32.mrb[23].mxu1 }
 0x238   : > { %8453 = vst [vmem:[#allocation11_spill] sm:$0xff] %v6939_v3 }
 0x23c   : > { %v6941_v4 = vpop.f32.mrb[24].mxu0  ;;  %v6943_v5 = vpop.f32.mrb[24].mxu1 }
 0x23d   : > { %8454 = vst [vmem:[#allocation12_spill] sm:$0xff] %v6943_v5  ;;  %v6945_v6 = vpop.f32.mrb[25].mxu0  ;;  %v6947_v7 = vpop.f32.mrb[25].mxu1  ;;  %v6996_v5 = vrot.slane %v688_v32, %v708_v12  ;;  %v7015_v12 = vadd.f32 %v6868_v29, %v6958_v42 }
 0x23e   : > { %8455 = vst [vmem:[#allocation13_spill] sm:$0xff] %v6947_v7  ;;  %v3164_v8 = vpop.f32.mrb[26].mxu0  ;;  %v3473_v9 = vpop.f32.mrb[26].mxu1  ;;  %v712_v7 = vsub.s32 5, %v6950_v21 }
 0x23f   : > { %v3166_v10 = vpop.f32.mrb[27].mxu0  ;;  %v3475_v11 = vpop.f32.mrb[27].mxu1  ;;  %v6963_v8 = vadd.f32 %v6838_v13, %v6956_v41  ;;  %v6967_v9 = vadd.f32 %v6842_v15, %v6958_v42  ;;  %8466 = vst [vmem:[#allocation24_spill] sm:$0xff] %v7015_v12 }
 0x240   : > { %v6971_v10 = vadd.f32 %v6846_v17, %v6956_v41  ;;  %v6975_v11 = vadd.f32 %v6850_v19, %v6958_v42  ;;  %v6988_v17 = vadd.f32 %v6840_v14, %v6977_v22  ;;  %v6990_v19 = vrot.slane %v688_v32, %v704_v31 }
 0x241   : > { %8457 = vst [vmem:[#allocation15_spill] sm:$0xff] %v6963_v8  ;;  %8458 = vst [vmem:[#allocation16_spill] sm:$0xff] %v6967_v9  ;;  %v4105_v13 = vmax.f32 %v6963_v8, %v6967_v9  ;;  %v7001_v9 = vadd.f32 %v6856_v23, %v6956_v41  ;;  %v716_v14 = vsub.s32 6, %v6950_v21 }
 0x242   : > { %8459 = vst [vmem:[#allocation17_spill] sm:$0xff] %v6971_v10  ;;  %8460 = vst [vmem:[#allocation18_spill] sm:$0xff] %v6975_v11  ;;  %v4114_v15 = vmax.f32 %v6971_v10, %v6975_v11  ;;  %v7005_v11 = vadd.f32 %v6860_v25, %v6958_v42  ;;  %v7021_v23 = vadd.f32 %v6844_v16, %v6990_v19  ;;  %v720_v25 = vsub.s32 7, %v6950_v21 }
 0x243   : > { %8461 = vst [vmem:[#allocation19_spill] sm:$0xff] %v6988_v17  ;;  %v4106_v3 = vmax.f32 %v4105_v13, %v6988_v17  ;;  %8463 = vst [vmem:[#allocation21_spill] sm:$0xff] %v7001_v9  ;;  %v7017_v13 = vrot.slane %v688_v32, %v712_v7  ;;  %v7026_v10 = vadd.f32 %v6852_v20, %v6990_v19 }
 0x244   : > { %8464 = vst [vmem:[#allocation22_spill] sm:$0xff] %v7005_v11  ;;  %v4115_v31 = vmax.f32 %v4114_v15, %v6994_v51  ;;  %v4123_v51 = vmax.f32 %v7001_v9, %v7005_v11  ;;  %v7034_v7 = vrot.slane %v688_v32, %v716_v14  ;;  %v4132_v21 = vmax.f32 %v7011_v18, %v7015_v12 }
 0x245   : > { %8467 = vst [vmem:[#allocation25_spill] sm:$0xff] %v7026_v10  ;;  %v4107_v27 = vmax.f32 %v4106_v3, %v7021_v23  ;;  %v7044_v11 = vadd.f32 %v6858_v24, %v6977_v22  ;;  %v7047_v14 = vrot.slane %v688_v32, %v720_v25  ;;  %v7054_v12 = vadd.f32 %v6866_v28, %v6977_v22 }
 0x246   : > { %v4116_v8 = vmax.f32 %v4115_v31, %v7026_v10  ;;  %v7062_v24 = vadd.f32 %v6878_v35, %v6958_v42 }
 0x247   : > { %8468 = vst [vmem:[#allocation26_spill] sm:$0xff] %v7044_v11  ;;  %8470 = vst [vmem:[#allocation28_spill] sm:$0xff] %v7054_v12  ;;  %v4133_v35 = vmax.f32 %v4132_v21, %v7054_v12  ;;  %v7096_v21 = vadd.f32 %v6870_v30, %v6990_v19  ;;  %v7109_v30 = vadd.f32 %v6876_v34, %v6977_v22 }
 0x248   : > { %8472 = vst [vmem:[#allocation30_spill] sm:$0xff] %v7062_v24 }
 0x249   : > { %8476 = vst [vmem:[#allocation34_spill] sm:$0xff] %v7096_v21  ;;  %8477 = vst [vmem:[#allocation35_spill] sm:$0xff] %v7109_v30 }
 0x2cc   : > { %v3718_v15 = vpop.f32.mrb[28].mxu0  ;;  %v4027_v17 = vpop.f32.mrb[28].mxu1 }
 0x2cd   : > { %v7032_v29 = vadd.f32 %v3718_v15, %v6996_v5  ;;  %v3720_v16 = vpop.f32.mrb[29].mxu0  ;;  %v4029_v63 = vpop.f32.mrb[29].mxu1 }
 0x2ce   : > { %v7040_v20 = vadd.f32 %v3720_v16, %v7017_v13  ;;  %v3722_v3 = vpop.f32.mrb[30].mxu0  ;;  %v4031_v31 = vpop.f32.mrb[30].mxu1  ;;  %v7058_v16 = vadd.f32 %v6874_v33, %v6956_v41  ;;  %v7075_v33 = vadd.f32 %v6862_v26, %v6990_v19 }
 0x2cf   : > { %v4108_v15 = vmax.f32 %v4107_v27, %v7032_v29  ;;  %v7050_v9 = vadd.f32 %v3722_v3, %v6996_v5  ;;  %v3724_v10 = vpop.f32.mrb[31].mxu0  ;;  %v4033_v25 = vpop.f32.mrb[31].mxu1  ;;  %v4124_v27 = vmax.f32 %v4123_v51, %v7044_v11  ;;  %v7069_v3 = vadd.f32 %v4027_v17, %v7034_v7 }
 0x2d0   : > { %8471 = vst [vmem:[#allocation29_spill] sm:$0xff] %v7058_v16  ;;  %v7065_v32 = vadd.f32 %v3724_v10, %v7017_v13  ;;  %8473 = vst [vmem:[#allocation31_spill] sm:$0xff] %v7075_v33  ;;  %v7080_v10 = vadd.f32 %v6882_v37, %v6956_v41  ;;  %v7084_v51 = vadd.f32 %v6886_v39, %v6958_v42 }
 0x2d1   : > { %8469 = vst [vmem:[#allocation27_spill] sm:$0xff] %v7050_v9  ;;  %v4109_v28 = vmax.f32 %v4108_v15, %v7040_v20  ;;  %v4117_v18 = vmax.f32 %v4116_v8, %v7050_v9  ;;  %v7087_v17 = vadd.f32 %v4029_v63, %v7047_v14  ;;  %v7090_v15 = vadd.f32 %v4031_v31, %v7034_v7 }
 0x2d2   : > { %8474 = vst [vmem:[#allocation32_spill] sm:$0xff] %v7080_v10  ;;  %8475 = vst [vmem:[#allocation33_spill] sm:$0xff] %v7084_v51  ;;  %v4141_v37 = vmax.f32 %v7058_v16, %v7062_v24  ;;  %v4125_v39 = vmax.f32 %v4124_v27, %v7075_v33  ;;  %v4150_v24 = vmax.f32 %v7080_v10, %v7084_v51 }
 0x2d3   : > { %v4118_v8 = vmax.f32 %v4117_v18, %v7065_v32  ;;  %v4110_v26 = vmax.f32 %v4109_v28, %v7069_v3  ;;  %v4134_v28 = vmax.f32 %v4133_v35, %v7096_v21  ;;  %v7118_v33 = vadd.f32 %v6884_v38, %v6977_v22 }
 0x2d4   : > { %v3728_v12 = vpop.f32.mrb[32].mxu0  ;;  %v4037_v11 = vpop.f32.mrb[32].mxu1  ;;  %v7130_v51 = vadd.f32 %v6892_v43, %v6956_v41  ;;  %v7134_v38 = vadd.f32 %v6896_v45, %v6958_v42  ;;  %v7147_v43 = vadd.f32 %v6880_v36, %v6990_v19 }
 0x2d5   : > { %v7102_v63 = vadd.f32 %v3728_v12, %v6996_v5  ;;  %v3730_v31 = vpop.f32.mrb[33].mxu0  ;;  %v4111_v9 = vmax.f32 %v4110_v26, %v7087_v17  ;;  %v4119_v18 = vmax.f32 %v4118_v8, %v7090_v15  ;;  %v4039_v12 = vpop.f32.mrb[33].mxu1  ;;  %8478 = vst [vmem:[#allocation36_spill] sm:$0xff] %v7118_v33  ;;  %v7121_v8 = vadd.f32 %v4033_v25, %v7047_v14 }
 0x2d6   : > { %v7114_v27 = vadd.f32 %v3730_v31, %v7017_v13  ;;  %v3732_v16 = vpop.f32.mrb[34].mxu0  ;;  %v4041_v26 = vpop.f32.mrb[34].mxu1  ;;  %v4142_v31 = vmax.f32 %v4141_v37, %v7109_v30  ;;  %8479 = vst [vmem:[#allocation37_spill] sm:$0xff] %v7130_v51  ;;  %8480 = vst [vmem:[#allocation38_spill] sm:$0xff] %v7134_v38  ;;  %v4151_v45 = vmax.f32 %v4150_v24, %v7118_v33 }
 0x2d7   : > { %v4126_v35 = vmax.f32 %v4125_v39, %v7102_v63  ;;  %v7125_v34 = vadd.f32 %v3732_v16, %v6996_v5  ;;  %v3734_v21 = vpop.f32.mrb[35].mxu0  ;;  %4112 = vmax.xlane.f32.xlu0 %v4111_v9  ;;  %v4043_v39 = vpop.f32.mrb[35].mxu1  ;;  %v7140_v16 = vadd.f32 %v4037_v11, %v7034_v7  ;;  %v4120_v37 = vmax.f32 %v4119_v18, %v7121_v8 }
 0x2d8   : > { %v7137_v25 = vadd.f32 %v3734_v21, %v7017_v13  ;;  %8481 = vst [vmem:[#allocation39_spill] sm:$0xff] %v7147_v43  ;;  %v7152_v21 = vadd.f32 %v6900_v47, %v6956_v41  ;;  %v7156_v11 = vadd.f32 %v6904_v49, %v6958_v42  ;;  %v7168_v24 = vadd.f32 %v6888_v40, %v6990_v19 }
 0x2d9   : > { %v4127_v10 = vmax.f32 %v4126_v35, %v7114_v27  ;;  %v4135_v9 = vmax.f32 %v4134_v28, %v7125_v34  ;;  %v7159_v35 = vadd.f32 %v4039_v12, %v7047_v14  ;;  %v7162_v28 = vadd.f32 %v4041_v26, %v7034_v7 }
 0x2da   : > { %8482 = vst [vmem:[#allocation40_spill] sm:$0xff] %v7152_v21  ;;  %8483 = vst [vmem:[#allocation41_spill] sm:$0xff] %v7156_v11  ;;  %v4159_v47 = vmax.f32 %v7130_v51, %v7134_v38  ;;  %v4143_v33 = vmax.f32 %v4142_v31, %v7147_v43  ;;  %v7181_v40 = vadd.f32 %v6894_v44, %v6977_v22 }
 0x2db   : > { %v4136_v18 = vmax.f32 %v4135_v9, %v7137_v25  ;;  %4121 = vmax.xlane.f32.xlu0 %v4120_v37  ;;  %v4128_v36 = vmax.f32 %v4127_v10, %v7140_v16  ;;  %8484 = vst [vmem:[#allocation42_spill] sm:$0xff] %v7168_v24  ;;  %v4152_v10 = vmax.f32 %v4151_v45, %v7168_v24 }
 0x2dc   : > { %v3738_v49 = vpop.f32.mrb[36].mxu0  ;;  %v4047_v26 = vpop.f32.mrb[36].mxu1  ;;  %8485 = vst [vmem:[#allocation43_spill] sm:$0xff] %v7181_v40  ;;  %v4168_v38 = vmax.f32 %v7152_v21, %v7156_v11  ;;  %v7190_v43 = vadd.f32 %v6902_v48, %v6977_v22  ;;  %v7202_v11 = vadd.f32 %v6909_v52, %v6956_v41  ;;  %v7206_v48 = vadd.f32 %v6913_v54, %v6958_v42 }
 0x2dd   : > { %v7174_v12 = vadd.f32 %v3738_v49, %v6996_v5  ;;  %v3740_v30 = vpop.f32.mrb[37].mxu0  ;;  %v4129_v9 = vmax.f32 %v4128_v36, %v7159_v35  ;;  %v4137_v37 = vmax.f32 %v4136_v18, %v7162_v28  ;;  %v4049_v49 = vpop.f32.mrb[37].mxu1  ;;  %v7193_v18 = vadd.f32 %v4043_v39, %v7047_v14 }
 0x2de   : > { %v7186_v31 = vadd.f32 %v3740_v30, %v7017_v13  ;;  %v3742_v51 = vpop.f32.mrb[38].mxu0  ;;  %8486 = vst [vmem:[#allocation44_spill] sm:$0xff] %v7190_v43  ;;  %v4051_v36 = vpop.f32.mrb[38].mxu1  ;;  %v4160_v30 = vmax.f32 %v4159_v47, %v7181_v40  ;;  %8487 = vst [vmem:[#allocation45_spill] sm:$0xff] %v7202_v11  ;;  %v7219_v52 = vadd.f32 %v6898_v46, %v6990_v19 }
 0x2df   : > { %v4144_v45 = vmax.f32 %v4143_v33, %v7174_v12  ;;  %v7197_v44 = vadd.f32 %v3742_v51, %v6996_v5  ;;  %v3744_v24 = vpop.f32.mrb[39].mxu0  ;;  %4130 = vmax.xlane.f32.xlu1 %v4129_v9  ;;  %8488 = vst [vmem:[#allocation46_spill] sm:$0xff] %v7206_v48  ;;  %v4053_v33 = vpop.f32.mrb[39].mxu1  ;;  %v7212_v51 = vadd.f32 %v4047_v26, %v7034_v7 }
 0x2e0   : > { %v7209_v39 = vadd.f32 %v3744_v24, %v7017_v13  ;;  %v4138_v47 = vmax.f32 %v4137_v37, %v7193_v18  ;;  %8489 = vst [vmem:[#allocation47_spill] sm:$0xff] %v7219_v52  ;;  %v4169_v54 = vmax.f32 %v4168_v38, %v7190_v43  ;;  %v7224_v24 = vadd.f32 %v6917_v56, %v6956_v41 }
 0x2e1   : > { %v4145_v21 = vmax.f32 %v4144_v45, %v7186_v31  ;;  %v4153_v9 = vmax.f32 %v4152_v10, %v7197_v44  ;;  %v7228_v26 = vadd.f32 %v6921_v58, %v6958_v42  ;;  %v7231_v45 = vadd.f32 %v4049_v49, %v7047_v14 }
 0x2e2   : > { %8490 = vst [vmem:[#allocation48_spill] sm:$0xff] %v7224_v24  ;;  %v7234_v10 = vadd.f32 %v4051_v36, %v7034_v7  ;;  %v4161_v38 = vmax.f32 %v4160_v30, %v7219_v52  ;;  %v7241_v56 = vadd.f32 %v6906_v50, %v6990_v19  ;;  %v4177_v58 = vmax.f32 %v7202_v11, %v7206_v48 }
 0x2e3   : > { %8491 = vst [vmem:[#allocation49_spill] sm:$0xff] %v7228_v26  ;;  %v4154_v37 = vmax.f32 %v4153_v9, %v7209_v39  ;;  %4139 = vmax.xlane.f32.xlu1 %v4138_v47  ;;  %v4146_v46 = vmax.f32 %v4145_v21, %v7212_v51  ;;  %v7246_v49 = vadd.f32 %v4053_v33, %v7047_v14 }
 0x2e4   : > { %8492 = vst [vmem:[#allocation50_spill] sm:$0xff] %v7241_v56  ;;  %v3748_v43 = vpop.f32.mrb[40].mxu0  ;;  %v4057_v9 = vpop.f32.mrb[40].mxu1  ;;  %v4170_v52 = vmax.f32 %v4169_v54, %v7241_v56  ;;  %v7256_v50 = vadd.f32 %v6911_v53, %v6977_v22  ;;  %v4186_v48 = vmax.f32 %v7224_v24, %v7228_v26  ;;  %v7265_v40 = vadd.f32 %v6919_v57, %v6977_v22 }
 0x2e5   : > { %v7249_v36 = vadd.f32 %v3748_v43, %v6996_v5  ;;  %v3750_v47 = vpop.f32.mrb[41].mxu0  ;;  %v4147_v21 = vmax.f32 %v4146_v46, %v7231_v45  ;;  %v4155_v30 = vmax.f32 %v4154_v37, %v7234_v10  ;;  %v4059_v43 = vpop.f32.mrb[41].mxu1  ;;  %v7279_v57 = vadd.f32 %v6929_v62, %v6958_v42 }
 0x2e6   : > { %8493 = vst [vmem:[#allocation51_spill] sm:$0xff] %v7256_v50  ;;  %v7261_v33 = vadd.f32 %v3750_v47, %v7017_v13  ;;  %v3752_v11 = vpop.f32.mrb[42].mxu0  ;;  %8494 = vst [vmem:[#allocation52_spill] sm:$0xff] %v7265_v40  ;;  %v4061_v46 = vpop.f32.mrb[42].mxu1  ;;  %v4178_v26 = vmax.f32 %v4177_v58, %v7256_v50  ;;  %v7275_v47 = vadd.f32 %v6925_v60, %v6956_v41 }
 0x2e7   : > { %v4162_v37 = vmax.f32 %v4161_v38, %v7249_v36  ;;  %v7269_v54 = vadd.f32 %v3752_v11, %v6996_v5  ;;  %v3754_v53 = vpop.f32.mrb[43].mxu0  ;;  %4148 = vmax.xlane.f32.xlu0 %v4147_v21  ;;  %v4156_v56 = vmax.f32 %v4155_v30, %v7246_v49  ;;  %8496 = vst [vmem:[#allocation54_spill] sm:$0xff] %v7279_v57  ;;  %v4063_v11 = vpop.f32.mrb[43].mxu1 }
 0x2e8   : > { %8495 = vst [vmem:[#allocation53_spill] sm:$0xff] %v7275_v47  ;;  %v7282_v38 = vadd.f32 %v3754_v53, %v7017_v13  ;;  %v7285_v24 = vadd.f32 %v4057_v9, %v7034_v7  ;;  %v7291_v60 = vadd.f32 %v6915_v55, %v6990_v19  ;;  %v4187_v58 = vmax.f32 %v4186_v48, %v7265_v40 }
 0x2e9   : > { %v4163_v21 = vmax.f32 %v4162_v37, %v7261_v33  ;;  %v4171_v30 = vmax.f32 %v4170_v52, %v7269_v54  ;;  %4157 = vmax.xlane.f32.xlu1 %v4156_v56  ;;  %v7296_v62 = vadd.f32 %v6933_v0, %v6956_v41  ;;  %v7300_v53 = vadd.f32 %v6937_v2, %v6958_v42 }
 0x2ea   : > { %8497 = vst [vmem:[#allocation55_spill] sm:$0xff] %v7291_v60  ;;  %v7303_v9 = vadd.f32 %v4059_v43, %v7047_v14  ;;  %v7306_v52 = vadd.f32 %v4061_v46, %v7034_v7  ;;  %v4179_v48 = vmax.f32 %v4178_v26, %v7291_v60  ;;  %v7313_v0 = vadd.f32 %v6923_v59, %v6990_v19 }
 0x2eb   : > { %8498 = vst [vmem:[#allocation56_spill] sm:$0xff] %v7296_v62  ;;  %8499 = vst [vmem:[#allocation57_spill] sm:$0xff] %v7300_v53  ;;  %v4172_v56 = vmax.f32 %v4171_v30, %v7282_v38  ;;  %v4164_v55 = vmax.f32 %v4163_v21, %v7285_v24  ;;  %v4195_v2 = vmax.f32 %v7275_v47, %v7279_v57 }
 0x2ec   : > { %8500 = vst [vmem:[#allocation58_spill] sm:$0xff] %v7313_v0  ;;  %v3758_v37 = vpop.f32.mrb[44].mxu0  ;;  %v7318_v43 = vadd.f32 %v4063_v11, %v7047_v14  ;;  %v4067_v40 = vpop.f32.mrb[44].mxu1  ;;  %v4188_v60 = vmax.f32 %v4187_v58, %v7313_v0  ;;  %v7328_v59 = vadd.f32 %v6927_v61, %v6977_v22  ;;  %v4204_v57 = vmax.f32 %v7296_v62, %v7300_v53 }
 0x2ed   : > { %v7321_v46 = vadd.f32 %v3758_v37, %v6996_v5  ;;  %v3760_v30 = vpop.f32.mrb[45].mxu0  ;;  %v4165_v21 = vmax.f32 %v4164_v55, %v7303_v9  ;;  %v4173_v26 = vmax.f32 %v4172_v56, %v7306_v52  ;;  %v4069_v37 = vpop.f32.mrb[45].mxu1  ;;  %v7337_v50 = vadd.f32 %v6935_v1, %v6977_v22 }
 0x2ee   : > { %8501 = vst [vmem:[#allocation59_spill] sm:$0xff] %v7328_v59  ;;  %v7333_v11 = vadd.f32 %v3760_v30, %v7017_v13  ;;  %v3762_v47 = vpop.f32.mrb[46].mxu0  ;;  %v4071_v55 = vpop.f32.mrb[46].mxu1  ;;  %v4196_v53 = vmax.f32 %v4195_v2, %v7328_v59  ;;  %v7347_v30 = vadd.f32 %v6941_v4, %v6956_v41  ;;  %v7351_v1 = vadd.f32 %v6945_v6, %v6958_v42  ;;  %v8507_v2 = vld [vmem:[#allocation10_spill] sm:$0xff] }
 0x2ef   : > { %8502 = vst [vmem:[#allocation60_spill] sm:$0xff] %v7337_v50  ;;  %v4180_v56 = vmax.f32 %v4179_v48, %v7321_v46  ;;  %v7341_v58 = vadd.f32 %v3762_v47, %v6996_v5  ;;  %v3764_v61 = vpop.f32.mrb[47].mxu0  ;;  %4166 = vmax.xlane.f32.xlu0 %v4165_v21  ;;  %v4174_v0 = vmax.f32 %v4173_v26, %v7318_v43  ;;  %v4073_v47 = vpop.f32.mrb[47].mxu1 }
 0x2f0   : > { %8504 = vst [vmem:[#allocation62_spill] sm:$0xff] %v7347_v30  ;;  %8505 = vst [vmem:[#allocation63_spill] sm:$0xff] %v7351_v1  ;;  %v7354_v48 = vadd.f32 %v3764_v61, %v7017_v13  ;;  %v7357_v62 = vadd.f32 %v4067_v40, %v7034_v7  ;;  %v7363_v4 = vadd.f32 %v8507_v2, %v6990_v19 }
 0x2f1   : > { %8503 = vst [vmem:[#allocation61_spill] sm:$0xff] %v7341_v58  ;;  %v4181_v21 = vmax.f32 %v4180_v56, %v7333_v11  ;;  %v4189_v26 = vmax.f32 %v4188_v60, %v7341_v58  ;;  %4175 = vmax.xlane.f32.xlu1 %v4174_v0  ;;  %v4205_v41 = vmax.f32 %v4204_v57, %v7337_v50  ;;  %v8510_v60 = vld [vmem:[#allocation11_spill] sm:$0xff] }
 0x2f2   : > { %8506 = vst [vmem:[#allocation64_spill] sm:$0xff] %v7354_v48  ;;  %8508 = vst [vmem:[#allocation10_spill] sm:$0xff] %v7363_v4  ;;  %v7367_v6 = vadd.f32 %v4069_v37, %v7047_v14  ;;  %v7370_v42 = vadd.f32 %v4071_v55, %v7034_v7  ;;  %v4197_v56 = vmax.f32 %v4196_v53, %v7363_v4  ;;  %v8512_v4 = vld [vmem:[#allocation12_spill] sm:$0xff] }
 0x2f3   : > { %v4190_v40 = vmax.f32 %v4189_v26, %v7354_v48  ;;  %v4182_v61 = vmax.f32 %v4181_v21, %v7357_v62  ;;  %v7377_v0 = vadd.f32 %v8510_v60, %v6990_v19  ;;  %v4213_v2 = vmax.f32 %v7347_v30, %v7351_v1 }
 0x2f4   : > { %8509 = vst [vmem:[#allocation65_spill] sm:$0xff] %v7370_v42  ;;  %v3768_v57 = vpop.f32.mrb[48].mxu0  ;;  %v7382_v37 = vadd.f32 %v4073_v47, %v7047_v14  ;;  %v4077_v50 = vpop.f32.mrb[48].mxu1  ;;  %v7391_v60 = vadd.f32 %v8512_v4, %v6977_v22 }
 0x2f5   : > { %8511 = vst [vmem:[#allocation11_spill] sm:$0xff] %v7377_v0  ;;  %v7385_v55 = vadd.f32 %v3768_v57, %v6996_v5  ;;  %v3770_v26 = vpop.f32.mrb[49].mxu0  ;;  %v4183_v21 = vmax.f32 %v4182_v61, %v7367_v6  ;;  %v4191_v53 = vmax.f32 %v4190_v40, %v7370_v42  ;;  %v4079_v1 = vpop.f32.mrb[49].mxu1  ;;  %v4206_v47 = vmax.f32 %v4205_v41, %v7377_v0 }
 0x2f6   : > { %8513 = vst [vmem:[#allocation12_spill] sm:$0xff] %v7391_v60  ;;  %v7394_v59 = vadd.f32 %v3770_v26, %v7017_v13  ;;  %v3772_v30 = vpop.f32.mrb[50].mxu0  ;;  %v4081_v58 = vpop.f32.mrb[50].mxu1  ;;  %v4214_v22 = vmax.f32 %v4213_v2, %v7391_v60  ;;  %v7407_v42 = vadd.f32 %v4077_v50, %v7034_v7 }
 0x2f7   : > { %v4198_v57 = vmax.f32 %v4197_v56, %v7385_v55  ;;  %v7399_v48 = vadd.f32 %v3772_v30, %v6996_v5  ;;  %v3774_v61 = vpop.f32.mrb[51].mxu0  ;;  %4184 = vmax.xlane.f32.xlu0 %v4183_v21  ;;  %v4192_v40 = vmax.f32 %v4191_v53, %v7382_v37  ;;  %v4083_v26 = vpop.f32.mrb[51].mxu1  ;;  %v8515_v30 = vld [vmem:[#allocation13_spill] sm:$0xff]  ;;  %v7416_v21 = vadd.f32 %v4079_v1, %v7047_v14 }
 0x2f8   : > { %v7404_v4 = vadd.f32 %v3774_v61, %v7017_v13  ;;  %v7413_v0 = vadd.f32 %v8515_v30, %v6990_v19  ;;  %v7419_v2 = vadd.f32 %v4081_v58, %v7034_v7 }
 0x2f9   : > { %v4199_v41 = vmax.f32 %v4198_v57, %v7394_v59  ;;  %v4207_v56 = vmax.f32 %v4206_v47, %v7399_v48  ;;  %4193 = vmax.xlane.f32.xlu1 %v4192_v40  ;;  %v7425_v47 = vadd.f32 %v4083_v26, %v7047_v14 }
 0x2fa   : > { %8514 = vst [vmem:[#allocation66_spill] sm:$0xff] %v7404_v4  ;;  %8516 = vst [vmem:[#allocation13_spill] sm:$0xff] %v7413_v0  ;;  %v4215_v61 = vmax.f32 %v4214_v22, %v7413_v0 }
 0x2fb   : > { %8517 = vst [vmem:[#allocation67_spill] sm:$0xff] %v7419_v2  ;;  %v4208_v53 = vmax.f32 %v4207_v56, %v7404_v4  ;;  %v4200_v50 = vmax.f32 %v4199_v41, %v7407_v42  ;;  %8518 = vst [vmem:[#allocation68_spill] sm:$0xff] %v7425_v47 }
 0x2fc   : > { %v3778_v57 = vpop.f32.mrb[52].mxu0  ;;  %v4087_v19 = vpop.f32.mrb[52].mxu1 }
 0x2fd   : > { %v7428_v40 = vadd.f32 %v3778_v57, %v6996_v5  ;;  %v3780_v30 = vpop.f32.mrb[53].mxu0  ;;  %v4201_v1 = vmax.f32 %v4200_v50, %v7416_v21  ;;  %v4209_v58 = vmax.f32 %v4208_v53, %v7419_v2  ;;  %v4089_v56 = vpop.f32.mrb[53].mxu1  ;;  %v7438_v57 = vadd.f32 %v4087_v19, %v7034_v7  ;;  %v8524_v7 = vld [vmem:[#allocation15_spill] sm:$0xff]  ;;  %v8525_v19 = vld [vmem:[#allocation16_spill] sm:$0xff] }
 0x2fe   : > { %v7433_v60 = vadd.f32 %v3780_v30, %v7017_v13  ;;  %v3782_v41 = vpop.f32.mrb[54].mxu0  ;;  %v4091_v0 = vpop.f32.mrb[54].mxu1  ;;  %v7442_v53 = vadd.f32 %v4089_v56, %v7047_v14 }
 0x2ff   : > { %8519 = vst [vmem:[#allocation69_spill] sm:$0xff] %v7428_v40  ;;  %v4216_v22 = vmax.f32 %v4215_v61, %v7428_v40  ;;  %v3784_v4 = vpop.f32.mrb[55].mxu0  ;;  %4202 = vmax.xlane.f32.xlu0 %v4201_v1  ;;  %v4210_v26 = vmax.f32 %v4209_v58, %v7425_v47  ;;  %v4093_v5 = vpop.f32.mrb[55].mxu1  ;;  %8521 = vst [vmem:[#allocation71_spill] sm:$0xff] %v7438_v57  ;;  %v8523_v0 = vlaneseq  ;;  %v8532_v40 = vld [vmem:[#allocation21_spill] sm:$0xff]  ;;  %v8533_v47 = vld [vmem:[#allocation22_spill] sm:$0xff] }
 0x300   : > { %8520 = vst [vmem:[#allocation70_spill] sm:$0xff] %v7433_v60  ;;  %8522 = vst [vmem:[#allocation72_spill] sm:$0xff] %v7442_v53 }
 0x301   : > { %v4217_v50 = vmax.f32 %v4216_v22, %v7433_v60  ;;  %4211 = vmax.xlane.f32.xlu1 %v4210_v26  ;;  %v7447_v4 = vand.u32 127, %v8523_v0  ;;  %v8526_v22 = vld [vmem:[#allocation19_spill] sm:$0xff]  ;;  %v8527_v0 = vld [vmem:[#allocation17_spill] sm:$0xff] }
 0x302   : > { %v8531_v60 = vld [vmem:[#allocation27_spill] sm:$0xff] }
 0x303   : > { %v4218_v13 = vmax.f32 %v4217_v50, %v7438_v57  ;;  %v7450_v61 = vadd.s32 128, %v7447_v4  ;;  %v7455_v58 = vadd.s32 256, %v7447_v4  ;;  %v7458_v14 = vadd.s32 384, %v7447_v4 }
 0x304   : > { %v7461_v56 = vadd.s32 512, %v7447_v4  ;;  %v7464_v41 = vadd.s32 640, %v7447_v4 }
 0x305   : > { %v4219_v30 = vmax.f32 %v4218_v13, %v7442_v53  ;;  %v7470_v13 = vadd.s32 768, %v7447_v4 }
 0x307   : > { %4220 = vmax.xlane.f32.xlu0 %v4219_v30  ;;  %v7473_v30 = vadd.s32 896, %v7447_v4 }
 0x364   : > { %v4113_v1 = vpop.xlane.xlu0 %4112 }
 0x365   : > { %vm4231_vm0 = vcmp.eq.f32.partialorder %v8524_v7, %v4113_v1  ;;  %vm4232_vm1 = vcmp.eq.f32.partialorder %v8525_v19, %v4113_v1  ;;  %vm4233_vm2 = vcmp.eq.f32.partialorder %v8526_v22, %v4113_v1  ;;  %vm4234_vm3 = vcmp.eq.f32.partialorder %v7021_v23, %v4113_v1  ;;  %v8528_v7 = vld [vmem:[#allocation18_spill] sm:$0xff] }
 0x366   : > { %v4343_v26 = vsel %vm4231_vm0, %v7447_v4, 1024  ;;  %v4344_v5 = vsel %vm4232_vm1, %v7450_v61, 1024  ;;  %vm4235_vm4 = vcmp.eq.f32.partialorder %v7032_v29, %v4113_v1  ;;  %vm4236_vm5 = vcmp.eq.f32.partialorder %v7040_v20, %v4113_v1 }
 0x367   : > { %vm4455_vm6 = vcmp.lt.s32.totalorder %v4343_v26, %v4344_v5  ;;  %vm4237_vm9 = vcmp.eq.f32.partialorder %v7069_v3, %v4113_v1  ;;  %vm4238_vm10 = vcmp.eq.f32.partialorder %v7087_v17, %v4113_v1  ;;  %v4345_v19 = vsel %vm4233_vm2, %v7455_v58, 1024 }
 0x368   : > { %v4122_v50 = vpop.xlane.xlu0 %4121  ;;  %v4456_v22 = vsel %vm4455_vm6, %v4343_v26, %v4344_v5  ;;  %v4346_v53 = vsel %vm4234_vm3, %v7458_v14, 1024  ;;  %v4347_v23 = vsel %vm4235_vm4, %v7461_v56, 1024  ;;  %v4348_v20 = vsel %vm4236_vm5, %v7464_v41, 1024  ;;  %v8530_v26 = vld [vmem:[#allocation25_spill] sm:$0xff] }
 0x369   : > { %vm4239_vm7 = vcmp.eq.f32.partialorder %v8527_v0, %v4122_v50  ;;  %vm4240_vm8 = vcmp.eq.f32.partialorder %v8528_v7, %v4122_v50  ;;  %vm4457_vm11 = vcmp.lt.s32.totalorder %v4456_v22, %v4345_v19  ;;  %v8529_v0 = vld [vmem:[#allocation20_spill] sm:$0xff]  ;;  %v4349_v17 = vsel %vm4237_vm9, %v7470_v13, 1024 }
 0x36a   : > { %v4351_v29 = vsel %vm4239_vm7, %v7447_v4, 1024  ;;  %v4458_v57 = vsel %vm4457_vm11, %v4456_v22, %v4345_v19  ;;  %vm4241_vm12 = vcmp.eq.f32.partialorder %v8529_v0, %v4122_v50  ;;  %v4352_v7 = vsel %vm4240_vm8, %v7450_v61, 1024 }
 0x36b   : > { %v4350_v1 = vsel %vm4238_vm10, %v7473_v30, 1024  ;;  %vm4459_vm13 = vcmp.lt.s32.totalorder %v4458_v57, %v4346_v53  ;;  %vm4242_vm14 = vcmp.eq.f32.partialorder %v8530_v26, %v4122_v50  ;;  %vm4243_vm15 = vcmp.eq.f32.partialorder %v8531_v60, %v4122_v50  ;;  %v8534_v60 = vld [vmem:[#allocation26_spill] sm:$0xff] }
 0x36c   : > { %v7489_v3 = vpop.xlane.xlu1 %4130  ;;  %v4460_v5 = vsel %vm4459_vm13, %v4458_v57, %v4346_v53  ;;  %vm4244_vm0 = vcmp.eq.f32.partialorder %v7065_v32, %v4122_v50  ;;  %vm4483_vm1 = vcmp.lt.s32.totalorder %v4351_v29, %v4352_v7  ;;  %vm4245_vm3 = vcmp.eq.f32.partialorder %v7090_v15, %v4122_v50 }
 0x36d   : > { %vm4461_vm2 = vcmp.lt.s32.totalorder %v4460_v5, %v4347_v23  ;;  %v4353_v19 = vsel %vm4241_vm12, %v7455_v58, 1024  ;;  %v4484_v22 = vsel %vm4483_vm1, %v4351_v29, %v4352_v7  ;;  %vm4247_vm5 = vcmp.eq.f32.partialorder %v8532_v40, %v7489_v3 }
 0x36e   : > { %v4462_v0 = vsel %vm4461_vm2, %v4460_v5, %v4347_v23  ;;  %vm4485_vm4 = vcmp.lt.s32.totalorder %v4484_v22, %v4353_v19  ;;  %vm4248_vm6 = vcmp.eq.f32.partialorder %v8533_v47, %v7489_v3  ;;  %vm4246_vm8 = vcmp.eq.f32.partialorder %v7121_v8, %v4122_v50 }
 0x36f   : > { %vm4463_vm7 = vcmp.lt.s32.totalorder %v4462_v0, %v4348_v20  ;;  %v4354_v57 = vsel %vm4242_vm14, %v7458_v14, 1024  ;;  %v4486_v53 = vsel %vm4485_vm4, %v4484_v22, %v4353_v19  ;;  %v4355_v2 = vsel %vm4243_vm15, %v7461_v56, 1024  ;;  %v8535_v22 = vld [vmem:[#allocation31_spill] sm:$0xff] }
 0x370   : > { %v4464_v26 = vsel %vm4463_vm7, %v4462_v0, %v4348_v20  ;;  %v4356_v23 = vsel %vm4244_vm0, %v7464_v41, 1024  ;;  %vm4487_vm9 = vcmp.lt.s32.totalorder %v4486_v53, %v4354_v57  ;;  %v4359_v47 = vsel %vm4247_vm5, %v7447_v4, 1024  ;;  %v7517_v5 = vpop.xlane.xlu1 %4139 }
 0x371   : > { %vm4465_vm10 = vcmp.lt.s32.totalorder %v4464_v26, %v4349_v17  ;;  %v4488_v40 = vsel %vm4487_vm9, %v4486_v53, %v4354_v57  ;;  %v4360_v29 = vsel %vm4248_vm6, %v7450_v61, 1024  ;;  %v4357_v20 = vsel %vm4245_vm3, %v7470_v13, 1024 }
 0x372   : > { %v4466_v7 = vsel %vm4465_vm10, %v4464_v26, %v4349_v17  ;;  %vm4489_vm11 = vcmp.lt.s32.totalorder %v4488_v40, %v4355_v2  ;;  %vm4249_vm12 = vcmp.eq.f32.partialorder %v8534_v60, %v7489_v3  ;;  %v4358_v32 = vsel %vm4246_vm8, %v7473_v30, 1024 }
 0x373   : > { %vm4467_vm13 = vcmp.lt.s32.totalorder %v4466_v7, %v4350_v1  ;;  %v4490_v19 = vsel %vm4489_vm11, %v4488_v40, %v4355_v2  ;;  %vm4250_vm14 = vcmp.eq.f32.partialorder %v8535_v22, %v7489_v3  ;;  %vm4251_vm0 = vcmp.eq.f32.partialorder %v7102_v63, %v7489_v3  ;;  %v8536_v2 = vld [vmem:[#allocation23_spill] sm:$0xff]  ;;  %v8537_v40 = vld [vmem:[#allocation24_spill] sm:$0xff]  ;;  %v8539_v22 = vld [vmem:[#allocation34_spill] sm:$0xff] }
 0x374   : > { %v7524_v17 = vsel %vm4467_vm13, %v4466_v7, %v4350_v1  ;;  %vm4491_vm15 = vcmp.lt.s32.totalorder %v4490_v19, %v4356_v23  ;;  %vm4511_vm1 = vcmp.lt.s32.totalorder %v4359_v47, %v4360_v29  ;;  %v4361_v57 = vsel %vm4249_vm12, %v7455_v58, 1024  ;;  %v7560_v63 = vpop.xlane.xlu0 %4148 }
 0x375   : > { %v4470_v15 = vshra.s32 %v7524_v17, 16  ;;  %v4492_v0 = vsel %vm4491_vm15, %v4490_v19, %v4356_v23  ;;  %v4512_v53 = vsel %vm4511_vm1, %v4359_v47, %v4360_v29  ;;  %v4362_v8 = vsel %vm4250_vm14, %v7458_v14, 1024 }
 0x376   : > { %vm4493_vm2 = vcmp.lt.s32.totalorder %v4492_v0, %v4357_v20  ;;  %vm4513_vm3 = vcmp.lt.s32.totalorder %v4512_v53, %v4361_v57  ;;  %vm4255_vm4 = vcmp.eq.f32.partialorder %v8536_v2, %v7517_v5  ;;  %vm4256_vm5 = vcmp.eq.f32.partialorder %v8537_v40, %v7517_v5  ;;  %v8541_v2 = vld [vmem:[#allocation30_spill] sm:$0xff] }
 0x377   : > { %v7533_v50 = vcvt.s32.f32 %v4470_v15  ;;  %v4494_v1 = vsel %vm4493_vm2, %v4492_v0, %v4357_v20  ;;  %v4514_v26 = vsel %vm4513_vm3, %v4512_v53, %v4361_v57  ;;  %vm4252_vm7 = vcmp.eq.f32.partialorder %v7114_v27, %v7489_v3 }
 0x378   : > { %vm4495_vm6 = vcmp.lt.s32.totalorder %v4494_v1, %v4358_v32  ;;  %vm4253_vm8 = vcmp.eq.f32.partialorder %v7140_v16, %v7489_v3  ;;  %vm4515_vm9 = vcmp.lt.s32.totalorder %v4514_v26, %v4362_v8  ;;  %vm4254_vm10 = vcmp.eq.f32.partialorder %v7159_v35, %v7489_v3 }
 0x379   : > { %4473 = vmin.xlane.f32.xlu1 %v7533_v50  ;;  %v7542_v23 = vsel %vm4495_vm6, %v4494_v1, %v4358_v32  ;;  %v4363_v47 = vsel %vm4251_vm0, %v7461_v56, 1024  ;;  %v4516_v29 = vsel %vm4515_vm9, %v4514_v26, %v4362_v8  ;;  %v4367_v27 = vsel %vm4255_vm4, %v7447_v4, 1024  ;;  %v8538_v32 = vld [vmem:[#allocation28_spill] sm:$0xff]  ;;  %v8540_v8 = vld [vmem:[#allocation29_spill] sm:$0xff] }
 0x37a   : > { %v4498_v7 = vshra.s32 %v7542_v23, 16  ;;  %vm4517_vm11 = vcmp.lt.s32.totalorder %v4516_v29, %v4363_v47  ;;  %v4368_v16 = vsel %vm4256_vm5, %v7450_v61, 1024  ;;  %v4364_v20 = vsel %vm4252_vm7, %v7464_v41, 1024 }
 0x37b   : > { %v4365_v35 = vsel %vm4253_vm8, %v7470_v13, 1024  ;;  %v4518_v60 = vsel %vm4517_vm11, %v4516_v29, %v4363_v47  ;;  %vm4257_vm12 = vcmp.eq.f32.partialorder %v8538_v32, %v7517_v5  ;;  %v4366_v19 = vsel %vm4254_vm10, %v7473_v30, 1024  ;;  %v8542_v29 = vld [vmem:[#allocation35_spill] sm:$0xff] }
 0x37c   : > { %v7562_v3 = vcvt.s32.f32 %v4498_v7  ;;  %vm4519_vm13 = vcmp.lt.s32.totalorder %v4518_v60, %v4364_v20  ;;  %vm4258_vm14 = vcmp.eq.f32.partialorder %v8539_v22, %v7517_v5  ;;  %vm4259_vm15 = vcmp.eq.f32.partialorder %v7125_v34, %v7517_v5  ;;  %v8543_v22 = vld [vmem:[#allocation39_spill] sm:$0xff] }
 0x37d   : > { %v4520_v15 = vsel %vm4519_vm13, %v4518_v60, %v4364_v20  ;;  %vm4260_vm0 = vcmp.eq.f32.partialorder %v7137_v25, %v7517_v5  ;;  %vm4539_vm1 = vcmp.lt.s32.totalorder %v4367_v27, %v4368_v16  ;;  %vm4261_vm3 = vcmp.eq.f32.partialorder %v7162_v28, %v7517_v5  ;;  %v7596_v20 = vpop.xlane.xlu1 %4157 }
 0x37e   : > { %4501 = vmin.xlane.f32.xlu0 %v7562_v3  ;;  %vm4521_vm2 = vcmp.lt.s32.totalorder %v4520_v15, %v4365_v35  ;;  %v4369_v0 = vsel %vm4257_vm12, %v7455_v58, 1024  ;;  %v4540_v57 = vsel %vm4539_vm1, %v4367_v27, %v4368_v16  ;;  %vm4263_vm5 = vcmp.eq.f32.partialorder %v8540_v8, %v7560_v63 }
 0x37f   : > { %v4522_v53 = vsel %vm4521_vm2, %v4520_v15, %v4365_v35  ;;  %vm4541_vm4 = vcmp.lt.s32.totalorder %v4540_v57, %v4369_v0  ;;  %vm4264_vm6 = vcmp.eq.f32.partialorder %v8541_v2, %v7560_v63  ;;  %vm4262_vm8 = vcmp.eq.f32.partialorder %v7193_v18, %v7517_v5  ;;  %v8544_v15 = vld [vmem:[#allocation32_spill] sm:$0xff] }
 0x380   : > { %vm4523_vm7 = vcmp.lt.s32.totalorder %v4522_v53, %v4366_v19  ;;  %v4370_v1 = vsel %vm4258_vm14, %v7458_v14, 1024  ;;  %v4542_v26 = vsel %vm4541_vm4, %v4540_v57, %v4369_v0  ;;  %v4371_v47 = vsel %vm4259_vm15, %v7461_v56, 1024  ;;  %v8545_v0 = vld [vmem:[#allocation33_spill] sm:$0xff] }
 0x381   : > { %v7585_v40 = vsel %vm4523_vm7, %v4522_v53, %v4366_v19  ;;  %vm4543_vm9 = vcmp.lt.s32.totalorder %v4542_v26, %v4370_v1  ;;  %vm4265_vm10 = vcmp.eq.f32.partialorder %v8542_v29, %v7560_v63  ;;  %v4375_v27 = vsel %vm4263_vm5, %v7447_v4, 1024 }
 0x382   : > { %v4526_v7 = vshra.s32 %v7585_v40, 16  ;;  %v4544_v18 = vsel %vm4543_vm9, %v4542_v26, %v4370_v1  ;;  %v4376_v16 = vsel %vm4264_vm6, %v7450_v61, 1024  ;;  %v4372_v35 = vsel %vm4260_vm0, %v7464_v41, 1024 }
 0x383   : > { %v4373_v34 = vsel %vm4261_vm3, %v7470_v13, 1024  ;;  %v4374_v60 = vsel %vm4262_vm8, %v7473_v30, 1024  ;;  %vm4545_vm11 = vcmp.lt.s32.totalorder %v4544_v18, %v4371_v47  ;;  %vm4266_vm12 = vcmp.eq.f32.partialorder %v8543_v22, %v7560_v63 }
 0x384   : > { %v7607_v32 = vcvt.s32.f32 %v4526_v7  ;;  %v4546_v19 = vsel %vm4545_vm11, %v4544_v18, %v4371_v47  ;;  %vm4267_vm13 = vcmp.eq.f32.partialorder %v7174_v12, %v7560_v63  ;;  %vm4268_vm15 = vcmp.eq.f32.partialorder %v7186_v31, %v7560_v63  ;;  %v8546_v18 = vld [vmem:[#allocation36_spill] sm:$0xff] }
 0x385   : > { %vm4547_vm14 = vcmp.lt.s32.totalorder %v4546_v19, %v4372_v35  ;;  %v4377_v25 = vsel %vm4265_vm10, %v7455_v58, 1024  ;;  %vm4567_vm0 = vcmp.lt.s32.totalorder %v4375_v27, %v4376_v16  ;;  %vm4271_vm1 = vcmp.eq.f32.partialorder %v8544_v15, %v7596_v20 }
 0x386   : > { %4529 = vmin.xlane.f32.xlu1 %v7607_v32  ;;  %v4548_v28 = vsel %vm4547_vm14, %v4546_v19, %v4372_v35  ;;  %v4568_v5 = vsel %vm4567_vm0, %v4375_v27, %v4376_v16  ;;  %vm4272_vm2 = vcmp.eq.f32.partialorder %v8545_v0, %v7596_v20  ;;  %vm4269_vm4 = vcmp.eq.f32.partialorder %v7212_v51, %v7560_v63  ;;  %v8547_v16 = vld [vmem:[#allocation42_spill] sm:$0xff]  ;;  %v7653_v35 = vpop.xlane.xlu0 %4166 }
 0x387   : > { %vm4549_vm3 = vcmp.lt.s32.totalorder %v4548_v28, %v4373_v34  ;;  %vm4270_vm5 = vcmp.eq.f32.partialorder %v7231_v45, %v7560_v63  ;;  %vm4569_vm6 = vcmp.lt.s32.totalorder %v4568_v5, %v4377_v25  ;;  %v4378_v53 = vsel %vm4266_vm12, %v7458_v14, 1024  ;;  %v8548_v63 = vld [vmem:[#allocation37_spill] sm:$0xff] }
 0x388   : > { %v4550_v57 = vsel %vm4549_vm3, %v4548_v28, %v4373_v34  ;;  %v4379_v8 = vsel %vm4267_vm13, %v7461_v56, 1024  ;;  %v4570_v2 = vsel %vm4569_vm6, %v4568_v5, %v4377_v25  ;;  %v4383_v1 = vsel %vm4271_vm1, %v7447_v4, 1024  ;;  %v8549_v28 = vld [vmem:[#allocation38_spill] sm:$0xff] }
 0x389   : > { %vm4551_vm7 = vcmp.lt.s32.totalorder %v4550_v57, %v4374_v60  ;;  %vm4571_vm8 = vcmp.lt.s32.totalorder %v4570_v2, %v4378_v53  ;;  %v4384_v26 = vsel %vm4272_vm2, %v7450_v61, 1024  ;;  %v4380_v29 = vsel %vm4268_vm15, %v7464_v41, 1024 }
 0x38a   : > { %v7638_v47 = vsel %vm4551_vm7, %v4550_v57, %v4374_v60  ;;  %v4572_v7 = vsel %vm4571_vm8, %v4570_v2, %v4378_v53  ;;  %vm4273_vm9 = vcmp.eq.f32.partialorder %v8546_v18, %v7596_v20  ;;  %v4381_v27 = vsel %vm4269_vm4, %v7470_v13, 1024 }
 0x38b   : > { %v4554_v12 = vshra.s32 %v7638_v47, 16  ;;  %vm4573_vm10 = vcmp.lt.s32.totalorder %v4572_v7, %v4379_v8  ;;  %vm4274_vm11 = vcmp.eq.f32.partialorder %v8547_v16, %v7596_v20  ;;  %v4382_v31 = vsel %vm4270_vm5, %v7473_v30, 1024  ;;  %v8552_v16 = vld [vmem:[#allocation40_spill] sm:$0xff] }
 0x38c   : > { %v4574_v34 = vsel %vm4573_vm10, %v4572_v7, %v4379_v8  ;;  %vm4275_vm12 = vcmp.eq.f32.partialorder %v7197_v44, %v7596_v20  ;;  %vm4595_vm13 = vcmp.lt.s32.totalorder %v4383_v1, %v4384_v26  ;;  %v4385_v51 = vsel %vm4273_vm9, %v7455_v58, 1024  ;;  %v7689_v44 = vpop.xlane.xlu1 %4175 }
 0x38d   : > { %v7661_v60 = vcvt.s32.f32 %v4554_v12  ;;  %vm4575_vm14 = vcmp.lt.s32.totalorder %v4574_v34, %v4380_v29  ;;  %v4596_v19 = vsel %vm4595_vm13, %v4383_v1, %v4384_v26  ;;  %vm4276_vm15 = vcmp.eq.f32.partialorder %v7209_v39, %v7596_v20  ;;  %v8550_v1 = vld [vmem:[#allocation43_spill] sm:$0xff] }
 0x38e   : > { %v4576_v22 = vsel %vm4575_vm14, %v4574_v34, %v4380_v29  ;;  %v4386_v25 = vsel %vm4274_vm11, %v7458_v14, 1024  ;;  %vm4597_vm0 = vcmp.lt.s32.totalorder %v4596_v19, %v4385_v51  ;;  %vm4279_vm2 = vcmp.eq.f32.partialorder %v8548_v63, %v7653_v35  ;;  %v8551_v26 = vld [vmem:[#allocation47_spill] sm:$0xff] }
 0x38f   : > { %4557 = vmin.xlane.f32.xlu0 %v7661_v60  ;;  %vm4577_vm1 = vcmp.lt.s32.totalorder %v4576_v22, %v4381_v27  ;;  %v4598_v45 = vsel %vm4597_vm0, %v4596_v19, %v4385_v51  ;;  %vm4280_vm3 = vcmp.eq.f32.partialorder %v8549_v28, %v7653_v35  ;;  %vm4277_vm4 = vcmp.eq.f32.partialorder %v7234_v10, %v7596_v20 }
 0x390   : > { %v4578_v5 = vsel %vm4577_vm1, %v4576_v22, %v4381_v27  ;;  %vm4278_vm5 = vcmp.eq.f32.partialorder %v7246_v49, %v7596_v20  ;;  %vm4599_vm6 = vcmp.lt.s32.totalorder %v4598_v45, %v4386_v25  ;;  %v4387_v39 = vsel %vm4275_vm12, %v7461_v56, 1024 }
 0x391   : > { %vm4579_vm7 = vcmp.lt.s32.totalorder %v4578_v5, %v4382_v31  ;;  %v4388_v15 = vsel %vm4276_vm15, %v7464_v41, 1024  ;;  %v4600_v0 = vsel %vm4599_vm6, %v4598_v45, %v4386_v25  ;;  %v4391_v53 = vsel %vm4279_vm2, %v7447_v4, 1024  ;;  %v8554_v25 = vld [vmem:[#allocation44_spill] sm:$0xff] }
 0x392   : > { %v7681_v57 = vsel %vm4579_vm7, %v4578_v5, %v4382_v31  ;;  %vm4601_vm8 = vcmp.lt.s32.totalorder %v4600_v0, %v4387_v39  ;;  %v4392_v10 = vsel %vm4280_vm3, %v7450_v61, 1024  ;;  %v4389_v49 = vsel %vm4277_vm4, %v7470_v13, 1024  ;;  %v8553_v31 = vld [vmem:[#allocation41_spill] sm:$0xff]  ;;  %v7725_v5 = vpop.xlane.xlu0 %4184 }
 0x393   : > { %v4582_v8 = vshra.s32 %v7681_v57, 16  ;;  %v4602_v2 = vsel %vm4601_vm8, %v4600_v0, %v4387_v39  ;;  %vm4281_vm9 = vcmp.eq.f32.partialorder %v8550_v1, %v7653_v35  ;;  %v4390_v20 = vsel %vm4278_vm5, %v7473_v30, 1024 }
 0x394   : > { %vm4603_vm10 = vcmp.lt.s32.totalorder %v4602_v2, %v4388_v15  ;;  %vm4282_vm11 = vcmp.eq.f32.partialorder %v8551_v26, %v7653_v35  ;;  %vm4283_vm12 = vcmp.eq.f32.partialorder %v7249_v36, %v7653_v35  ;;  %vm4284_vm13 = vcmp.eq.f32.partialorder %v7261_v33, %v7653_v35 }
 0x395   : > { %v7696_v29 = vcvt.s32.f32 %v4582_v8  ;;  %v4604_v7 = vsel %vm4603_vm10, %v4602_v2, %v4388_v15  ;;  %vm4623_vm14 = vcmp.lt.s32.totalorder %v4391_v53, %v4392_v10  ;;  %vm4285_vm0 = vcmp.eq.f32.partialorder %v7285_v24, %v7653_v35  ;;  %v8556_v8 = vld [vmem:[#allocation45_spill] sm:$0xff] }
 0x396   : > { %vm4605_vm15 = vcmp.lt.s32.totalorder %v4604_v7, %v4389_v49  ;;  %v4393_v18 = vsel %vm4281_vm9, %v7455_v58, 1024  ;;  %v4624_v12 = vsel %vm4623_vm14, %v4391_v53, %v4392_v10  ;;  %vm4287_vm2 = vcmp.eq.f32.partialorder %v8552_v16, %v7689_v44  ;;  %v8555_v10 = vld [vmem:[#allocation50_spill] sm:$0xff] }
 0x397   : > { %4585 = vmin.xlane.f32.xlu1 %v7696_v29  ;;  %v4606_v27 = vsel %vm4605_vm15, %v4604_v7, %v4389_v49  ;;  %vm4625_vm1 = vcmp.lt.s32.totalorder %v4624_v12, %v4393_v18  ;;  %vm4288_vm3 = vcmp.eq.f32.partialorder %v8553_v31, %v7689_v44  ;;  %vm4286_vm5 = vcmp.eq.f32.partialorder %v7303_v9, %v7653_v35  ;;  %v8557_v49 = vld [vmem:[#allocation46_spill] sm:$0xff]  ;;  %v8558_v31 = vld [vmem:[#allocation51_spill] sm:$0xff] }
 0x398   : > { %vm4607_vm4 = vcmp.lt.s32.totalorder %v4606_v27, %v4390_v20  ;;  %v4394_v34 = vsel %vm4282_vm11, %v7458_v14, 1024  ;;  %v4626_v51 = vsel %vm4625_vm1, %v4624_v12, %v4393_v18  ;;  %v4395_v22 = vsel %vm4283_vm12, %v7461_v56, 1024 }
 0x399   : > { %v7714_v19 = vsel %vm4607_vm4, %v4606_v27, %v4390_v20  ;;  %vm4627_vm6 = vcmp.lt.s32.totalorder %v4626_v51, %v4394_v34  ;;  %vm4289_vm7 = vcmp.eq.f32.partialorder %v8554_v25, %v7689_v44  ;;  %v4399_v63 = vsel %vm4287_vm2, %v7447_v4, 1024 }
 0x39a   : > { %v4610_v45 = vshra.s32 %v7714_v19, 16  ;;  %v4628_v9 = vsel %vm4627_vm6, %v4626_v51, %v4394_v34  ;;  %v4400_v28 = vsel %vm4288_vm3, %v7450_v61, 1024  ;;  %v4396_v39 = vsel %vm4284_vm13, %v7464_v41, 1024  ;;  %v8559_v51 = vld [vmem:[#allocation55_spill] sm:$0xff] }
 0x39b   : > { %v4397_v36 = vsel %vm4285_vm0, %v7470_v13, 1024  ;;  %v4398_v15 = vsel %vm4286_vm5, %v7473_v30, 1024  ;;  %vm4629_vm8 = vcmp.lt.s32.totalorder %v4628_v9, %v4395_v22  ;;  %vm4290_vm9 = vcmp.eq.f32.partialorder %v8555_v10, %v7689_v44 }
 0x39c   : > { %v7736_v0 = vcvt.s32.f32 %v4610_v45  ;;  %v4630_v53 = vsel %vm4629_vm8, %v4628_v9, %v4395_v22  ;;  %vm4291_vm10 = vcmp.eq.f32.partialorder %v7269_v54, %v7689_v44  ;;  %vm4292_vm12 = vcmp.eq.f32.partialorder %v7282_v38, %v7689_v44  ;;  %v7782_v22 = vpop.xlane.xlu1 %4193 }
 0x39d   : > { %vm4631_vm11 = vcmp.lt.s32.totalorder %v4630_v53, %v4396_v39  ;;  %v4401_v24 = vsel %vm4289_vm7, %v7455_v58, 1024  ;;  %vm4651_vm13 = vcmp.lt.s32.totalorder %v4399_v63, %v4400_v28  ;;  %vm4295_vm14 = vcmp.eq.f32.partialorder %v8556_v8, %v7725_v5  ;;  %v8562_v8 = vld [vmem:[#allocation52_spill] sm:$0xff] }
 0x39e   : > { %4613 = vmin.xlane.f32.xlu0 %v7736_v0  ;;  %v4632_v33 = vsel %vm4631_vm11, %v4630_v53, %v4396_v39  ;;  %v4652_v35 = vsel %vm4651_vm13, %v4399_v63, %v4400_v28  ;;  %vm4296_vm15 = vcmp.eq.f32.partialorder %v8557_v49, %v7725_v5  ;;  %vm4293_vm1 = vcmp.eq.f32.partialorder %v7306_v52, %v7689_v44  ;;  %v8561_v39 = vld [vmem:[#allocation49_spill] sm:$0xff]  ;;  %v8563_v49 = vld [vmem:[#allocation58_spill] sm:$0xff] }
 0x39f   : > { %vm4633_vm0 = vcmp.lt.s32.totalorder %v4632_v33, %v4397_v36  ;;  %vm4294_vm2 = vcmp.eq.f32.partialorder %v7318_v43, %v7689_v44  ;;  %vm4653_vm3 = vcmp.lt.s32.totalorder %v4652_v35, %v4401_v24  ;;  %v4402_v1 = vsel %vm4290_vm9, %v7458_v14, 1024  ;;  %v8560_v44 = vld [vmem:[#allocation48_spill] sm:$0xff] }
 0x3a0   : > { %v4634_v2 = vsel %vm4633_vm0, %v4632_v33, %v4397_v36  ;;  %v4403_v20 = vsel %vm4291_vm10, %v7461_v56, 1024  ;;  %v4654_v26 = vsel %vm4653_vm3, %v4652_v35, %v4401_v24  ;;  %v4407_v7 = vsel %vm4295_vm14, %v7447_v4, 1024 }
 0x3a1   : > { %vm4635_vm4 = vcmp.lt.s32.totalorder %v4634_v2, %v4398_v15  ;;  %vm4655_vm5 = vcmp.lt.s32.totalorder %v4654_v26, %v4402_v1  ;;  %v4408_v18 = vsel %vm4296_vm15, %v7450_v61, 1024  ;;  %v4404_v27 = vsel %vm4292_vm12, %v7464_v41, 1024 }
 0x3a2   : > { %v7767_v12 = vsel %vm4635_vm4, %v4634_v2, %v4398_v15  ;;  %v4656_v16 = vsel %vm4655_vm5, %v4654_v26, %v4402_v1  ;;  %vm4297_vm6 = vcmp.eq.f32.partialorder %v8558_v31, %v7725_v5  ;;  %v4405_v34 = vsel %vm4293_vm1, %v7470_v13, 1024  ;;  %v8564_v2 = vld [vmem:[#allocation61_spill] sm:$0xff]  ;;  %v8565_v26 = vld [vmem:[#allocation64_spill] sm:$0xff] }
 0x3a3   : > { %v4638_v54 = vshra.s32 %v7767_v12, 16  ;;  %vm4657_vm7 = vcmp.lt.s32.totalorder %v4656_v16, %v4403_v20  ;;  %vm4298_vm8 = vcmp.eq.f32.partialorder %v8559_v51, %v7725_v5  ;;  %v4406_v38 = vsel %vm4294_vm2, %v7473_v30, 1024  ;;  %v8567_v31 = vld [vmem:[#allocation53_spill] sm:$0xff] }
 0x3a4   : > { %v4658_v25 = vsel %vm4657_vm7, %v4656_v16, %v4403_v20  ;;  %vm4299_vm9 = vcmp.eq.f32.partialorder %v7321_v46, %v7725_v5  ;;  %vm4679_vm10 = vcmp.lt.s32.totalorder %v4407_v7, %v4408_v18  ;;  %v4409_v52 = vsel %vm4297_vm6, %v7455_v58, 1024  ;;  %v7818_v46 = vpop.xlane.xlu0 %4202 }
 0x3a5   : > { %v7790_v45 = vcvt.s32.f32 %v4638_v54  ;;  %vm4659_vm11 = vcmp.lt.s32.totalorder %v4658_v25, %v4404_v27  ;;  %v4680_v9 = vsel %vm4679_vm10, %v4407_v7, %v4408_v18  ;;  %vm4300_vm12 = vcmp.eq.f32.partialorder %v7333_v11, %v7725_v5  ;;  %v8566_v7 = vld [vmem:[#allocation65_spill] sm:$0xff]  ;;  %v8568_v54 = vld [vmem:[#allocation54_spill] sm:$0xff] }
 0x3a6   : > { %v4660_v63 = vsel %vm4659_vm11, %v4658_v25, %v4404_v27  ;;  %v4410_v28 = vsel %vm4298_vm8, %v7458_v14, 1024  ;;  %vm4681_vm13 = vcmp.lt.s32.totalorder %v4680_v9, %v4409_v52  ;;  %vm4303_vm15 = vcmp.eq.f32.partialorder %v8560_v44, %v7782_v22  ;;  %v7854_v44 = vpop.xlane.xlu1 %4211 }
 0x3a7   : > { %4641 = vmin.xlane.f32.xlu1 %v7790_v45  ;;  %vm4661_vm14 = vcmp.lt.s32.totalorder %v4660_v63, %v4405_v34  ;;  %v4682_v43 = vsel %vm4681_vm13, %v4680_v9, %v4409_v52  ;;  %vm4304_vm0 = vcmp.eq.f32.partialorder %v8561_v39, %v7782_v22  ;;  %vm4301_vm1 = vcmp.eq.f32.partialorder %v7357_v62, %v7725_v5  ;;  %v8569_v52 = vld [vmem:[#allocation59_spill] sm:$0xff] }
 0x3a8   : > { %v4662_v36 = vsel %vm4661_vm14, %v4660_v63, %v4405_v34  ;;  %vm4302_vm2 = vcmp.eq.f32.partialorder %v7367_v6, %v7725_v5  ;;  %vm4683_vm3 = vcmp.lt.s32.totalorder %v4682_v43, %v4410_v28  ;;  %v4411_v11 = vsel %vm4299_vm9, %v7461_v56, 1024 }
 0x3a9   : > { %vm4663_vm4 = vcmp.lt.s32.totalorder %v4662_v36, %v4406_v38  ;;  %v4412_v15 = vsel %vm4300_vm12, %v7464_v41, 1024  ;;  %v4684_v53 = vsel %vm4683_vm3, %v4682_v43, %v4410_v28  ;;  %v4415_v24 = vsel %vm4303_vm15, %v7447_v4, 1024 }
 0x3aa   : > { %v7810_v10 = vsel %vm4663_vm4, %v4662_v36, %v4406_v38  ;;  %vm4685_vm5 = vcmp.lt.s32.totalorder %v4684_v53, %v4411_v11  ;;  %v4416_v62 = vsel %vm4304_vm0, %v7450_v61, 1024  ;;  %v4413_v6 = vsel %vm4301_vm1, %v7470_v13, 1024 }
 0x3ab   : > { %v4666_v33 = vshra.s32 %v7810_v10, 16  ;;  %v4686_v35 = vsel %vm4685_vm5, %v4684_v53, %v4411_v11  ;;  %vm4305_vm6 = vcmp.eq.f32.partialorder %v8562_v8, %v7782_v22  ;;  %v4414_v5 = vsel %vm4302_vm2, %v7473_v30, 1024  ;;  %v8572_v8 = vld [vmem:[#allocation57_spill] sm:$0xff] }
 0x3ac   : > { %vm4687_vm7 = vcmp.lt.s32.totalorder %v4686_v35, %v4412_v15  ;;  %vm4306_vm8 = vcmp.eq.f32.partialorder %v8563_v49, %v7782_v22  ;;  %vm4307_vm9 = vcmp.eq.f32.partialorder %v8564_v2, %v7782_v22  ;;  %vm4308_vm10 = vcmp.eq.f32.partialorder %v8565_v26, %v7782_v22 }
 0x3ad   : > { %v7825_v1 = vcvt.s32.f32 %v4666_v33  ;;  %v4688_v20 = vsel %vm4687_vm7, %v4686_v35, %v4412_v15  ;;  %vm4707_vm11 = vcmp.lt.s32.totalorder %v4415_v24, %v4416_v62  ;;  %vm4309_vm13 = vcmp.eq.f32.partialorder %v8566_v7, %v7782_v22  ;;  %v8571_v35 = vld [vmem:[#allocation56_spill] sm:$0xff] }
 0x3ae   : > { %vm4689_vm12 = vcmp.lt.s32.totalorder %v4688_v20, %v4413_v6  ;;  %v4417_v18 = vsel %vm4305_vm6, %v7455_v58, 1024  ;;  %v4708_v27 = vsel %vm4707_vm11, %v4415_v24, %v4416_v62  ;;  %vm4311_vm15 = vcmp.eq.f32.partialorder %v8567_v31, %v7818_v46  ;;  %v8570_v24 = vld [vmem:[#allocation10_spill] sm:$0xff]  ;;  %v8573_v7 = vld [vmem:[#allocation60_spill] sm:$0xff] }
 0x3af   : > { %4669 = vmin.xlane.f32.xlu0 %v7825_v1  ;;  %v4690_v16 = vsel %vm4689_vm12, %v4688_v20, %v4413_v6  ;;  %vm4709_vm14 = vcmp.lt.s32.totalorder %v4708_v27, %v4417_v18  ;;  %vm4312_vm0 = vcmp.eq.f32.partialorder %v8568_v54, %v7818_v46  ;;  %vm4310_vm2 = vcmp.eq.f32.partialorder %v7382_v37, %v7782_v22 }
 0x3b0   : > { %vm4691_vm1 = vcmp.lt.s32.totalorder %v4690_v16, %v4414_v5  ;;  %v4418_v34 = vsel %vm4306_vm8, %v7458_v14, 1024  ;;  %v4710_v51 = vsel %vm4709_vm14, %v4708_v27, %v4417_v18  ;;  %v4419_v25 = vsel %vm4307_vm9, %v7461_v56, 1024  ;;  %v8574_v27 = vld [vmem:[#allocation11_spill] sm:$0xff] }
 0x3b1   : > { %v7843_v38 = vsel %vm4691_vm1, %v4690_v16, %v4414_v5  ;;  %vm4711_vm3 = vcmp.lt.s32.totalorder %v4710_v51, %v4418_v34  ;;  %vm4313_vm4 = vcmp.eq.f32.partialorder %v8569_v52, %v7818_v46  ;;  %v4423_v28 = vsel %vm4311_vm15, %v7447_v4, 1024  ;;  %v7897_v16 = vpop.xlane.xlu0 %4220 }
 0x3b2   : > { %v4694_v9 = vshra.s32 %v7843_v38, 16  ;;  %v4712_v63 = vsel %vm4711_vm3, %v4710_v51, %v4418_v34  ;;  %v4424_v43 = vsel %vm4312_vm0, %v7450_v61, 1024  ;;  %v4420_v39 = vsel %vm4308_vm10, %v7464_v41, 1024 }
 0x3b3   : > { %vm4713_vm5 = vcmp.lt.s32.totalorder %v4712_v63, %v4419_v25  ;;  %v4421_v11 = vsel %vm4309_vm13, %v7470_v13, 1024  ;;  %v4422_v15 = vsel %vm4310_vm2, %v7473_v30, 1024  ;;  %vm4314_vm7 = vcmp.eq.f32.partialorder %v8570_v24, %v7818_v46 }
 0x3b4   : > { %v7860_v36 = vcvt.s32.f32 %v4694_v9  ;;  %v4714_v53 = vsel %vm4713_vm5, %v4712_v63, %v4419_v25  ;;  %v4425_v62 = vsel %vm4313_vm4, %v7455_v58, 1024  ;;  %vm4735_vm8 = vcmp.lt.s32.totalorder %v4423_v28, %v4424_v43  ;;  %v8575_v63 = vld [vmem:[#allocation62_spill] sm:$0xff] }
 0x3b5   : > { %vm4715_vm6 = vcmp.lt.s32.totalorder %v4714_v53, %v4420_v39  ;;  %v4736_v6 = vsel %vm4735_vm8, %v4423_v28, %v4424_v43  ;;  %vm4319_vm9 = vcmp.eq.f32.partialorder %v8571_v35, %v7854_v44  ;;  %vm4320_vm10 = vcmp.eq.f32.partialorder %v8572_v8, %v7854_v44  ;;  %v8576_v28 = vld [vmem:[#allocation63_spill] sm:$0xff]  ;;  %v8579_v35 = vld [vmem:[#allocation12_spill] sm:$0xff] }
 0x3b6   : > { %4697 = vmin.xlane.f32.xlu1 %v7860_v36  ;;  %v4716_v33 = vsel %vm4715_vm6, %v4714_v53, %v4420_v39  ;;  %vm4315_vm12 = vcmp.eq.f32.partialorder %v7385_v55, %v7818_v46  ;;  %vm4316_vm13 = vcmp.eq.f32.partialorder %v7394_v59, %v7818_v46  ;;  %vm4737_vm14 = vcmp.lt.s32.totalorder %v4736_v6, %v4425_v62  ;;  %v8580_v8 = vld [vmem:[#allocation68_spill] sm:$0xff] }
 0x3b7   : > { %vm4717_vm11 = vcmp.lt.s32.totalorder %v4716_v33, %v4421_v11  ;;  %vm4317_vm15 = vcmp.eq.f32.partialorder %v7407_v42, %v7818_v46  ;;  %v4426_v22 = vsel %vm4314_vm7, %v7458_v14, 1024  ;;  %v4738_v5 = vsel %vm4737_vm14, %v4736_v6, %v4425_v62 }
 0x3b8   : > { %v4718_v37 = vsel %vm4717_vm11, %v4716_v33, %v4421_v11  ;;  %vm4739_vm1 = vcmp.lt.s32.totalorder %v4738_v5, %v4426_v22  ;;  %v4431_v49 = vsel %vm4319_vm9, %v7447_v4, 1024  ;;  %v4432_v2 = vsel %vm4320_vm10, %v7450_v61, 1024  ;;  %v8578_v11 = vld [vmem:[#allocation67_spill] sm:$0xff] }
 0x3b9   : > { %vm4719_vm0 = vcmp.lt.s32.totalorder %v4718_v37, %v4422_v15  ;;  %v4427_v55 = vsel %vm4315_vm12, %v7461_v56, 1024  ;;  %v4740_v26 = vsel %vm4739_vm1, %v4738_v5, %v4426_v22  ;;  %vm4321_vm2 = vcmp.eq.f32.partialorder %v8573_v7, %v7854_v44 }
 0x3ba   : > { %v7887_v20 = vsel %vm4719_vm0, %v4718_v37, %v4422_v15  ;;  %vm4318_vm3 = vcmp.eq.f32.partialorder %v7416_v21, %v7818_v46  ;;  %vm4741_vm4 = vcmp.lt.s32.totalorder %v4740_v26, %v4427_v55  ;;  %vm4322_vm5 = vcmp.eq.f32.partialorder %v8574_v27, %v7854_v44 }
 0x3bb   : > { %v4722_v18 = vshra.s32 %v7887_v20, 16  ;;  %v4428_v31 = vsel %vm4316_vm13, %v7464_v41, 1024  ;;  %v4429_v54 = vsel %vm4317_vm15, %v7470_v13, 1024  ;;  %v4742_v34 = vsel %vm4741_vm4, %v4740_v26, %v4427_v55 }
 0x3bc   : > { %vm4763_vm6 = vcmp.lt.s32.totalorder %v4431_v49, %v4432_v2  ;;  %vm4743_vm7 = vcmp.lt.s32.totalorder %v4742_v34, %v4428_v31  ;;  %v4433_v25 = vsel %vm4321_vm2, %v7455_v58, 1024  ;;  %vm4323_vm8 = vcmp.eq.f32.partialorder %v7399_v48, %v7854_v44  ;;  %v8577_v48 = vld [vmem:[#allocation66_spill] sm:$0xff] }
 0x3bd   : > { %v7907_v51 = vcvt.s32.f32 %v4722_v18  ;;  %v4764_v52 = vsel %vm4763_vm6, %v4431_v49, %v4432_v2  ;;  %v4744_v9 = vsel %vm4743_vm7, %v4742_v34, %v4428_v31  ;;  %v4434_v59 = vsel %vm4322_vm5, %v7458_v14, 1024  ;;  %v8581_v49 = vld [vmem:[#allocation13_spill] sm:$0xff] }
 0x3be   : > { %vm4765_vm9 = vcmp.lt.s32.totalorder %v4764_v52, %v4433_v25  ;;  %vm4745_vm10 = vcmp.lt.s32.totalorder %v4744_v9, %v4429_v54  ;;  %vm4327_vm11 = vcmp.eq.f32.partialorder %v8575_v63, %v7897_v16  ;;  %vm4328_vm12 = vcmp.eq.f32.partialorder %v8576_v28, %v7897_v16  ;;  %v8585_v28 = vld [vmem:[#allocation72_spill] sm:$0xff] }
 0x3bf   : > { %4725 = vmin.xlane.f32.xlu0 %v7907_v51  ;;  %v4766_v42 = vsel %vm4765_vm9, %v4764_v52, %v4433_v25  ;;  %v4430_v43 = vsel %vm4318_vm3, %v7473_v30, 1024  ;;  %v4746_v39 = vsel %vm4745_vm10, %v4744_v9, %v4429_v54  ;;  %vm4324_vm13 = vcmp.eq.f32.partialorder %v8577_v48, %v7854_v44  ;;  %v8583_v54 = vld [vmem:[#allocation70_spill] sm:$0xff]  ;;  %v8584_v9 = vld [vmem:[#allocation71_spill] sm:$0xff] }
 0x3c0   : > { %vm4767_vm14 = vcmp.lt.s32.totalorder %v4766_v42, %v4434_v59  ;;  %vm4747_vm15 = vcmp.lt.s32.totalorder %v4746_v39, %v4430_v43  ;;  %vm4325_vm0 = vcmp.eq.f32.partialorder %v8578_v11, %v7854_v44  ;;  %v4435_v15 = vsel %vm4323_vm8, %v7461_v56, 1024 }
 0x3c1   : > { %v4768_v53 = vsel %vm4767_vm14, %v4766_v42, %v4434_v59  ;;  %v7927_v24 = vsel %vm4747_vm15, %v4746_v39, %v4430_v43  ;;  %v4439_v62 = vsel %vm4327_vm11, %v7447_v4, 1024  ;;  %v4440_v21 = vsel %vm4328_vm12, %v7450_v61, 1024 }
 0x3c2   : > { %vm4769_vm1 = vcmp.lt.s32.totalorder %v4768_v53, %v4435_v15  ;;  %v4750_v46 = vshra.s32 %v7927_v24, 16  ;;  %v4436_v33 = vsel %vm4324_vm13, %v7464_v41, 1024  ;;  %vm4329_vm2 = vcmp.eq.f32.partialorder %v8579_v35, %v7897_v16 }
 0x3c3   : > { %v4770_v6 = vsel %vm4769_vm1, %v4768_v53, %v4435_v15  ;;  %vm4326_vm3 = vcmp.eq.f32.partialorder %v8580_v8, %v7854_v44  ;;  %v4437_v37 = vsel %vm4325_vm0, %v7470_v13, 1024  ;;  %vm4330_vm5 = vcmp.eq.f32.partialorder %v8581_v49, %v7897_v16  ;;  %v8582_v44 = vld [vmem:[#allocation69_spill] sm:$0xff] }
 0x3c4   : > { %vm4771_vm4 = vcmp.lt.s32.totalorder %v4770_v6, %v4436_v33  ;;  %v7938_v22 = vcvt.s32.f32 %v4750_v46  ;;  %vm4791_vm6 = vcmp.lt.s32.totalorder %v4439_v62, %v4440_v21  ;;  %v4441_v2 = vsel %vm4329_vm2, %v7455_v58, 1024 }
 0x3c5   : > { %v4772_v5 = vsel %vm4771_vm4, %v4770_v6, %v4436_v33  ;;  %v4792_v55 = vsel %vm4791_vm6, %v4439_v62, %v4440_v21  ;;  %v4438_v26 = vsel %vm4326_vm3, %v7473_v30, 1024  ;;  %vm4331_vm8 = vcmp.eq.f32.partialorder %v8582_v44, %v7897_v16 }
 0x3c6   : > { %vm4773_vm7 = vcmp.lt.s32.totalorder %v4772_v5, %v4437_v37  ;;  %4753 = vmin.xlane.f32.xlu1 %v7938_v22  ;;  %vm4793_vm9 = vcmp.lt.s32.totalorder %v4792_v55, %v4441_v2  ;;  %v4442_v18 = vsel %vm4330_vm5, %v7458_v14, 1024  ;;  %vm4332_vm11 = vcmp.eq.f32.partialorder %v8583_v54, %v7897_v16 }
 0x3c7   : > { %v4774_v7 = vsel %vm4773_vm7, %v4772_v5, %v4437_v37  ;;  %v4794_v27 = vsel %vm4793_vm9, %v4792_v55, %v4441_v2  ;;  %v4443_v25 = vsel %vm4331_vm8, %v7461_v56, 1024  ;;  %vm4333_vm13 = vcmp.eq.f32.partialorder %v8584_v9, %v7897_v16 }
 0x3c8   : > { %vm4775_vm10 = vcmp.lt.s32.totalorder %v4774_v7, %v4438_v26  ;;  %vm4795_vm12 = vcmp.lt.s32.totalorder %v4794_v27, %v4442_v18  ;;  %v4444_v42 = vsel %vm4332_vm11, %v7464_v41, 1024  ;;  %vm4334_vm15 = vcmp.eq.f32.partialorder %v8585_v28, %v7897_v16 }
 0x3c9   : > { %v7948_v31 = vsel %vm4775_vm10, %v4774_v7, %v4438_v26  ;;  %v4796_v52 = vsel %vm4795_vm12, %v4794_v27, %v4442_v18  ;;  %v4445_v43 = vsel %vm4333_vm13, %v7470_v13, 1024  ;;  %v4446_v48 = vsel %vm4334_vm15, %v7473_v30, 1024 }
 0x3ca   : > { %v4778_v34 = vshra.s32 %v7948_v31, 16  ;;  %vm4797_vm14 = vcmp.lt.s32.totalorder %v4796_v52, %v4443_v25  ;;  %v4469_v16 = vand.u32 65535, %v7524_v17  ;;  %v4497_v33 = vand.u32 65535, %v7542_v23 }
 0x3cb   : > { %v4798_v63 = vsel %vm4797_vm14, %v4796_v52, %v4443_v25  ;;  %v4525_v17 = vand.u32 65535, %v7585_v40  ;;  %v4553_v23 = vand.u32 65535, %v7638_v47  ;;  %v4581_v40 = vand.u32 65535, %v7681_v57 }
 0x3cc   : > { %v7956_v59 = vcvt.s32.f32 %v4778_v34  ;;  %vm4799_vm0 = vcmp.lt.s32.totalorder %v4798_v63, %v4444_v42  ;;  %v4471_v46 = vcvt.s32.f32 %v4469_v16  ;;  %v4499_v8 = vcvt.s32.f32 %v4497_v33 }
 0x3cd   : > { %v4800_v39 = vsel %vm4799_vm0, %v4798_v63, %v4444_v42  ;;  %v4527_v49 = vcvt.s32.f32 %v4525_v17  ;;  %v4555_v55 = vcvt.s32.f32 %v4553_v23  ;;  %v4583_v7 = vcvt.s32.f32 %v4581_v40 }
 0x3ce   : > { %4781 = vmin.xlane.f32.xlu0 %v7956_v59  ;;  %vm4801_vm1 = vcmp.lt.s32.totalorder %v4800_v39, %v4445_v43  ;;  %v4609_v47 = vand.u32 65535, %v7714_v19  ;;  %v4637_v57 = vand.u32 65535, %v7767_v12  ;;  %v4665_v19 = vand.u32 65535, %v7810_v10 }
 0x3cf   : > { %v4802_v11 = vsel %vm4801_vm1, %v4800_v39, %v4445_v43  ;;  %v4693_v12 = vand.u32 65535, %v7843_v38  ;;  %v4721_v10 = vand.u32 65535, %v7887_v20  ;;  %v4749_v38 = vand.u32 65535, %v7927_v24 }
 0x3d0   : > { %vm4803_vm2 = vcmp.lt.s32.totalorder %v4802_v11, %v4446_v48  ;;  %v4611_v18 = vcvt.s32.f32 %v4609_v47  ;;  %v4639_v54 = vcvt.s32.f32 %v4637_v57  ;;  %v4667_v25 = vcvt.s32.f32 %v4665_v19 }
 0x3d1   : > { %v7964_v15 = vsel %vm4803_vm2, %v4802_v11, %v4446_v48  ;;  %v4695_v9 = vcvt.s32.f32 %v4693_v12  ;;  %v4723_v63 = vcvt.s32.f32 %v4721_v10  ;;  %v4751_v43 = vcvt.s32.f32 %v4749_v38 }
 0x3d2   : > { %v4806_v53 = vshra.s32 %v7964_v15, 16  ;;  %v4777_v20 = vand.u32 65535, %v7948_v31  ;;  %v4805_v24 = vand.u32 65535, %v7964_v15 }
 0x3d4   : > { %v7967_v62 = vcvt.s32.f32 %v4806_v53  ;;  %v4779_v48 = vcvt.s32.f32 %v4777_v20  ;;  %v4807_v53 = vcvt.s32.f32 %v4805_v24 }
 0x3d6   : > { %4809 = vmin.xlane.f32.xlu1 %v7967_v62 }
 0x406   : > { %v7971_v21 = vpop.xlane.xlu1 %4473 }
 0x407   : > { %vm4475_vm3 = vcmp.eq.f32.partialorder %v7533_v50, %v7971_v21  ;;  %v4480_v31 = vcvt.f32.s32 %v7971_v21  ;;  %v6550_v21 = vmov 0  }
 0x408   : > { %v4476_v6 = vsel %vm4475_vm3, %v4471_v46, inf }
 0x409   : > { %4477 = vmin.xlane.f32.xlu0 %v4476_v6  ;;  %v4481_v46 = vshll.u32 %v4480_v31, 16 }
 0x40b   : > { %v7976_v35 = vpop.xlane.xlu0 %4501 }
 0x40c   : > { %vm4503_vm4 = vcmp.eq.f32.partialorder %v7562_v3, %v7976_v35  ;;  %v4508_v6 = vcvt.f32.s32 %v7976_v35 }
 0x40d   : > { %v4504_v37 = vsel %vm4503_vm4, %v4499_v8, inf }
 0x40e   : > { %4505 = vmin.xlane.f32.xlu1 %v4504_v37  ;;  %v4509_v37 = vshll.u32 %v4508_v6, 16 }
 0x413   : > { %v7981_v5 = vpop.xlane.xlu1 %4529 }
 0x414   : > { %vm4531_vm5 = vcmp.eq.f32.partialorder %v7607_v32, %v7981_v5 }
 0x415   : > { %v4532_v50 = vsel %vm4531_vm5, %v4527_v49, inf }
 0x416   : > { %4533 = vmin.xlane.f32.xlu0 %v4532_v50 }
 0x41c   : > { %v7986_v2 = vpop.xlane.xlu0 %4557 }
 0x41d   : > { %vm4559_vm6 = vcmp.eq.f32.partialorder %v7661_v60, %v7986_v2  ;;  %v4564_v20 = vcvt.f32.s32 %v7986_v2 }
 0x41e   : > { %v4560_v3 = vsel %vm4559_vm6, %v4555_v55, inf }
 0x41f   : > { %4561 = vmin.xlane.f32.xlu1 %v4560_v3 }
 0x424   : > { %v7991_v26 = vpop.xlane.xlu1 %4585 }
 0x425   : > { %vm4587_vm7 = vcmp.eq.f32.partialorder %v7696_v29, %v7991_v26 }
 0x426   : > { %v4588_v32 = vsel %vm4587_vm7, %v4583_v7, inf }
 0x427   : > { %4589 = vmin.xlane.f32.xlu0 %v4588_v32 }
 0x42b   : > { %v7996_v44 = vpop.xlane.xlu0 %4613 }
 0x42c   : > { %vm4615_vm8 = vcmp.eq.f32.partialorder %v7736_v0, %v7996_v44 }
 0x42d   : > { %v4616_v60 = vsel %vm4615_vm8, %v4611_v18, inf }
 0x42e   : > { %4617 = vmin.xlane.f32.xlu1 %v4616_v60 }
 0x434   : > { %v8001_v27 = vpop.xlane.xlu1 %4641 }
 0x435   : > { %vm4643_vm9 = vcmp.eq.f32.partialorder %v7790_v45, %v8001_v27 }
 0x436   : > { %v4644_v29 = vsel %vm4643_vm9, %v4639_v54, inf }
 0x437   : > { %4645 = vmin.xlane.f32.xlu0 %v4644_v29 }
 0x43c   : > { %v8006_v34 = vpop.xlane.xlu0 %4669 }
 0x43d   : > { %vm4671_vm10 = vcmp.eq.f32.partialorder %v7825_v1, %v8006_v34 }
 0x43e   : > { %v4672_v0 = vsel %vm4671_vm10, %v4667_v25, inf }
 0x43f   : > { %4673 = vmin.xlane.f32.xlu1 %v4672_v0 }
 0x443   : > { %v8011_v52 = vpop.xlane.xlu1 %4697 }
 0x444   : > { %vm4699_vm11 = vcmp.eq.f32.partialorder %v7860_v36, %v8011_v52 }
 0x445   : > { %v4700_v45 = vsel %vm4699_vm11, %v4695_v9, inf }
 0x446   : > { %4701 = vmin.xlane.f32.xlu0 %v4700_v45 }
 0x44c   : > { %v8016_v42 = vpop.xlane.xlu0 %4725 }
 0x44d   : > { %vm4727_vm12 = vcmp.eq.f32.partialorder %v7907_v51, %v8016_v42 }
 0x44e   : > { %v4728_v1 = vsel %vm4727_vm12, %v4723_v63, inf }
 0x44f   : > { %4729 = vmin.xlane.f32.xlu1 %v4728_v1 }
 0x453   : > { %v8021_v28 = vpop.xlane.xlu1 %4753 }
 0x454   : > { %vm4755_vm13 = vcmp.eq.f32.partialorder %v7938_v22, %v8021_v28 }
 0x455   : > { %v4756_v36 = vsel %vm4755_vm13, %v4751_v43, inf }
 0x456   : > { %4757 = vmin.xlane.f32.xlu0 %v4756_v36 }
 0x45b   : > { %v8026_v39 = vpop.xlane.xlu0 %4781 }
 0x45c   : > { %vm4783_vm14 = vcmp.eq.f32.partialorder %v7956_v59, %v8026_v39 }
 0x45d   : > { %v4784_v51 = vsel %vm4783_vm14, %v4779_v48, inf  ;;  %v4592_v48 = vcvt.f32.s32 %v7991_v26 }
 0x45e   : > { %4785 = vmin.xlane.f32.xlu1 %v4784_v51 }
 0x463   : > { %v8031_v11 = vpop.xlane.xlu1 %4809 }
 0x464   : > { %vm4811_vm15 = vcmp.eq.f32.partialorder %v7967_v62, %v8031_v11  ;;  %v4536_v62 = vcvt.f32.s32 %v7981_v5 }
 0x465   : > { %v4812_v22 = vsel %vm4811_vm15, %v4807_v53, inf }
 0x466   : > { %4813 = vmin.xlane.f32.xlu0 %v4812_v22  ;;  %v4537_v38 = vshll.u32 %v4536_v62, 16 }
 0x496   : > { %v4478_v16 = vpop.xlane.xlu0 %4477 }
 0x497   : > { %v4479_v33 = vcvt.f32.s32 %v4478_v16 }
 0x499   : > { %v4482_v59 = vadd.s32 %v4481_v46, %v4479_v33 }
 0x49b   : > { %v4506_v8 = vpop.xlane.xlu1 %4505  ;;  %vm4906_vm0 = vcmp.eq.s32.totalorder %v4482_v59, %v7447_v4  ;;  %vm4907_vm1 = vcmp.eq.s32.totalorder %v4482_v59, %v7450_v61  ;;  %vm4908_vm2 = vcmp.eq.s32.totalorder %v4482_v59, %v7455_v58  ;;  %vm4909_vm3 = vcmp.eq.s32.totalorder %v4482_v59, %v7458_v14 }
 0x49c   : > { %vm4910_vm4 = vcmp.eq.s32.totalorder %v4482_v59, %v7461_v56  ;;  %vm4911_vm5 = vcmp.eq.s32.totalorder %v4482_v59, %v7464_v41  ;;  %vm4912_vm6 = vcmp.eq.s32.totalorder %v4482_v59, %v7470_v13  ;;  %vm4913_vm7 = vcmp.eq.s32.totalorder %v4482_v59, %v7473_v30 }
 0x49d   : > { %v4507_v15 = vcvt.f32.s32 %v4506_v8  ;;  %v5018_v35 = vsel %vm4906_vm0, 1, %v6550_v21  ;;  %v5019_v17 = vsel %vm4907_vm1, 1, %v6550_v21  ;;  %v5020_v49 = vsel %vm4908_vm2, 1, %v6550_v21 }
 0x49e   : > { %v5021_v50 = vsel %vm4909_vm3, 1, %v6550_v21  ;;  %v5022_v55 = vsel %vm4910_vm4, 1, %v6550_v21  ;;  %v5023_v3 = vsel %vm4911_vm5, 1, %v6550_v21  ;;  %v5024_v40 = vsel %vm4912_vm6, 1, %v6550_v21 }
 0x49f   : > { %v4510_v23 = vadd.s32 %v4509_v37, %v4507_v15  ;;  %v5025_v7 = vsel %vm4913_vm7, 1, %v6550_v21 }
 0x4a1   : > { %vm4914_vm8 = vcmp.eq.s32.totalorder %v4510_v23, %v7447_v4  ;;  %vm4915_vm9 = vcmp.eq.s32.totalorder %v4510_v23, %v7450_v61  ;;  %vm4916_vm10 = vcmp.eq.s32.totalorder %v4510_v23, %v7455_v58  ;;  %vm4917_vm11 = vcmp.eq.s32.totalorder %v4510_v23, %v7458_v14 }
 0x4a2   : > { %vm4918_vm12 = vcmp.eq.s32.totalorder %v4510_v23, %v7461_v56  ;;  %vm4919_vm13 = vcmp.eq.s32.totalorder %v4510_v23, %v7464_v41  ;;  %vm4920_vm14 = vcmp.eq.s32.totalorder %v4510_v23, %v7470_v13  ;;  %vm4921_vm15 = vcmp.eq.s32.totalorder %v4510_v23, %v7473_v30 }
 0x4a3   : > { %v5026_v5 = vsel %vm4914_vm8, 1, %v6550_v21  ;;  %v5027_v32 = vsel %vm4915_vm9, 1, %v6550_v21  ;;  %v5028_v47 = vsel %vm4916_vm10, 1, %v6550_v21  ;;  %v5029_v18 = vsel %vm4917_vm11, 1, %v6550_v21  ;;  %v4534_v19 = vpop.xlane.xlu0 %4533 }
 0x4a4   : > { %v5030_v60 = vsel %vm4918_vm12, 1, %v6550_v21  ;;  %v5031_v57 = vsel %vm4919_vm13, 1, %v6550_v21  ;;  %v5032_v54 = vsel %vm4920_vm14, 1, %v6550_v21  ;;  %v5033_v29 = vsel %vm4921_vm15, 1, %v6550_v21 }
 0x4a5   : > { %v5131_v25 = vadd.s32 %v5026_v5, %v5018_v35  ;;  %v5150_v0 = vadd.s32 %v5027_v32, %v5019_v17  ;;  %v5169_v12 = vadd.s32 %v5028_v47, %v5020_v49  ;;  %v5188_v9 = vadd.s32 %v5029_v18, %v5021_v50 }
 0x4a6   : > { %v5207_v45 = vadd.s32 %v5030_v60, %v5022_v55  ;;  %v5226_v10 = vadd.s32 %v5031_v57, %v5023_v3  ;;  %v5245_v63 = vadd.s32 %v5032_v54, %v5024_v40  ;;  %v5264_v1 = vadd.s32 %v5033_v29, %v5025_v7 }
 0x4a7   : > { %v4535_v43 = vcvt.f32.s32 %v4534_v19  ;;  %v4565_v17 = vshll.u32 %v4564_v20, 16  ;;  %v4593_v55 = vshll.u32 %v4592_v48, 16  ;;  %v4620_v3 = vcvt.f32.s32 %v7996_v44 }
 0x4a9   : > { %v4538_v36 = vadd.s32 %v4537_v38, %v4535_v43  ;;  %v4648_v38 = vcvt.f32.s32 %v8001_v27  ;;  %v4676_v43 = vcvt.f32.s32 %v8006_v34 }
 0x4ab   : > { %vm4922_vm0 = vcmp.eq.s32.totalorder %v4538_v36, %v7447_v4  ;;  %vm4923_vm1 = vcmp.eq.s32.totalorder %v4538_v36, %v7450_v61  ;;  %vm4924_vm2 = vcmp.eq.s32.totalorder %v4538_v36, %v7455_v58  ;;  %vm4925_vm3 = vcmp.eq.s32.totalorder %v4538_v36, %v7458_v14 }
 0x4ac   : > { %vm4926_vm4 = vcmp.eq.s32.totalorder %v4538_v36, %v7461_v56  ;;  %vm4927_vm5 = vcmp.eq.s32.totalorder %v4538_v36, %v7464_v41  ;;  %vm4928_vm6 = vcmp.eq.s32.totalorder %v4538_v36, %v7470_v13  ;;  %vm4929_vm7 = vcmp.eq.s32.totalorder %v4538_v36, %v7473_v30  ;;  %v4562_v46 = vpop.xlane.xlu1 %4561 }
 0x4ad   : > { %v5034_v2 = vsel %vm4922_vm0, 1, %v6550_v21  ;;  %v5035_v26 = vsel %vm4923_vm1, 1, %v6550_v21  ;;  %v5036_v51 = vsel %vm4924_vm2, 1, %v6550_v21  ;;  %v5037_v24 = vsel %vm4925_vm3, 1, %v6550_v21 }
 0x4ae   : > { %v5038_v53 = vsel %vm4926_vm4, 1, %v6550_v21  ;;  %v5039_v22 = vsel %vm4927_vm5, 1, %v6550_v21  ;;  %v5040_v31 = vsel %vm4928_vm6, 1, %v6550_v21  ;;  %v5041_v16 = vsel %vm4929_vm7, 1, %v6550_v21 }
 0x4af   : > { %v5132_v33 = vadd.s32 %v5131_v25, %v5034_v2  ;;  %v5151_v6 = vadd.s32 %v5150_v0, %v5035_v26  ;;  %v5170_v59 = vadd.s32 %v5169_v12, %v5036_v51  ;;  %v5189_v8 = vadd.s32 %v5188_v9, %v5037_v24 }
 0x4b0   : > { %v5208_v37 = vadd.s32 %v5207_v45, %v5038_v53  ;;  %v5227_v15 = vadd.s32 %v5226_v10, %v5039_v22  ;;  %v5246_v62 = vadd.s32 %v5245_v63, %v5040_v31  ;;  %v5265_v35 = vadd.s32 %v5264_v1, %v5041_v16 }
 0x4b1   : > { %v4563_v49 = vcvt.f32.s32 %v4562_v46  ;;  %v4621_v1 = vshll.u32 %v4620_v3, 16 }
 0x4b3   : > { %v4566_v23 = vadd.s32 %v4565_v17, %v4563_v49  ;;  %v4677_v17 = vshll.u32 %v4676_v43, 16 }
 0x4b4   : > { %v4590_v50 = vpop.xlane.xlu0 %4589 }
 0x4b5   : > { %v4591_v40 = vcvt.f32.s32 %v4590_v50  ;;  %vm4930_vm8 = vcmp.eq.s32.totalorder %v4566_v23, %v7447_v4  ;;  %vm4931_vm9 = vcmp.eq.s32.totalorder %v4566_v23, %v7450_v61  ;;  %vm4932_vm10 = vcmp.eq.s32.totalorder %v4566_v23, %v7455_v58 }
 0x4b6   : > { %vm4933_vm11 = vcmp.eq.s32.totalorder %v4566_v23, %v7458_v14  ;;  %vm4934_vm12 = vcmp.eq.s32.totalorder %v4566_v23, %v7461_v56  ;;  %vm4935_vm13 = vcmp.eq.s32.totalorder %v4566_v23, %v7464_v41  ;;  %vm4936_vm14 = vcmp.eq.s32.totalorder %v4566_v23, %v7470_v13 }
 0x4b7   : > { %vm4937_vm15 = vcmp.eq.s32.totalorder %v4566_v23, %v7473_v30  ;;  %v5042_v7 = vsel %vm4930_vm8, 1, %v6550_v21  ;;  %v5043_v44 = vsel %vm4931_vm9, 1, %v6550_v21  ;;  %v5044_v5 = vsel %vm4932_vm10, 1, %v6550_v21 }
 0x4b8   : > { %v5045_v32 = vsel %vm4933_vm11, 1, %v6550_v21  ;;  %v5046_v47 = vsel %vm4934_vm12, 1, %v6550_v21  ;;  %v5047_v18 = vsel %vm4935_vm13, 1, %v6550_v21  ;;  %v5048_v60 = vsel %vm4936_vm14, 1, %v6550_v21 }
 0x4b9   : > { %v5049_v57 = vsel %vm4937_vm15, 1, %v6550_v21  ;;  %v5133_v54 = vadd.s32 %v5132_v33, %v5042_v7  ;;  %v5152_v29 = vadd.s32 %v5151_v6, %v5043_v44  ;;  %v5171_v19 = vadd.s32 %v5170_v59, %v5044_v5 }
 0x4ba   : > { %v5190_v25 = vadd.s32 %v5189_v8, %v5045_v32  ;;  %v5209_v12 = vadd.s32 %v5208_v37, %v5046_v47  ;;  %v5228_v9 = vadd.s32 %v5227_v15, %v5047_v18  ;;  %v5247_v45 = vadd.s32 %v5246_v62, %v5048_v60 }
 0x4bb   : > { %v4618_v0 = vpop.xlane.xlu1 %4617  ;;  %v5266_v10 = vadd.s32 %v5265_v35, %v5049_v57  ;;  %v4594_v63 = vadd.s32 %v4593_v55, %v4591_v40  ;;  %v4649_v15 = vshll.u32 %v4648_v38, 16  ;;  %v4704_v62 = vcvt.f32.s32 %v8011_v52 }
 0x4bc   : > { %v4619_v36 = vcvt.f32.s32 %v4618_v0 }
 0x4bd   : > { %vm4938_vm0 = vcmp.eq.s32.totalorder %v4594_v63, %v7447_v4  ;;  %vm4939_vm1 = vcmp.eq.s32.totalorder %v4594_v63, %v7450_v61  ;;  %vm4940_vm2 = vcmp.eq.s32.totalorder %v4594_v63, %v7455_v58  ;;  %vm4941_vm3 = vcmp.eq.s32.totalorder %v4594_v63, %v7458_v14 }
 0x4be   : > { %vm4942_vm4 = vcmp.eq.s32.totalorder %v4594_v63, %v7461_v56  ;;  %vm4943_vm5 = vcmp.eq.s32.totalorder %v4594_v63, %v7464_v41  ;;  %vm4944_vm6 = vcmp.eq.s32.totalorder %v4594_v63, %v7470_v13  ;;  %vm4945_vm7 = vcmp.eq.s32.totalorder %v4594_v63, %v7473_v30 }
 0x4bf   : > { %v5050_v27 = vsel %vm4938_vm0, 1, %v6550_v21  ;;  %v5051_v34 = vsel %vm4939_vm1, 1, %v6550_v21  ;;  %v5052_v20 = vsel %vm4940_vm2, 1, %v6550_v21  ;;  %v5053_v48 = vsel %vm4941_vm3, 1, %v6550_v21 }
 0x4c0   : > { %v5054_v2 = vsel %vm4942_vm4, 1, %v6550_v21  ;;  %v5055_v26 = vsel %vm4943_vm5, 1, %v6550_v21  ;;  %v5056_v51 = vsel %vm4944_vm6, 1, %v6550_v21  ;;  %v5057_v24 = vsel %vm4945_vm7, 1, %v6550_v21 }
 0x4c1   : > { %v5134_v53 = vadd.s32 %v5133_v54, %v5050_v27  ;;  %v5153_v22 = vadd.s32 %v5152_v29, %v5051_v34  ;;  %v5172_v31 = vadd.s32 %v5171_v19, %v5052_v20  ;;  %v5191_v16 = vadd.s32 %v5190_v25, %v5053_v48 }
 0x4c2   : > { %v5210_v46 = vadd.s32 %v5209_v12, %v5054_v2  ;;  %v5229_v33 = vadd.s32 %v5228_v9, %v5055_v26  ;;  %v5248_v6 = vadd.s32 %v5247_v45, %v5056_v51  ;;  %v8123_v59 = vadd.s32 %v5266_v10, %v5057_v24 }
 0x4c3   : > { %v4622_v37 = vadd.s32 %v4621_v1, %v4619_v36  ;;  %v4705_v55 = vshll.u32 %v4704_v62, 16  ;;  %v4732_v19 = vcvt.f32.s32 %v8016_v42  ;;  %v4760_v48 = vcvt.f32.s32 %v8021_v28 }
 0x4c4   : > { %v4646_v8 = vpop.xlane.xlu0 %4645 }
 0x4c5   : > { %v4647_v35 = vcvt.f32.s32 %v4646_v8  ;;  %vm4946_vm8 = vcmp.eq.s32.totalorder %v4622_v37, %v7447_v4  ;;  %vm4947_vm9 = vcmp.eq.s32.totalorder %v4622_v37, %v7450_v61  ;;  %vm4948_vm10 = vcmp.eq.s32.totalorder %v4622_v37, %v7455_v58 }
 0x4c6   : > { %vm4949_vm11 = vcmp.eq.s32.totalorder %v4622_v37, %v7458_v14  ;;  %vm4950_vm12 = vcmp.eq.s32.totalorder %v4622_v37, %v7461_v56  ;;  %vm4951_vm13 = vcmp.eq.s32.totalorder %v4622_v37, %v7464_v41  ;;  %vm4952_vm14 = vcmp.eq.s32.totalorder %v4622_v37, %v7470_v13 }
 0x4c7   : > { %v5058_v49 = vsel %vm4946_vm8, 1, %v6550_v21  ;;  %v5059_v52 = vsel %vm4947_vm9, 1, %v6550_v21  ;;  %v5060_v50 = vsel %vm4948_vm10, 1, %v6550_v21  ;;  %v5061_v23 = vsel %vm4949_vm11, 1, %v6550_v21 }
 0x4c8   : > { %v5062_v3 = vsel %vm4950_vm12, 1, %v6550_v21  ;;  %v5063_v40 = vsel %vm4951_vm13, 1, %v6550_v21  ;;  %v5064_v7 = vsel %vm4952_vm14, 1, %v6550_v21  ;;  %v4650_v44 = vadd.s32 %v4649_v15, %v4647_v35 }
 0x4c9   : > { %v5135_v5 = vadd.s32 %v5134_v53, %v5058_v49  ;;  %v5154_v32 = vadd.s32 %v5153_v22, %v5059_v52  ;;  %v5173_v47 = vadd.s32 %v5172_v31, %v5060_v50  ;;  %v5192_v60 = vadd.s32 %v5191_v16, %v5061_v23 }
 0x4ca   : > { %v5211_v57 = vadd.s32 %v5210_v46, %v5062_v3  ;;  %v5230_v54 = vadd.s32 %v5229_v33, %v5063_v40  ;;  %v8140_v29 = vadd.s32 %v5248_v6, %v5064_v7  ;;  %vm4954_vm15 = vcmp.eq.s32.totalorder %v4650_v44, %v7447_v4 }
 0x4cb   : > { %vm4955_vm0 = vcmp.eq.s32.totalorder %v4650_v44, %v7450_v61  ;;  %vm4956_vm1 = vcmp.eq.s32.totalorder %v4650_v44, %v7455_v58  ;;  %vm4957_vm2 = vcmp.eq.s32.totalorder %v4650_v44, %v7458_v14  ;;  %vm4953_vm3 = vcmp.eq.s32.totalorder %v4622_v37, %v7473_v30 }
 0x4cc   : > { %v4674_v18 = vpop.xlane.xlu1 %4673  ;;  %vm4958_vm4 = vcmp.eq.s32.totalorder %v4650_v44, %v7461_v56  ;;  %vm4959_vm5 = vcmp.eq.s32.totalorder %v4650_v44, %v7464_v41  ;;  %v5066_v0 = vsel %vm4954_vm15, 1, %v6550_v21  ;;  %v5067_v12 = vsel %vm4955_vm0, 1, %v6550_v21 }
 0x4cd   : > { %v4675_v25 = vcvt.f32.s32 %v4674_v18  ;;  %v5068_v9 = vsel %vm4956_vm1, 1, %v6550_v21  ;;  %vm4960_vm6 = vcmp.eq.s32.totalorder %v4650_v44, %v7470_v13  ;;  %v5069_v45 = vsel %vm4957_vm2, 1, %v6550_v21 }
 0x4ce   : > { %v5070_v10 = vsel %vm4958_vm4, 1, %v6550_v21  ;;  %v5071_v42 = vsel %vm4959_vm5, 1, %v6550_v21  ;;  %vm4961_vm7 = vcmp.eq.s32.totalorder %v4650_v44, %v7473_v30  ;;  %v5136_v1 = vadd.s32 %v5135_v5, %v5066_v0 }
 0x4cf   : > { %v8158_v63 = vadd.s32 %v4677_v17, %v4675_v25  ;;  %v5155_v38 = vadd.s32 %v5154_v32, %v5067_v12  ;;  %v5174_v43 = vadd.s32 %v5173_v47, %v5068_v9  ;;  %v5193_v36 = vadd.s32 %v5192_v60, %v5069_v45 }
 0x4d0   : > { %v5212_v27 = vadd.s32 %v5211_v57, %v5070_v10  ;;  %v5231_v34 = vadd.s32 %v5230_v54, %v5071_v42  ;;  %v4733_v20 = vshll.u32 %v4732_v19, 16  ;;  %v5065_v26 = vsel %vm4953_vm3, 1, %v6550_v21 }
 0x4d1   : > { %vm4962_vm8 = vcmp.eq.s32.totalorder %v8158_v63, %v7447_v4  ;;  %vm4963_vm9 = vcmp.eq.s32.totalorder %v8158_v63, %v7450_v61  ;;  %vm4964_vm10 = vcmp.eq.s32.totalorder %v8158_v63, %v7455_v58  ;;  %v5072_v24 = vsel %vm4960_vm6, 1, %v6550_v21 }
 0x4d2   : > { %vm4965_vm11 = vcmp.eq.s32.totalorder %v8158_v63, %v7458_v14  ;;  %v5073_v28 = vsel %vm4961_vm7, 1, %v6550_v21  ;;  %v5074_v53 = vsel %vm4962_vm8, 1, %v6550_v21  ;;  %v5075_v22 = vsel %vm4963_vm9, 1, %v6550_v21 }
 0x4d3   : > { %v4702_v2 = vpop.xlane.xlu0 %4701  ;;  %vm4966_vm12 = vcmp.eq.s32.totalorder %v8158_v63, %v7461_v56  ;;  %vm4967_vm13 = vcmp.eq.s32.totalorder %v8158_v63, %v7464_v41  ;;  %vm4968_vm14 = vcmp.eq.s32.totalorder %v8158_v63, %v7470_v13  ;;  %vm4969_vm15 = vcmp.eq.s32.totalorder %v8158_v63, %v7473_v30 }
 0x4d4   : > { %v4703_v51 = vcvt.f32.s32 %v4702_v2  ;;  %v5076_v16 = vsel %vm4964_vm10, 1, %v6550_v21  ;;  %v5137_v46 = vadd.s32 %v5136_v1, %v5074_v53  ;;  %v5156_v33 = vadd.s32 %v5155_v38, %v5075_v22 }
 0x4d5   : > { %v5077_v6 = vsel %vm4965_vm11, 1, %v6550_v21  ;;  %v5078_v8 = vsel %vm4966_vm12, 1, %v6550_v21  ;;  %v5079_v37 = vsel %vm4967_vm13, 1, %v6550_v21  ;;  %v5080_v15 = vsel %vm4968_vm14, 1, %v6550_v21 }
 0x4d6   : > { %v8180_v31 = vadd.s32 %v4705_v55, %v4703_v51  ;;  %v5175_v40 = vadd.s32 %v5174_v43, %v5076_v16  ;;  %v5194_v7 = vadd.s32 %v5193_v36, %v5077_v6  ;;  %v5213_v5 = vadd.s32 %v5212_v27, %v5078_v8 }
 0x4d7   : > { %v5232_v32 = vadd.s32 %v5231_v34, %v5079_v37  ;;  %v5250_v47 = vadd.s32 %v8140_v29, %v5072_v24  ;;  %v5268_v57 = vadd.s32 %v8123_v59, %v5065_v26  ;;  %v4761_v12 = vshll.u32 %v4760_v48, 16 }
 0x4d8   : > { %vm4970_vm0 = vcmp.eq.s32.totalorder %v8180_v31, %v7447_v4  ;;  %vm4971_vm1 = vcmp.eq.s32.totalorder %v8180_v31, %v7450_v61  ;;  %vm4972_vm2 = vcmp.eq.s32.totalorder %v8180_v31, %v7455_v58  ;;  %vm4973_vm3 = vcmp.eq.s32.totalorder %v8180_v31, %v7458_v14 }
 0x4d9   : > { %vm4974_vm4 = vcmp.eq.s32.totalorder %v8180_v31, %v7461_v56  ;;  %vm4975_vm5 = vcmp.eq.s32.totalorder %v8180_v31, %v7464_v41  ;;  %v5082_v62 = vsel %vm4970_vm0, 1, %v6550_v21  ;;  %v5083_v35 = vsel %vm4971_vm1, 1, %v6550_v21 }
 0x4da   : > { %v5084_v17 = vsel %vm4972_vm2, 1, %v6550_v21  ;;  %v5085_v49 = vsel %vm4973_vm3, 1, %v6550_v21  ;;  %v5086_v52 = vsel %vm4974_vm4, 1, %v6550_v21  ;;  %v5087_v50 = vsel %vm4975_vm5, 1, %v6550_v21 }
 0x4db   : > { %v5138_v55 = vadd.s32 %v5137_v46, %v5082_v62  ;;  %v5157_v3 = vadd.s32 %v5156_v33, %v5083_v35  ;;  %vm4976_vm6 = vcmp.eq.s32.totalorder %v8180_v31, %v7470_v13  ;;  %v5176_v18 = vadd.s32 %v5175_v40, %v5084_v17  ;;  %v8586_v46 = vld [vmem:[#allocation14_spill] sm:$0xff] }
 0x4dc   : > { %v4730_v23 = vpop.xlane.xlu1 %4729  ;;  %v5195_v60 = vadd.s32 %v5194_v7, %v5085_v49  ;;  %v5214_v19 = vadd.s32 %v5213_v5, %v5086_v52  ;;  %v5233_v25 = vadd.s32 %v5232_v32, %v5087_v50  ;;  %v5251_v0 = vadd.s32 %v5250_v47, %v5080_v15 }
 0x4dd   : > { %v4731_v44 = vcvt.f32.s32 %v4730_v23  ;;  %v4788_v9 = vcvt.f32.s32 %v8026_v39  ;;  %v5081_v29 = vsel %vm4969_vm15, 1, %v6550_v21  ;;  %v5269_v45 = vadd.s32 %v5268_v57, %v5073_v28 }
 0x4de   : > { %v5088_v39 = vsel %vm4976_vm6, 1, %v6550_v21  ;;  %vm4977_vm14 = vcmp.eq.s32.totalorder %v8180_v31, %v7473_v30  ;;  %v4816_v53 = vcvt.f32.s32 %v8031_v11  ;;  %v8256_v33 = vadd.s32 96, %v8586_v46 }
 0x4df   : > { %v8220_v54 = vadd.s32 %v4733_v20, %v4731_v44  ;;  %v5252_v24 = vadd.s32 %v5251_v0, %v5088_v39  ;;  %v4789_v28 = vshll.u32 %v4788_v9, 16  ;;  %v5270_v16 = vadd.s32 %v5269_v45, %v5081_v29 }
 0x4e0   : > { %v5089_v6 = vsel %vm4977_vm14, 1, %v6550_v21 }
 0x4e1   : > { %vm4978_vm7 = vcmp.eq.s32.totalorder %v8220_v54, %v7447_v4  ;;  %vm4979_vm8 = vcmp.eq.s32.totalorder %v8220_v54, %v7450_v61  ;;  %vm4980_vm9 = vcmp.eq.s32.totalorder %v8220_v54, %v7455_v58  ;;  %vm4981_vm10 = vcmp.eq.s32.totalorder %v8220_v54, %v7458_v14 }
 0x4e2   : > { %vm4982_vm11 = vcmp.eq.s32.totalorder %v8220_v54, %v7461_v56  ;;  %vm4983_vm12 = vcmp.eq.s32.totalorder %v8220_v54, %v7464_v41  ;;  %vm4984_vm13 = vcmp.eq.s32.totalorder %v8220_v54, %v7470_v13  ;;  %v5090_v59 = vsel %vm4978_vm7, 1, %v6550_v21 }
 0x4e3   : > { %v5091_v10 = vsel %vm4979_vm8, 1, %v6550_v21  ;;  %v5092_v42 = vsel %vm4980_vm9, 1, %v6550_v21  ;;  %v5093_v63 = vsel %vm4981_vm10, 1, %v6550_v21  ;;  %v4758_v1 = vpop.xlane.xlu0 %4757  ;;  %v5094_v38 = vsel %vm4982_vm11, 1, %v6550_v21 }
 0x4e4   : > { %v5095_v43 = vsel %vm4983_vm12, 1, %v6550_v21  ;;  %v5096_v36 = vsel %vm4984_vm13, 1, %v6550_v21  ;;  %v4759_v27 = vcvt.f32.s32 %v4758_v1  ;;  %v5139_v34 = vadd.s32 %v5138_v55, %v5090_v59 }
 0x4e5   : > { %v5158_v20 = vadd.s32 %v5157_v3, %v5091_v10  ;;  %v5177_v48 = vadd.s32 %v5176_v18, %v5092_v42  ;;  %v5196_v2 = vadd.s32 %v5195_v60, %v5093_v63  ;;  %v5215_v26 = vadd.s32 %v5214_v19, %v5094_v38 }
 0x4e6   : > { %v5234_v51 = vadd.s32 %v5233_v25, %v5095_v43  ;;  %v4762_v22 = vadd.s32 %v4761_v12, %v4759_v27  ;;  %v5253_v8 = vadd.s32 %v5252_v24, %v5096_v36  ;;  %vm4985_vm3 = vcmp.eq.s32.totalorder %v8220_v54, %v7473_v30 }
 0x4e7   : > { %v5097_v5 = vsel %vm4985_vm3, 1, %v6550_v21  ;;  %v5271_v47 = vadd.s32 %v5270_v16, %v5089_v6  ;;  %v6551_v18 = vmov 1966171168   ;;  %v4817_v36 = vshll.u32 %v4816_v53, 16 }
 0x4e8   : > { %vm4986_vm15 = vcmp.eq.s32.totalorder %v4762_v22, %v7447_v4  ;;  %vm4987_vm0 = vcmp.eq.s32.totalorder %v4762_v22, %v7450_v61  ;;  %vm4988_vm1 = vcmp.eq.s32.totalorder %v4762_v22, %v7455_v58  ;;  %vm4989_vm2 = vcmp.eq.s32.totalorder %v4762_v22, %v7458_v14 }
 0x4e9   : > { %vm4990_vm4 = vcmp.eq.s32.totalorder %v4762_v22, %v7461_v56  ;;  %vm4991_vm5 = vcmp.eq.s32.totalorder %v4762_v22, %v7464_v41  ;;  %vm4992_vm6 = vcmp.eq.s32.totalorder %v4762_v22, %v7470_v13  ;;  %v5098_v31 = vsel %vm4986_vm15, 1, %v6550_v21 }
 0x4ea   : > { %v5099_v37 = vsel %vm4987_vm0, 1, %v6550_v21  ;;  %v5100_v15 = vsel %vm4988_vm1, 1, %v6550_v21  ;;  %v5101_v62 = vsel %vm4989_vm2, 1, %v6550_v21  ;;  %v5102_v17 = vsel %vm4990_vm4, 1, %v6550_v21 }
 0x4eb   : > { %v4786_v11 = vpop.xlane.xlu1 %4785  ;;  %v5103_v49 = vsel %vm4991_vm5, 1, %v6550_v21  ;;  %v5104_v52 = vsel %vm4992_vm6, 1, %v6550_v21  ;;  %vm4993_vm7 = vcmp.eq.s32.totalorder %v4762_v22, %v7473_v30  ;;  %v5140_v50 = vadd.s32 %v5139_v34, %v5098_v31 }
 0x4ec   : > { %v4787_v35 = vcvt.f32.s32 %v4786_v11  ;;  %v5159_v23 = vadd.s32 %v5158_v20, %v5099_v37  ;;  %v5178_v55 = vadd.s32 %v5177_v48, %v5100_v15  ;;  %v5197_v40 = vadd.s32 %v5196_v2, %v5101_v62 }
 0x4ed   : > { %v5216_v7 = vadd.s32 %v5215_v26, %v5102_v17  ;;  %v5235_v44 = vadd.s32 %v5234_v51, %v5103_v49  ;;  %v5254_v32 = vadd.s32 %v5253_v8, %v5104_v52  ;;  %v5288_v60 = vunpack.c.l.s4 %v6551_v18 }
 0x4ee   : > { %v4790_v3 = vadd.s32 %v4789_v28, %v4787_v35  ;;  %v5105_v57 = vsel %vm4993_vm7, 1, %v6550_v21  ;;  %v5272_v43 = vadd.s32 %v5271_v47, %v5097_v5  ;;  %vm4890_vm0 = vcmp.lt.s32.totalorder %v8256_v33, 100 }
 0x4ef   : > { %v5289_v34 = vunpack.c.0.s8 %v5288_v60 }
 0x4f0   : > { %vm4994_vm8 = vcmp.eq.s32.totalorder %v4790_v3, %v7447_v4  ;;  %vm4995_vm9 = vcmp.eq.s32.totalorder %v4790_v3, %v7450_v61  ;;  %vm4996_vm10 = vcmp.eq.s32.totalorder %v4790_v3, %v7455_v58  ;;  %vm4997_vm11 = vcmp.eq.s32.totalorder %v4790_v3, %v7458_v14 }
 0x4f1   : > { %vm4998_vm12 = vcmp.eq.s32.totalorder %v4790_v3, %v7461_v56  ;;  %vm4999_vm13 = vcmp.eq.s32.totalorder %v4790_v3, %v7464_v41  ;;  %vm5000_vm14 = vcmp.eq.s32.totalorder %v4790_v3, %v7470_v13  ;;  %v5106_v54 = vsel %vm4994_vm8, 1, %v6550_v21 }
 0x4f2   : > { %v5107_v19 = vsel %vm4995_vm9, 1, %v6550_v21  ;;  %v5108_v25 = vsel %vm4996_vm10, 1, %v6550_v21  ;;  %v5109_v0 = vsel %vm4997_vm11, 1, %v6550_v21  ;;  %vm5001_vm15 = vcmp.eq.s32.totalorder %v4790_v3, %v7473_v30 }
 0x4f3   : > { %v5110_v12 = vsel %vm4998_vm12, 1, %v6550_v21  ;;  %v5111_v9 = vsel %vm4999_vm13, 1, %v6550_v21  ;;  %v5112_v29 = vsel %vm5000_vm14, 1, %v6550_v21  ;;  %v5141_v45 = vadd.s32 %v5140_v50, %v5106_v54  ;;  %v4814_v42 = vpop.xlane.xlu0 %4813 }
 0x4f4   : > { %v5160_v39 = vadd.s32 %v5159_v23, %v5107_v19  ;;  %v5179_v59 = vadd.s32 %v5178_v55, %v5108_v25  ;;  %v5198_v10 = vadd.s32 %v5197_v40, %v5109_v0  ;;  %v5217_v63 = vadd.s32 %v5216_v7, %v5110_v12 }
 0x4f5   : > { %v5236_v1 = vadd.s32 %v5235_v44, %v5111_v9  ;;  %v5255_v38 = vadd.s32 %v5254_v32, %v5112_v29  ;;  %v5113_v27 = vsel %vm5001_vm15, 1, %v6550_v21  ;;  %v4815_v20 = vcvt.f32.s32 %v4814_v42 }
 0x4f6   : > { %v5273_v48 = vadd.s32 %v5272_v43, %v5105_v57  ;;  %v8304_v51 = vsub.s32 %v5289_v34, %v8586_v46 }
 0x4f7   : > { %v4818_v2 = vadd.s32 %v4817_v36, %v4815_v20 }
 0x4f8   : > { %v5274_v26 = vadd.s32 %v5273_v48, %v5113_v27 }
 0x4f9   : > { %v4904_v24 = vsel %vm4890_vm0, %v4818_v2, 1024 }
 0x4fa   : > { %vm5002_vm1 = vcmp.eq.s32.totalorder %v4904_v24, %v7447_v4  ;;  %vm5003_vm2 = vcmp.eq.s32.totalorder %v4904_v24, %v7450_v61  ;;  %vm5004_vm3 = vcmp.eq.s32.totalorder %v4904_v24, %v7455_v58  ;;  %vm5005_vm4 = vcmp.eq.s32.totalorder %v4904_v24, %v7458_v14 }
 0x4fb   : > { %vm5006_vm5 = vcmp.eq.s32.totalorder %v4904_v24, %v7461_v56  ;;  %vm5007_vm6 = vcmp.eq.s32.totalorder %v4904_v24, %v7464_v41  ;;  %vm5008_vm7 = vcmp.eq.s32.totalorder %v4904_v24, %v7470_v13  ;;  %vm5009_vm8 = vcmp.eq.s32.totalorder %v4904_v24, %v7473_v30 }
 0x4fc   : > { %v5114_v28 = vsel %vm5002_vm1, 1, %v6550_v21  ;;  %v5115_v53 = vsel %vm5003_vm2, 1, %v6550_v21  ;;  %v5116_v4 = vsel %vm5004_vm3, 1, %v6550_v21  ;;  %v5117_v61 = vsel %vm5005_vm4, 1, %v6550_v21 }
 0x4fd   : > { %v5118_v58 = vsel %vm5006_vm5, 1, %v6550_v21  ;;  %v5119_v14 = vsel %vm5007_vm6, 1, %v6550_v21  ;;  %v5120_v56 = vsel %vm5008_vm7, 1, %v6550_v21  ;;  %v5121_v41 = vsel %vm5009_vm8, 1, %v6550_v21 }
 0x4fe   : > { %v5142_v22 = vadd.s32 %v5141_v45, %v5114_v28  ;;  %v5161_v13 = vadd.s32 %v5160_v39, %v5115_v53  ;;  %v5180_v16 = vadd.s32 %v5179_v59, %v5116_v4  ;;  %v5199_v30 = vadd.s32 %v5198_v10, %v5117_v61 }
 0x4ff   : > { %v5218_v46 = vadd.s32 %v5217_v63, %v5118_v58  ;;  %v5237_v33 = vadd.s32 %v5236_v1, %v5119_v14  ;;  %v5256_v6 = vadd.s32 %v5255_v38, %v5120_v56  ;;  %v5275_v8 = vadd.s32 %v5274_v26, %v5121_v41 }
 0x500   : > { %v5144_v11 = vrot.slane %v5142_v22, 4  ;;  %v5163_v31 = vrot.slane %v5161_v13, 4  ;;  %v5182_v37 = vrot.slane %v5180_v16, 4  ;;  %v5201_v15 = vrot.slane %v5199_v30, 4 }
 0x501   : > { %v5220_v62 = vrot.slane %v5218_v46, 4  ;;  %v5239_v35 = vrot.slane %v5237_v33, 4  ;;  %v5258_v17 = vrot.slane %v5256_v6, 4  ;;  %v5277_v49 = vrot.slane %v5275_v8, 4 }
 0x502   : > { %v5145_v52 = vadd.s32 %v5144_v11, %v5142_v22  ;;  %v5164_v50 = vadd.s32 %v5163_v31, %v5161_v13  ;;  %v5183_v23 = vadd.s32 %v5182_v37, %v5180_v16  ;;  %v5202_v21 = vadd.s32 %v5201_v15, %v5199_v30 }
 0x503   : > { %v5221_v55 = vadd.s32 %v5220_v62, %v5218_v46  ;;  %v5240_v3 = vadd.s32 %v5239_v35, %v5237_v33  ;;  %v5259_v40 = vadd.s32 %v5258_v17, %v5256_v6  ;;  %v5278_v7 = vadd.s32 %v5277_v49, %v5275_v8 }
 0x504   : > { %v5146_v44 = vrot.slane %v5145_v52, 2  ;;  %v5165_v5 = vrot.slane %v5164_v50, 2  ;;  %v5184_v32 = vrot.slane %v5183_v23, 2  ;;  %v5203_v47 = vrot.slane %v5202_v21, 2 }
 0x505   : > { %v5222_v18 = vrot.slane %v5221_v55, 2  ;;  %v5241_v60 = vrot.slane %v5240_v3, 2  ;;  %v5260_v57 = vrot.slane %v5259_v40, 2  ;;  %v5279_v54 = vrot.slane %v5278_v7, 2 }
 0x506   : > { %v5147_v19 = vadd.s32 %v5146_v44, %v5145_v52  ;;  %v5166_v25 = vadd.s32 %v5165_v5, %v5164_v50  ;;  %v5185_v0 = vadd.s32 %v5184_v32, %v5183_v23  ;;  %v5204_v12 = vadd.s32 %v5203_v47, %v5202_v21 }
 0x507   : > { %v5223_v9 = vadd.s32 %v5222_v18, %v5221_v55  ;;  %v5242_v29 = vadd.s32 %v5241_v60, %v5240_v3  ;;  %v5261_v45 = vadd.s32 %v5260_v57, %v5259_v40  ;;  %v5280_v39 = vadd.s32 %v5279_v54, %v5278_v7 }
 0x508   : > { %v5148_v59 = vrot.slane %v5147_v19, 1  ;;  %v5167_v10 = vrot.slane %v5166_v25, 1  ;;  %v5186_v42 = vrot.slane %v5185_v0, 1  ;;  %v5205_v63 = vrot.slane %v5204_v12, 1 }
 0x509   : > { %v5224_v1 = vrot.slane %v5223_v9, 1  ;;  %v5243_v38 = vrot.slane %v5242_v29, 1  ;;  %v5262_v43 = vrot.slane %v5261_v45, 1  ;;  %v5281_v36 = vrot.slane %v5280_v39, 1 }
 0x50a   : > { %v5149_v27 = vadd.s32 %v5148_v59, %v5147_v19  ;;  %v5168_v34 = vadd.s32 %v5167_v10, %v5166_v25  ;;  %v5187_v20 = vadd.s32 %v5186_v42, %v5185_v0  ;;  %v5206_v48 = vadd.s32 %v5205_v63, %v5204_v12 }
 0x50b   : > { %v5225_v2 = vadd.s32 %v5224_v1, %v5223_v9  ;;  %v5244_v26 = vadd.s32 %v5243_v38, %v5242_v29  ;;  %v5263_v24 = vadd.s32 %v5262_v43, %v5261_v45  ;;  %v5282_v28 = vadd.s32 %v5281_v36, %v5280_v39 }
 0x50c   : > { %v5283_v53 = vcombine.low %v5149_v27, %v5168_v34  ;;  %v5284_v4 = vcombine.low %v5187_v20, %v5206_v48 }
 0x50d   : > { %v5285_v61 = vcombine.low %v5225_v2, %v5244_v26  ;;  %v5286_v58 = vcombine.low %v5263_v24, %v5282_v28 }
 0x50e   : > { %v5293_v14 = vrot.slane %v5283_v53, %v8304_v51  ;;  %v5300_v56 = vrot.slane %v5284_v4, %v8304_v51 }
 0x50f   : > { %v5307_v41 = vrot.slane %v5285_v61, %v8304_v51  ;;  %v5314_v22 = vrot.slane %v5286_v58, %v8304_v51 }
 0x510   : > { %v5315_v13 = vcombine.low %v5293_v14, %v5300_v56 }
 0x511   : > { %v5316_v16 = vcombine.low %v5307_v41, %v5314_v22 }
 0x512   : > { %v5323_v30 = vrot.slane %v5315_v13, %v8304_v51 }
 0x513   : > { %v5330_v46 = vrot.slane %v5316_v16, %v8304_v51 }
 0x515   : > { %v5331_v33 = vcombine.low %v5323_v30, %v5330_v46 }
 0x517   : > { %5333 = vst [vmem:[%s256_s11] sm:$0xff] %v5331_v33 }
 0x518 PF: > { %s17_s17 = sadd.s32 1, %s6541_s17   ;;  %s8587_s12 = smov %s6525_s13 }
 0x519   : > { %p14_p10 = scmp.ge.s32.totalorder %s17_s17, 4   ;;  %s8588_s13 = smov %s6529_s14 }
 0x51a   : > { %s8589_s14 = smov %s6616_s24  ;;  %s8590_s15 = smov %s6537_s16 }
 0x51b   : > { %s8591_s16 = smov %s8593_s18  ;;  %16 = sbr.rel (!%p14_p10) target bundleno = 5 (0x5), region = 91 }
 0x522   :  { %5353 = vsyncpa [#allocation3], 1 }
 0x523   :  { %5355 = vsyncpa [#allocation3 + $0x1], 1 }
 0x524   :  { %5356 = vsyncpa [#allocation5], 1 }

</bundles_post_ra>
